<compile_context>
chip_gen: v7x
topology: tpu7x:2x2x1
jax: 0.10.0
libtpu: 0.0.40
codegen_flags: <defaults>
</compile_context>

<pallas_src>
import math
from functools import partial

import jax
import jax.numpy as jnp
from jax import lax
from jax.experimental import pallas as pl
from jax.experimental.pallas import tpu as pltpu


# ------------------------- config -------------------------
class Config:
    vocab_size = 128
    embed_size = 32
    num_heads = 4
    num_layers = 2
    max_len = 16
    block_size = 16
    dropout = 0.0  # eval mode -> identity


EPS = 1e-5
NEG_INF = -1e30


# ------------------------- fused Pallas kernel -------------------------
def _layernorm(x, w, b):
    # f32 statistics (keep elementwise math f32; VPU/EUP have no bf16 on v5e).
    mu = jnp.mean(x, axis=-1, keepdims=True)
    var = jnp.mean((x - mu) ** 2, axis=-1, keepdims=True)
    return (x - mu) * lax.rsqrt(var + EPS) * w + b


def gpt_kernel(x_ref, *refs, num_layers, num_heads, batch, seqlen):
    """Fused GPT forward.  x_ref: (B*T, E) f32.  refs = per-layer weights
    (12 each), final LN + lm_head (4), then out_ref (B*T, V) f32."""
    out_ref = refs[-1]
    w_refs = refs[:-1]

    x = x_ref[...]                       # (BT, E) f32
    BT, E = x.shape
    B, T = batch, seqlen
    H = num_heads
    hd = E // H
    scale = 1.0 / math.sqrt(hd)

    # Causal mask as an additive bias, built ONCE (hoisted out of layer loop).
    rows = lax.broadcasted_iota(jnp.int32, (T, T), 0)
    cols = lax.broadcasted_iota(jnp.int32, (T, T), 1)
    mask_bias = jnp.where(rows >= cols, 0.0, NEG_INF).astype(jnp.float32)
    mask_bias = mask_bias[None, :, :]    # (1, T, T) -> broadcast over batch

    for l in range(num_layers):
        (ln1w, ln1b, wqkv, bqkv, wo, bo,
         ln2w, ln2b, w1, b1, w2, b2) = w_refs[l * 12:(l + 1) * 12]

        # ---- attention sub-block ----
        xn = _layernorm(x, ln1w[...], ln1b[...])                       # f32
        qkv = jnp.dot(xn.astype(jnp.bfloat16), wqkv[...],
                      preferred_element_type=jnp.float32) + bqkv[...]  # (BT, 3E) f32
        qkv_b = qkv.astype(jnp.bfloat16)
        wo_b = wo[...]                                                 # (E, E) bf16

        acc = jnp.zeros((BT, E), jnp.float32)
        for h in range(H):
            qh = qkv_b[:, h * hd:(h + 1) * hd].reshape(B, T, hd)
            kh = qkv_b[:, E + h * hd:E + (h + 1) * hd].reshape(B, T, hd)
            vh = qkv_b[:, 2 * E + h * hd:2 * E + (h + 1) * hd].reshape(B, T, hd)

            att = jnp.einsum('bqd,bkd->bqk', qh, kh,
                             preferred_element_type=jnp.float32) * scale
            att = att + mask_bias                                      # causal
            att = att - jnp.max(att, axis=-1, keepdims=True)           # f32 softmax
            p = jnp.exp(att)
            p = p * pl.reciprocal(jnp.sum(p, axis=-1, keepdims=True), approx=True)

            oh = jnp.einsum('bqk,bkd->bqd', p.astype(jnp.bfloat16), vh,
                            preferred_element_type=jnp.float32)        # (B, T, hd)
            # accumulate straight into the output projection (no concat)
            acc = acc + jnp.dot(oh.reshape(BT, hd).astype(jnp.bfloat16),
                                wo_b[h * hd:(h + 1) * hd, :],
                                preferred_element_type=jnp.float32)
        x = x + acc + bo[...]

        # ---- MLP sub-block ----
        xn2 = _layernorm(x, ln2w[...], ln2b[...])
        h1 = jnp.dot(xn2.astype(jnp.bfloat16), w1[...],
                     preferred_element_type=jnp.float32) + b1[...]
        h1 = jax.nn.gelu(h1)
        h2 = jnp.dot(h1.astype(jnp.bfloat16), w2[...],
                     preferred_element_type=jnp.float32) + b2[...]
        x = x + h2

    # ---- final LN + lm_head (lane-dense V-wide output) ----
    lnf_w, lnf_b, wlm, blm = w_refs[num_layers * 12:num_layers * 12 + 4]
    xf = _layernorm(x, lnf_w[...], lnf_b[...])
    out_ref[...] = jnp.dot(xf.astype(jnp.bfloat16), wlm[...],
                           preferred_element_type=jnp.float32) + blm[...]


# ------------------------- wrapper -------------------------
def run_gpt(x2d, kernel_weights, *, num_layers, num_heads, batch, seqlen, vocab):
    BT, E = x2d.shape

    def full_spec(a):
        nd = a.ndim
        return pl.BlockSpec(a.shape, lambda i: (0,) * nd)

    in_specs = [full_spec(x2d)] + [full_spec(p) for p in kernel_weights]

    return pl.pallas_call(
        partial(gpt_kernel, num_layers=num_layers, num_heads=num_heads,
                batch=batch, seqlen=seqlen),
        out_shape=jax.ShapeDtypeStruct((BT, vocab), jnp.float32),
        grid_spec=pltpu.PrefetchScalarGridSpec(
            num_scalar_prefetch=0,
            grid=(1,),                                   # single fused step
            in_specs=in_specs,
            out_specs=pl.BlockSpec((BT, vocab), lambda i: (0, 0)),
        ),
        compiler_params=pltpu.CompilerParams(dimension_semantics=("arbitrary",)),
    )(x2d, *kernel_weights)


# ------------------------- parameter init -------------------------
def init_params(cfg, key):
    E, V, L, Hid = cfg.embed_size, cfg.vocab_size, cfg.num_layers, 4 * cfg.embed_size
    keys = jax.random.split(key, 4 + L)

    def dense(k, fan_in, fan_out):
        # matmul weights stored in bf16 ([in, out] layout so kernels do x @ W)
        return (jax.random.normal(k, (fan_in, fan_out), jnp.float32) * 0.02
                ).astype(jnp.bfloat16)

    # tied embedding / lm_head weight: wte = lm_head.weight, stored as (V, E) f32;
    # lm_head matmul weight pre-transposed to (E, V) bf16 at init (no per-call .T).
    wte = jax.random.normal(keys[0], (V, E), jnp.float32) * 0.02
    wpe = jax.random.normal(keys[1], (cfg.max_len, E), jnp.float32) * 0.02
    wlm = wte.T.astype(jnp.bfloat16)                 # (E, V)
    lm_bias = jnp.zeros((1, V), jnp.float32)
    lnf_w = jnp.ones((1, E), jnp.float32)
    lnf_b = jnp.zeros((1, E), jnp.float32)

    flat = []
    for l in range(L):
        bk = jax.random.split(keys[4 + l], 4)
        flat.extend([
            jnp.ones((1, E), jnp.float32), jnp.zeros((1, E), jnp.float32),     # ln1
            dense(bk[0], E, 3 * E), jnp.zeros((1, 3 * E), jnp.float32),        # qkv
            dense(bk[1], E, E), jnp.zeros((1, E), jnp.float32),                # attn out proj
            jnp.ones((1, E), jnp.float32), jnp.zeros((1, E), jnp.float32),     # ln2
            dense(bk[2], E, Hid), jnp.zeros((1, Hid), jnp.float32),            # mlp fc
            dense(bk[3], Hid, E), jnp.zeros((1, E), jnp.float32),              # mlp proj
        ])
    flat.extend([lnf_w, lnf_b, wlm, lm_bias])

    return dict(wte=wte, wpe=wpe, kernel_weights=tuple(flat))


# ------------------------- GPT forward -------------------------
def gpt_forward(idx, params, cfg, target=None):
    B, T = idx.shape
    assert T <= cfg.block_size, \
        f"Input tokens length {T} exceeds maximum length {cfg.block_size}"

    # embedding gathers (plain JAX glue)
    tok_embed = jnp.take(params["wte"], idx, axis=0)          # (B, T, E)
    pos_embed = params["wpe"][:T][None, :, :]                 # (1, T, E)
    x2d = (tok_embed + pos_embed).astype(jnp.float32).reshape(B * T, cfg.embed_size)

    logits2d = run_gpt(x2d, params["kernel_weights"],
                       num_layers=cfg.num_layers, num_heads=cfg.num_heads,
                       batch=B, seqlen=T, vocab=cfg.vocab_size)
    logits = logits2d.reshape(B, T, cfg.vocab_size)

    loss = None
    if target is not None:
        logp = jax.nn.log_softmax(logits.reshape(-1, logits.shape[-1]), axis=-1)
        loss = -jnp.mean(jnp.take_along_axis(logp, target.reshape(-1, 1), axis=-1))
    return logits, loss


# ------------------------- main -------------------------
if __name__ == "__main__":
    cfg = Config()
    key = jax.random.PRNGKey(0)
    pkey, ikey = jax.random.split(key)

    params = init_params(cfg, pkey)

    B, T = 2, 8
    idx = jax.random.randint(ikey, (B, T), 0, cfg.vocab_size, dtype=jnp.int32)

    logits, loss = gpt_forward(idx, params, cfg, target=None)
    jax.block_until_ready(logits)

    assert logits.shape == (B, T, cfg.vocab_size)
    assert logits.dtype == jnp.float32
    print("KERNEL_OK")
</pallas_src>

<mosaic_0001>
module attributes {stable_mosaic.version = 11 : i64} {
  func.func @gpt_kernel(%arg0: i32, %arg1: memref<16x32xf32, #tpu.memory_space<vmem>>, %arg2: memref<1x32xf32, #tpu.memory_space<vmem>>, %arg3: memref<1x32xf32, #tpu.memory_space<vmem>>, %arg4: memref<32x96xbf16, #tpu.memory_space<vmem>>, %arg5: memref<1x96xf32, #tpu.memory_space<vmem>>, %arg6: memref<32x32xbf16, #tpu.memory_space<vmem>>, %arg7: memref<1x32xf32, #tpu.memory_space<vmem>>, %arg8: memref<1x32xf32, #tpu.memory_space<vmem>>, %arg9: memref<1x32xf32, #tpu.memory_space<vmem>>, %arg10: memref<32x128xbf16, #tpu.memory_space<vmem>>, %arg11: memref<1x128xf32, #tpu.memory_space<vmem>>, %arg12: memref<128x32xbf16, #tpu.memory_space<vmem>>, %arg13: memref<1x32xf32, #tpu.memory_space<vmem>>, %arg14: memref<1x32xf32, #tpu.memory_space<vmem>>, %arg15: memref<1x32xf32, #tpu.memory_space<vmem>>, %arg16: memref<32x96xbf16, #tpu.memory_space<vmem>>, %arg17: memref<1x96xf32, #tpu.memory_space<vmem>>, %arg18: memref<32x32xbf16, #tpu.memory_space<vmem>>, %arg19: memref<1x32xf32, #tpu.memory_space<vmem>>, %arg20: memref<1x32xf32, #tpu.memory_space<vmem>>, %arg21: memref<1x32xf32, #tpu.memory_space<vmem>>, %arg22: memref<32x128xbf16, #tpu.memory_space<vmem>>, %arg23: memref<1x128xf32, #tpu.memory_space<vmem>>, %arg24: memref<128x32xbf16, #tpu.memory_space<vmem>>, %arg25: memref<1x32xf32, #tpu.memory_space<vmem>>, %arg26: memref<1x32xf32, #tpu.memory_space<vmem>>, %arg27: memref<1x32xf32, #tpu.memory_space<vmem>>, %arg28: memref<32x128xbf16, #tpu.memory_space<vmem>>, %arg29: memref<1x128xf32, #tpu.memory_space<vmem>>, %arg30: memref<16x128xf32, #tpu.memory_space<vmem>>) attributes {dimension_semantics = [#tpu.dimension_semantics<arbitrary>], iteration_bounds = array<i64: 1>, scalar_prefetch = 0 : i64, scratch_operands = 0 : i64, tpu.core_type = #tpu.core_type<tc>, window_params = [{pipeline_mode = #tpu.pipeline_mode<synchronous>, transform_indices = @transform_0, window_bounds = array<i64: 16, 32>}, {pipeline_mode = #tpu.pipeline_mode<synchronous>, transform_indices = @transform_1, window_bounds = array<i64: 1, 32>}, {pipeline_mode = #tpu.pipeline_mode<synchronous>, transform_indices = @transform_2, window_bounds = array<i64: 1, 32>}, {pipeline_mode = #tpu.pipeline_mode<synchronous>, transform_indices = @transform_3, window_bounds = array<i64: 32, 96>}, {pipeline_mode = #tpu.pipeline_mode<synchronous>, transform_indices = @transform_4, window_bounds = array<i64: 1, 96>}, {pipeline_mode = #tpu.pipeline_mode<synchronous>, transform_indices = @transform_5, window_bounds = array<i64: 32, 32>}, {pipeline_mode = #tpu.pipeline_mode<synchronous>, transform_indices = @transform_6, window_bounds = array<i64: 1, 32>}, {pipeline_mode = #tpu.pipeline_mode<synchronous>, transform_indices = @transform_7, window_bounds = array<i64: 1, 32>}, {pipeline_mode = #tpu.pipeline_mode<synchronous>, transform_indices = @transform_8, window_bounds = array<i64: 1, 32>}, {pipeline_mode = #tpu.pipeline_mode<synchronous>, transform_indices = @transform_9, window_bounds = array<i64: 32, 128>}, {pipeline_mode = #tpu.pipeline_mode<synchronous>, transform_indices = @transform_10, window_bounds = array<i64: 1, 128>}, {pipeline_mode = #tpu.pipeline_mode<synchronous>, transform_indices = @transform_11, window_bounds = array<i64: 128, 32>}, {pipeline_mode = #tpu.pipeline_mode<synchronous>, transform_indices = @transform_12, window_bounds = array<i64: 1, 32>}, {pipeline_mode = #tpu.pipeline_mode<synchronous>, transform_indices = @transform_13, window_bounds = array<i64: 1, 32>}, {pipeline_mode = #tpu.pipeline_mode<synchronous>, transform_indices = @transform_14, window_bounds = array<i64: 1, 32>}, {pipeline_mode = #tpu.pipeline_mode<synchronous>, transform_indices = @transform_15, window_bounds = array<i64: 32, 96>}, {pipeline_mode = #tpu.pipeline_mode<synchronous>, transform_indices = @transform_16, window_bounds = array<i64: 1, 96>}, {pipeline_mode = #tpu.pipeline_mode<synchronous>, transform_indices = @transform_17, window_bounds = array<i64: 32, 32>}, {pipeline_mode = #tpu.pipeline_mode<synchronous>, transform_indices = @transform_18, window_bounds = array<i64: 1, 32>}, {pipeline_mode = #tpu.pipeline_mode<synchronous>, transform_indices = @transform_19, window_bounds = array<i64: 1, 32>}, {pipeline_mode = #tpu.pipeline_mode<synchronous>, transform_indices = @transform_20, window_bounds = array<i64: 1, 32>}, {pipeline_mode = #tpu.pipeline_mode<synchronous>, transform_indices = @transform_21, window_bounds = array<i64: 32, 128>}, {pipeline_mode = #tpu.pipeline_mode<synchronous>, transform_indices = @transform_22, window_bounds = array<i64: 1, 128>}, {pipeline_mode = #tpu.pipeline_mode<synchronous>, transform_indices = @transform_23, window_bounds = array<i64: 128, 32>}, {pipeline_mode = #tpu.pipeline_mode<synchronous>, transform_indices = @transform_24, window_bounds = array<i64: 1, 32>}, {pipeline_mode = #tpu.pipeline_mode<synchronous>, transform_indices = @transform_25, window_bounds = array<i64: 1, 32>}, {pipeline_mode = #tpu.pipeline_mode<synchronous>, transform_indices = @transform_26, window_bounds = array<i64: 1, 32>}, {pipeline_mode = #tpu.pipeline_mode<synchronous>, transform_indices = @transform_27, window_bounds = array<i64: 32, 128>}, {pipeline_mode = #tpu.pipeline_mode<synchronous>, transform_indices = @transform_28, window_bounds = array<i64: 1, 128>}, {pipeline_mode = #tpu.pipeline_mode<synchronous>, transform_indices = @transform_29, window_bounds = array<i64: 16, 128>}]} {
    %c0 = arith.constant 0 : index
    %c0_0 = arith.constant 0 : index
    %0 = vector.load %arg1[%c0, %c0_0] : memref<16x32xf32, #tpu.memory_space<vmem>>, vector<16x32xf32>
    %1 = tpu.iota {dimensions = array<i32: 0>} : vector<8x8xi32>
    %2 = tpu.iota {dimensions = array<i32: 1>} : vector<8x8xi32>
    %3 = arith.cmpi sge, %1, %2 : vector<8x8xi32>
    %cst = arith.constant 0.000000e+00 : f32
    %cst_1 = arith.constant -1.000000e+30 : f32
    %4 = vector.broadcast %cst : f32 to vector<8x8xf32>
    %5 = vector.broadcast %cst_1 : f32 to vector<8x8xf32>
    %6 = arith.select %3, %4, %5 : vector<8x8xi1>, vector<8x8xf32>
    %7 = vector.shape_cast %6 : vector<8x8xf32> to vector<1x8x8xf32>
    %c0_2 = arith.constant 0 : index
    %c0_3 = arith.constant 0 : index
    %8 = vector.load %arg2[%c0_2, %c0_3] : memref<1x32xf32, #tpu.memory_space<vmem>>, vector<1x32xf32>
    %c0_4 = arith.constant 0 : index
    %c0_5 = arith.constant 0 : index
    %9 = vector.load %arg3[%c0_4, %c0_5] : memref<1x32xf32, #tpu.memory_space<vmem>>, vector<1x32xf32>
    %cst_6 = arith.constant dense<0.000000e+00> : vector<16xf32>
    %10 = vector.multi_reduction <add>, %0, %cst_6 [1] : vector<16x32xf32> to vector<16xf32>
    %11 = vector.shape_cast %10 : vector<16xf32> to vector<16x1xf32>
    %cst_7 = arith.constant 3.200000e+01 : f32
    %12 = vector.broadcast %cst_7 : f32 to vector<16x1xf32>
    %13 = arith.divf %11, %12 : vector<16x1xf32>
    %14 = vector.broadcast %13 : vector<16x1xf32> to vector<16x32xf32>
    %15 = arith.subf %0, %14 : vector<16x32xf32>
    %16 = arith.mulf %15, %15 : vector<16x32xf32>
    %cst_8 = arith.constant dense<0.000000e+00> : vector<16xf32>
    %17 = vector.multi_reduction <add>, %16, %cst_8 [1] : vector<16x32xf32> to vector<16xf32>
    %18 = vector.shape_cast %17 : vector<16xf32> to vector<16x1xf32>
    %cst_9 = arith.constant 3.200000e+01 : f32
    %19 = vector.broadcast %cst_9 : f32 to vector<16x1xf32>
    %20 = arith.divf %18, %19 : vector<16x1xf32>
    %21 = vector.broadcast %13 : vector<16x1xf32> to vector<16x32xf32>
    %22 = arith.subf %0, %21 : vector<16x32xf32>
    %cst_10 = arith.constant 9.99999974E-6 : f32
    %23 = vector.broadcast %cst_10 : f32 to vector<16x1xf32>
    %24 = arith.addf %20, %23 : vector<16x1xf32>
    %25 = math.rsqrt %24 : vector<16x1xf32>
    %26 = vector.broadcast %25 : vector<16x1xf32> to vector<16x32xf32>
    %27 = arith.mulf %22, %26 : vector<16x32xf32>
    %28 = vector.broadcast %8 : vector<1x32xf32> to vector<16x32xf32>
    %29 = arith.mulf %27, %28 : vector<16x32xf32>
    %30 = vector.broadcast %9 : vector<1x32xf32> to vector<16x32xf32>
    %31 = arith.addf %29, %30 : vector<16x32xf32>
    %32 = arith.truncf %31 : vector<16x32xf32> to vector<16x32xbf16>
    %c0_11 = arith.constant 0 : index
    %c0_12 = arith.constant 0 : index
    %33 = vector.load %arg4[%c0_11, %c0_12] : memref<32x96xbf16, #tpu.memory_space<vmem>>, vector<32x96xbf16>
    %cst_13 = arith.constant dense<0.000000e+00> : vector<16x96xf32>
    %34 = tpu.matmul %32, %33, %cst_13 {dimension_numbers = #tpu.dot_dimension_numbers<[1], [0], [0], [1], [0, 0, 1, 1], [], []>} : vector<16x32xbf16>, vector<32x96xbf16>, vector<16x96xf32> -> vector<16x96xf32>
    %c0_14 = arith.constant 0 : index
    %c0_15 = arith.constant 0 : index
    %35 = vector.load %arg5[%c0_14, %c0_15] : memref<1x96xf32, #tpu.memory_space<vmem>>, vector<1x96xf32>
    %36 = vector.broadcast %35 : vector<1x96xf32> to vector<16x96xf32>
    %37 = arith.addf %34, %36 : vector<16x96xf32>
    %38 = arith.truncf %37 : vector<16x96xf32> to vector<16x96xbf16>
    %c0_16 = arith.constant 0 : index
    %c0_17 = arith.constant 0 : index
    %39 = vector.load %arg6[%c0_16, %c0_17] : memref<32x32xbf16, #tpu.memory_space<vmem>>, vector<32x32xbf16>
    %cst_18 = arith.constant 0.000000e+00 : f32
    %40 = vector.broadcast %cst_18 : f32 to vector<16x32xf32>
    %41 = vector.extract_strided_slice %38 {offsets = [0, 0], sizes = [16, 8], strides = [1, 1]} : vector<16x96xbf16> to vector<16x8xbf16>
    %42 = vector.shape_cast %41 : vector<16x8xbf16> to vector<2x8x8xbf16>
    %43 = vector.extract_strided_slice %38 {offsets = [0, 32], sizes = [16, 8], strides = [1, 1]} : vector<16x96xbf16> to vector<16x8xbf16>
    %44 = vector.shape_cast %43 : vector<16x8xbf16> to vector<2x8x8xbf16>
    %45 = vector.extract_strided_slice %38 {offsets = [0, 64], sizes = [16, 8], strides = [1, 1]} : vector<16x96xbf16> to vector<16x8xbf16>
    %46 = vector.shape_cast %45 : vector<16x8xbf16> to vector<2x8x8xbf16>
    "tpu.trace_start"() <{level = 10 : i32, message = "bqd,bkd->bqk"}> : () -> ()
    %cst_19 = arith.constant dense<0.000000e+00> : vector<2x8x8xf32>
    %47 = tpu.matmul %42, %44, %cst_19 {dimension_numbers = #tpu.dot_dimension_numbers<[2], [2], [1], [1], [0, 0, 0, 1, 1, 1], [0], [0]>} : vector<2x8x8xbf16>, vector<2x8x8xbf16>, vector<2x8x8xf32> -> vector<2x8x8xf32>
    "tpu.trace_stop"() : () -> ()
    %cst_20 = arith.constant 0.353553385 : f32
    %48 = vector.broadcast %cst_20 : f32 to vector<2x8x8xf32>
    %49 = arith.mulf %47, %48 : vector<2x8x8xf32>
    %50 = vector.broadcast %7 : vector<1x8x8xf32> to vector<2x8x8xf32>
    %51 = arith.addf %49, %50 : vector<2x8x8xf32>
    %cst_21 = arith.constant dense<0xFF800000> : vector<2x8xf32>
    %52 = vector.multi_reduction <maximumf>, %51, %cst_21 [2] : vector<2x8x8xf32> to vector<2x8xf32>
    %53 = vector.shape_cast %52 : vector<2x8xf32> to vector<2x8x1xf32>
    %54 = vector.broadcast %53 : vector<2x8x1xf32> to vector<2x8x8xf32>
    %55 = arith.subf %51, %54 : vector<2x8x8xf32>
    %56 = math.exp %55 : vector<2x8x8xf32>
    %cst_22 = arith.constant dense<0.000000e+00> : vector<2x8xf32>
    %57 = vector.multi_reduction <add>, %56, %cst_22 [2] : vector<2x8x8xf32> to vector<2x8xf32>
    %58 = vector.shape_cast %57 : vector<2x8xf32> to vector<2x8x1xf32>
    %59 = tpu.reciprocal %58 {approx = true} : vector<2x8x1xf32> -> vector<2x8x1xf32>
    %60 = vector.broadcast %59 : vector<2x8x1xf32> to vector<2x8x8xf32>
    %61 = arith.mulf %56, %60 : vector<2x8x8xf32>
    %62 = arith.truncf %61 : vector<2x8x8xf32> to vector<2x8x8xbf16>
    "tpu.trace_start"() <{level = 10 : i32, message = "bqk,bkd->bqd"}> : () -> ()
    %cst_23 = arith.constant dense<0.000000e+00> : vector<2x8x8xf32>
    %63 = tpu.matmul %62, %46, %cst_23 {dimension_numbers = #tpu.dot_dimension_numbers<[2], [1], [1], [2], [0, 0, 0, 1, 1, 2], [0], [0]>} : vector<2x8x8xbf16>, vector<2x8x8xbf16>, vector<2x8x8xf32> -> vector<2x8x8xf32>
    "tpu.trace_stop"() : () -> ()
    %64 = vector.shape_cast %63 : vector<2x8x8xf32> to vector<16x8xf32>
    %65 = arith.truncf %64 : vector<16x8xf32> to vector<16x8xbf16>
    %66 = vector.extract_strided_slice %39 {offsets = [0, 0], sizes = [8, 32], strides = [1, 1]} : vector<32x32xbf16> to vector<8x32xbf16>
    %cst_24 = arith.constant dense<0.000000e+00> : vector<16x32xf32>
    %67 = tpu.matmul %65, %66, %cst_24 {dimension_numbers = #tpu.dot_dimension_numbers<[1], [0], [0], [1], [0, 0, 1, 1], [], []>} : vector<16x8xbf16>, vector<8x32xbf16>, vector<16x32xf32> -> vector<16x32xf32>
    %68 = arith.addf %40, %67 : vector<16x32xf32>
    %69 = vector.extract_strided_slice %38 {offsets = [0, 8], sizes = [16, 8], strides = [1, 1]} : vector<16x96xbf16> to vector<16x8xbf16>
    %70 = vector.shape_cast %69 : vector<16x8xbf16> to vector<2x8x8xbf16>
    %71 = vector.extract_strided_slice %38 {offsets = [0, 40], sizes = [16, 8], strides = [1, 1]} : vector<16x96xbf16> to vector<16x8xbf16>
    %72 = vector.shape_cast %71 : vector<16x8xbf16> to vector<2x8x8xbf16>
    %73 = vector.extract_strided_slice %38 {offsets = [0, 72], sizes = [16, 8], strides = [1, 1]} : vector<16x96xbf16> to vector<16x8xbf16>
    %74 = vector.shape_cast %73 : vector<16x8xbf16> to vector<2x8x8xbf16>
    "tpu.trace_start"() <{level = 10 : i32, message = "bqd,bkd->bqk"}> : () -> ()
    %cst_25 = arith.constant dense<0.000000e+00> : vector<2x8x8xf32>
    %75 = tpu.matmul %70, %72, %cst_25 {dimension_numbers = #tpu.dot_dimension_numbers<[2], [2], [1], [1], [0, 0, 0, 1, 1, 1], [0], [0]>} : vector<2x8x8xbf16>, vector<2x8x8xbf16>, vector<2x8x8xf32> -> vector<2x8x8xf32>
    "tpu.trace_stop"() : () -> ()
    %cst_26 = arith.constant 0.353553385 : f32
    %76 = vector.broadcast %cst_26 : f32 to vector<2x8x8xf32>
    %77 = arith.mulf %75, %76 : vector<2x8x8xf32>
    %78 = vector.broadcast %7 : vector<1x8x8xf32> to vector<2x8x8xf32>
    %79 = arith.addf %77, %78 : vector<2x8x8xf32>
    %cst_27 = arith.constant dense<0xFF800000> : vector<2x8xf32>
    %80 = vector.multi_reduction <maximumf>, %79, %cst_27 [2] : vector<2x8x8xf32> to vector<2x8xf32>
    %81 = vector.shape_cast %80 : vector<2x8xf32> to vector<2x8x1xf32>
    %82 = vector.broadcast %81 : vector<2x8x1xf32> to vector<2x8x8xf32>
    %83 = arith.subf %79, %82 : vector<2x8x8xf32>
    %84 = math.exp %83 : vector<2x8x8xf32>
    %cst_28 = arith.constant dense<0.000000e+00> : vector<2x8xf32>
    %85 = vector.multi_reduction <add>, %84, %cst_28 [2] : vector<2x8x8xf32> to vector<2x8xf32>
    %86 = vector.shape_cast %85 : vector<2x8xf32> to vector<2x8x1xf32>
    %87 = tpu.reciprocal %86 {approx = true} : vector<2x8x1xf32> -> vector<2x8x1xf32>
    %88 = vector.broadcast %87 : vector<2x8x1xf32> to vector<2x8x8xf32>
    %89 = arith.mulf %84, %88 : vector<2x8x8xf32>
    %90 = arith.truncf %89 : vector<2x8x8xf32> to vector<2x8x8xbf16>
    "tpu.trace_start"() <{level = 10 : i32, message = "bqk,bkd->bqd"}> : () -> ()
    %cst_29 = arith.constant dense<0.000000e+00> : vector<2x8x8xf32>
    %91 = tpu.matmul %90, %74, %cst_29 {dimension_numbers = #tpu.dot_dimension_numbers<[2], [1], [1], [2], [0, 0, 0, 1, 1, 2], [0], [0]>} : vector<2x8x8xbf16>, vector<2x8x8xbf16>, vector<2x8x8xf32> -> vector<2x8x8xf32>
    "tpu.trace_stop"() : () -> ()
    %92 = vector.shape_cast %91 : vector<2x8x8xf32> to vector<16x8xf32>
    %93 = arith.truncf %92 : vector<16x8xf32> to vector<16x8xbf16>
    %94 = vector.extract_strided_slice %39 {offsets = [8, 0], sizes = [8, 32], strides = [1, 1]} : vector<32x32xbf16> to vector<8x32xbf16>
    %cst_30 = arith.constant dense<0.000000e+00> : vector<16x32xf32>
    %95 = tpu.matmul %93, %94, %cst_30 {dimension_numbers = #tpu.dot_dimension_numbers<[1], [0], [0], [1], [0, 0, 1, 1], [], []>} : vector<16x8xbf16>, vector<8x32xbf16>, vector<16x32xf32> -> vector<16x32xf32>
    %96 = arith.addf %68, %95 : vector<16x32xf32>
    %97 = vector.extract_strided_slice %38 {offsets = [0, 16], sizes = [16, 8], strides = [1, 1]} : vector<16x96xbf16> to vector<16x8xbf16>
    %98 = vector.shape_cast %97 : vector<16x8xbf16> to vector<2x8x8xbf16>
    %99 = vector.extract_strided_slice %38 {offsets = [0, 48], sizes = [16, 8], strides = [1, 1]} : vector<16x96xbf16> to vector<16x8xbf16>
    %100 = vector.shape_cast %99 : vector<16x8xbf16> to vector<2x8x8xbf16>
    %101 = vector.extract_strided_slice %38 {offsets = [0, 80], sizes = [16, 8], strides = [1, 1]} : vector<16x96xbf16> to vector<16x8xbf16>
    %102 = vector.shape_cast %101 : vector<16x8xbf16> to vector<2x8x8xbf16>
    "tpu.trace_start"() <{level = 10 : i32, message = "bqd,bkd->bqk"}> : () -> ()
    %cst_31 = arith.constant dense<0.000000e+00> : vector<2x8x8xf32>
    %103 = tpu.matmul %98, %100, %cst_31 {dimension_numbers = #tpu.dot_dimension_numbers<[2], [2], [1], [1], [0, 0, 0, 1, 1, 1], [0], [0]>} : vector<2x8x8xbf16>, vector<2x8x8xbf16>, vector<2x8x8xf32> -> vector<2x8x8xf32>
    "tpu.trace_stop"() : () -> ()
    %cst_32 = arith.constant 0.353553385 : f32
    %104 = vector.broadcast %cst_32 : f32 to vector<2x8x8xf32>
    %105 = arith.mulf %103, %104 : vector<2x8x8xf32>
    %106 = vector.broadcast %7 : vector<1x8x8xf32> to vector<2x8x8xf32>
    %107 = arith.addf %105, %106 : vector<2x8x8xf32>
    %cst_33 = arith.constant dense<0xFF800000> : vector<2x8xf32>
    %108 = vector.multi_reduction <maximumf>, %107, %cst_33 [2] : vector<2x8x8xf32> to vector<2x8xf32>
    %109 = vector.shape_cast %108 : vector<2x8xf32> to vector<2x8x1xf32>
    %110 = vector.broadcast %109 : vector<2x8x1xf32> to vector<2x8x8xf32>
    %111 = arith.subf %107, %110 : vector<2x8x8xf32>
    %112 = math.exp %111 : vector<2x8x8xf32>
    %cst_34 = arith.constant dense<0.000000e+00> : vector<2x8xf32>
    %113 = vector.multi_reduction <add>, %112, %cst_34 [2] : vector<2x8x8xf32> to vector<2x8xf32>
    %114 = vector.shape_cast %113 : vector<2x8xf32> to vector<2x8x1xf32>
    %115 = tpu.reciprocal %114 {approx = true} : vector<2x8x1xf32> -> vector<2x8x1xf32>
    %116 = vector.broadcast %115 : vector<2x8x1xf32> to vector<2x8x8xf32>
    %117 = arith.mulf %112, %116 : vector<2x8x8xf32>
    %118 = arith.truncf %117 : vector<2x8x8xf32> to vector<2x8x8xbf16>
    "tpu.trace_start"() <{level = 10 : i32, message = "bqk,bkd->bqd"}> : () -> ()
    %cst_35 = arith.constant dense<0.000000e+00> : vector<2x8x8xf32>
    %119 = tpu.matmul %118, %102, %cst_35 {dimension_numbers = #tpu.dot_dimension_numbers<[2], [1], [1], [2], [0, 0, 0, 1, 1, 2], [0], [0]>} : vector<2x8x8xbf16>, vector<2x8x8xbf16>, vector<2x8x8xf32> -> vector<2x8x8xf32>
    "tpu.trace_stop"() : () -> ()
    %120 = vector.shape_cast %119 : vector<2x8x8xf32> to vector<16x8xf32>
    %121 = arith.truncf %120 : vector<16x8xf32> to vector<16x8xbf16>
    %122 = vector.extract_strided_slice %39 {offsets = [16, 0], sizes = [8, 32], strides = [1, 1]} : vector<32x32xbf16> to vector<8x32xbf16>
    %cst_36 = arith.constant dense<0.000000e+00> : vector<16x32xf32>
    %123 = tpu.matmul %121, %122, %cst_36 {dimension_numbers = #tpu.dot_dimension_numbers<[1], [0], [0], [1], [0, 0, 1, 1], [], []>} : vector<16x8xbf16>, vector<8x32xbf16>, vector<16x32xf32> -> vector<16x32xf32>
    %124 = arith.addf %96, %123 : vector<16x32xf32>
    %125 = vector.extract_strided_slice %38 {offsets = [0, 24], sizes = [16, 8], strides = [1, 1]} : vector<16x96xbf16> to vector<16x8xbf16>
    %126 = vector.shape_cast %125 : vector<16x8xbf16> to vector<2x8x8xbf16>
    %127 = vector.extract_strided_slice %38 {offsets = [0, 56], sizes = [16, 8], strides = [1, 1]} : vector<16x96xbf16> to vector<16x8xbf16>
    %128 = vector.shape_cast %127 : vector<16x8xbf16> to vector<2x8x8xbf16>
    %129 = vector.extract_strided_slice %38 {offsets = [0, 88], sizes = [16, 8], strides = [1, 1]} : vector<16x96xbf16> to vector<16x8xbf16>
    %130 = vector.shape_cast %129 : vector<16x8xbf16> to vector<2x8x8xbf16>
    "tpu.trace_start"() <{level = 10 : i32, message = "bqd,bkd->bqk"}> : () -> ()
    %cst_37 = arith.constant dense<0.000000e+00> : vector<2x8x8xf32>
    %131 = tpu.matmul %126, %128, %cst_37 {dimension_numbers = #tpu.dot_dimension_numbers<[2], [2], [1], [1], [0, 0, 0, 1, 1, 1], [0], [0]>} : vector<2x8x8xbf16>, vector<2x8x8xbf16>, vector<2x8x8xf32> -> vector<2x8x8xf32>
    "tpu.trace_stop"() : () -> ()
    %cst_38 = arith.constant 0.353553385 : f32
    %132 = vector.broadcast %cst_38 : f32 to vector<2x8x8xf32>
    %133 = arith.mulf %131, %132 : vector<2x8x8xf32>
    %134 = vector.broadcast %7 : vector<1x8x8xf32> to vector<2x8x8xf32>
    %135 = arith.addf %133, %134 : vector<2x8x8xf32>
    %cst_39 = arith.constant dense<0xFF800000> : vector<2x8xf32>
    %136 = vector.multi_reduction <maximumf>, %135, %cst_39 [2] : vector<2x8x8xf32> to vector<2x8xf32>
    %137 = vector.shape_cast %136 : vector<2x8xf32> to vector<2x8x1xf32>
    %138 = vector.broadcast %137 : vector<2x8x1xf32> to vector<2x8x8xf32>
    %139 = arith.subf %135, %138 : vector<2x8x8xf32>
    %140 = math.exp %139 : vector<2x8x8xf32>
    %cst_40 = arith.constant dense<0.000000e+00> : vector<2x8xf32>
    %141 = vector.multi_reduction <add>, %140, %cst_40 [2] : vector<2x8x8xf32> to vector<2x8xf32>
    %142 = vector.shape_cast %141 : vector<2x8xf32> to vector<2x8x1xf32>
    %143 = tpu.reciprocal %142 {approx = true} : vector<2x8x1xf32> -> vector<2x8x1xf32>
    %144 = vector.broadcast %143 : vector<2x8x1xf32> to vector<2x8x8xf32>
    %145 = arith.mulf %140, %144 : vector<2x8x8xf32>
    %146 = arith.truncf %145 : vector<2x8x8xf32> to vector<2x8x8xbf16>
    "tpu.trace_start"() <{level = 10 : i32, message = "bqk,bkd->bqd"}> : () -> ()
    %cst_41 = arith.constant dense<0.000000e+00> : vector<2x8x8xf32>
    %147 = tpu.matmul %146, %130, %cst_41 {dimension_numbers = #tpu.dot_dimension_numbers<[2], [1], [1], [2], [0, 0, 0, 1, 1, 2], [0], [0]>} : vector<2x8x8xbf16>, vector<2x8x8xbf16>, vector<2x8x8xf32> -> vector<2x8x8xf32>
    "tpu.trace_stop"() : () -> ()
    %148 = vector.shape_cast %147 : vector<2x8x8xf32> to vector<16x8xf32>
    %149 = arith.truncf %148 : vector<16x8xf32> to vector<16x8xbf16>
    %150 = vector.extract_strided_slice %39 {offsets = [24, 0], sizes = [8, 32], strides = [1, 1]} : vector<32x32xbf16> to vector<8x32xbf16>
    %cst_42 = arith.constant dense<0.000000e+00> : vector<16x32xf32>
    %151 = tpu.matmul %149, %150, %cst_42 {dimension_numbers = #tpu.dot_dimension_numbers<[1], [0], [0], [1], [0, 0, 1, 1], [], []>} : vector<16x8xbf16>, vector<8x32xbf16>, vector<16x32xf32> -> vector<16x32xf32>
    %152 = arith.addf %124, %151 : vector<16x32xf32>
    %153 = arith.addf %0, %152 : vector<16x32xf32>
    %c0_43 = arith.constant 0 : index
    %c0_44 = arith.constant 0 : index
    %154 = vector.load %arg7[%c0_43, %c0_44] : memref<1x32xf32, #tpu.memory_space<vmem>>, vector<1x32xf32>
    %155 = vector.broadcast %154 : vector<1x32xf32> to vector<16x32xf32>
    %156 = arith.addf %153, %155 : vector<16x32xf32>
    %c0_45 = arith.constant 0 : index
    %c0_46 = arith.constant 0 : index
    %157 = vector.load %arg8[%c0_45, %c0_46] : memref<1x32xf32, #tpu.memory_space<vmem>>, vector<1x32xf32>
    %c0_47 = arith.constant 0 : index
    %c0_48 = arith.constant 0 : index
    %158 = vector.load %arg9[%c0_47, %c0_48] : memref<1x32xf32, #tpu.memory_space<vmem>>, vector<1x32xf32>
    %cst_49 = arith.constant dense<0.000000e+00> : vector<16xf32>
    %159 = vector.multi_reduction <add>, %156, %cst_49 [1] : vector<16x32xf32> to vector<16xf32>
    %160 = vector.shape_cast %159 : vector<16xf32> to vector<16x1xf32>
    %cst_50 = arith.constant 3.200000e+01 : f32
    %161 = vector.broadcast %cst_50 : f32 to vector<16x1xf32>
    %162 = arith.divf %160, %161 : vector<16x1xf32>
    %163 = vector.broadcast %162 : vector<16x1xf32> to vector<16x32xf32>
    %164 = arith.subf %156, %163 : vector<16x32xf32>
    %165 = arith.mulf %164, %164 : vector<16x32xf32>
    %cst_51 = arith.constant dense<0.000000e+00> : vector<16xf32>
    %166 = vector.multi_reduction <add>, %165, %cst_51 [1] : vector<16x32xf32> to vector<16xf32>
    %167 = vector.shape_cast %166 : vector<16xf32> to vector<16x1xf32>
    %cst_52 = arith.constant 3.200000e+01 : f32
    %168 = vector.broadcast %cst_52 : f32 to vector<16x1xf32>
    %169 = arith.divf %167, %168 : vector<16x1xf32>
    %170 = vector.broadcast %162 : vector<16x1xf32> to vector<16x32xf32>
    %171 = arith.subf %156, %170 : vector<16x32xf32>
    %cst_53 = arith.constant 9.99999974E-6 : f32
    %172 = vector.broadcast %cst_53 : f32 to vector<16x1xf32>
    %173 = arith.addf %169, %172 : vector<16x1xf32>
    %174 = math.rsqrt %173 : vector<16x1xf32>
    %175 = vector.broadcast %174 : vector<16x1xf32> to vector<16x32xf32>
    %176 = arith.mulf %171, %175 : vector<16x32xf32>
    %177 = vector.broadcast %157 : vector<1x32xf32> to vector<16x32xf32>
    %178 = arith.mulf %176, %177 : vector<16x32xf32>
    %179 = vector.broadcast %158 : vector<1x32xf32> to vector<16x32xf32>
    %180 = arith.addf %178, %179 : vector<16x32xf32>
    %181 = arith.truncf %180 : vector<16x32xf32> to vector<16x32xbf16>
    %c0_54 = arith.constant 0 : index
    %c0_55 = arith.constant 0 : index
    %182 = vector.load %arg10[%c0_54, %c0_55] : memref<32x128xbf16, #tpu.memory_space<vmem>>, vector<32x128xbf16>
    %cst_56 = arith.constant dense<0.000000e+00> : vector<16x128xf32>
    %183 = tpu.matmul %181, %182, %cst_56 {dimension_numbers = #tpu.dot_dimension_numbers<[1], [0], [0], [1], [0, 0, 1, 1], [], []>} : vector<16x32xbf16>, vector<32x128xbf16>, vector<16x128xf32> -> vector<16x128xf32>
    %c0_57 = arith.constant 0 : index
    %c0_58 = arith.constant 0 : index
    %184 = vector.load %arg11[%c0_57, %c0_58] : memref<1x128xf32, #tpu.memory_space<vmem>>, vector<1x128xf32>
    %185 = vector.broadcast %184 : vector<1x128xf32> to vector<16x128xf32>
    %186 = arith.addf %183, %185 : vector<16x128xf32>
    %187 = arith.mulf %186, %186 : vector<16x128xf32>
    %188 = arith.mulf %186, %187 : vector<16x128xf32>
    %cst_59 = arith.constant 4.471500e-02 : f32
    %189 = vector.broadcast %cst_59 : f32 to vector<16x128xf32>
    %190 = arith.mulf %189, %188 : vector<16x128xf32>
    %191 = arith.addf %186, %190 : vector<16x128xf32>
    %cst_60 = arith.constant 0.797884583 : f32
    %192 = vector.broadcast %cst_60 : f32 to vector<16x128xf32>
    %193 = arith.mulf %192, %191 : vector<16x128xf32>
    %194 = math.tanh %193 : vector<16x128xf32>
    %cst_61 = arith.constant 1.000000e+00 : f32
    %195 = vector.broadcast %cst_61 : f32 to vector<16x128xf32>
    %196 = arith.addf %195, %194 : vector<16x128xf32>
    %cst_62 = arith.constant 5.000000e-01 : f32
    %197 = vector.broadcast %cst_62 : f32 to vector<16x128xf32>
    %198 = arith.mulf %197, %196 : vector<16x128xf32>
    %199 = arith.mulf %186, %198 : vector<16x128xf32>
    %200 = arith.truncf %199 : vector<16x128xf32> to vector<16x128xbf16>
    %c0_63 = arith.constant 0 : index
    %c0_64 = arith.constant 0 : index
    %201 = vector.load %arg12[%c0_63, %c0_64] : memref<128x32xbf16, #tpu.memory_space<vmem>>, vector<128x32xbf16>
    %cst_65 = arith.constant dense<0.000000e+00> : vector<16x32xf32>
    %202 = tpu.matmul %200, %201, %cst_65 {dimension_numbers = #tpu.dot_dimension_numbers<[1], [0], [0], [1], [0, 0, 1, 1], [], []>} : vector<16x128xbf16>, vector<128x32xbf16>, vector<16x32xf32> -> vector<16x32xf32>
    %c0_66 = arith.constant 0 : index
    %c0_67 = arith.constant 0 : index
    %203 = vector.load %arg13[%c0_66, %c0_67] : memref<1x32xf32, #tpu.memory_space<vmem>>, vector<1x32xf32>
    %204 = vector.broadcast %203 : vector<1x32xf32> to vector<16x32xf32>
    %205 = arith.addf %202, %204 : vector<16x32xf32>
    %206 = arith.addf %156, %205 : vector<16x32xf32>
    %c0_68 = arith.constant 0 : index
    %c0_69 = arith.constant 0 : index
    %207 = vector.load %arg14[%c0_68, %c0_69] : memref<1x32xf32, #tpu.memory_space<vmem>>, vector<1x32xf32>
    %c0_70 = arith.constant 0 : index
    %c0_71 = arith.constant 0 : index
    %208 = vector.load %arg15[%c0_70, %c0_71] : memref<1x32xf32, #tpu.memory_space<vmem>>, vector<1x32xf32>
    %cst_72 = arith.constant dense<0.000000e+00> : vector<16xf32>
    %209 = vector.multi_reduction <add>, %206, %cst_72 [1] : vector<16x32xf32> to vector<16xf32>
    %210 = vector.shape_cast %209 : vector<16xf32> to vector<16x1xf32>
    %cst_73 = arith.constant 3.200000e+01 : f32
    %211 = vector.broadcast %cst_73 : f32 to vector<16x1xf32>
    %212 = arith.divf %210, %211 : vector<16x1xf32>
    %213 = vector.broadcast %212 : vector<16x1xf32> to vector<16x32xf32>
    %214 = arith.subf %206, %213 : vector<16x32xf32>
    %215 = arith.mulf %214, %214 : vector<16x32xf32>
    %cst_74 = arith.constant dense<0.000000e+00> : vector<16xf32>
    %216 = vector.multi_reduction <add>, %215, %cst_74 [1] : vector<16x32xf32> to vector<16xf32>
    %217 = vector.shape_cast %216 : vector<16xf32> to vector<16x1xf32>
    %cst_75 = arith.constant 3.200000e+01 : f32
    %218 = vector.broadcast %cst_75 : f32 to vector<16x1xf32>
    %219 = arith.divf %217, %218 : vector<16x1xf32>
    %220 = vector.broadcast %212 : vector<16x1xf32> to vector<16x32xf32>
    %221 = arith.subf %206, %220 : vector<16x32xf32>
    %cst_76 = arith.constant 9.99999974E-6 : f32
    %222 = vector.broadcast %cst_76 : f32 to vector<16x1xf32>
    %223 = arith.addf %219, %222 : vector<16x1xf32>
    %224 = math.rsqrt %223 : vector<16x1xf32>
    %225 = vector.broadcast %224 : vector<16x1xf32> to vector<16x32xf32>
    %226 = arith.mulf %221, %225 : vector<16x32xf32>
    %227 = vector.broadcast %207 : vector<1x32xf32> to vector<16x32xf32>
    %228 = arith.mulf %226, %227 : vector<16x32xf32>
    %229 = vector.broadcast %208 : vector<1x32xf32> to vector<16x32xf32>
    %230 = arith.addf %228, %229 : vector<16x32xf32>
    %231 = arith.truncf %230 : vector<16x32xf32> to vector<16x32xbf16>
    %c0_77 = arith.constant 0 : index
    %c0_78 = arith.constant 0 : index
    %232 = vector.load %arg16[%c0_77, %c0_78] : memref<32x96xbf16, #tpu.memory_space<vmem>>, vector<32x96xbf16>
    %cst_79 = arith.constant dense<0.000000e+00> : vector<16x96xf32>
    %233 = tpu.matmul %231, %232, %cst_79 {dimension_numbers = #tpu.dot_dimension_numbers<[1], [0], [0], [1], [0, 0, 1, 1], [], []>} : vector<16x32xbf16>, vector<32x96xbf16>, vector<16x96xf32> -> vector<16x96xf32>
    %c0_80 = arith.constant 0 : index
    %c0_81 = arith.constant 0 : index
    %234 = vector.load %arg17[%c0_80, %c0_81] : memref<1x96xf32, #tpu.memory_space<vmem>>, vector<1x96xf32>
    %235 = vector.broadcast %234 : vector<1x96xf32> to vector<16x96xf32>
    %236 = arith.addf %233, %235 : vector<16x96xf32>
    %237 = arith.truncf %236 : vector<16x96xf32> to vector<16x96xbf16>
    %c0_82 = arith.constant 0 : index
    %c0_83 = arith.constant 0 : index
    %238 = vector.load %arg18[%c0_82, %c0_83] : memref<32x32xbf16, #tpu.memory_space<vmem>>, vector<32x32xbf16>
    %cst_84 = arith.constant 0.000000e+00 : f32
    %239 = vector.broadcast %cst_84 : f32 to vector<16x32xf32>
    %240 = vector.extract_strided_slice %237 {offsets = [0, 0], sizes = [16, 8], strides = [1, 1]} : vector<16x96xbf16> to vector<16x8xbf16>
    %241 = vector.shape_cast %240 : vector<16x8xbf16> to vector<2x8x8xbf16>
    %242 = vector.extract_strided_slice %237 {offsets = [0, 32], sizes = [16, 8], strides = [1, 1]} : vector<16x96xbf16> to vector<16x8xbf16>
    %243 = vector.shape_cast %242 : vector<16x8xbf16> to vector<2x8x8xbf16>
    %244 = vector.extract_strided_slice %237 {offsets = [0, 64], sizes = [16, 8], strides = [1, 1]} : vector<16x96xbf16> to vector<16x8xbf16>
    %245 = vector.shape_cast %244 : vector<16x8xbf16> to vector<2x8x8xbf16>
    "tpu.trace_start"() <{level = 10 : i32, message = "bqd,bkd->bqk"}> : () -> ()
    %cst_85 = arith.constant dense<0.000000e+00> : vector<2x8x8xf32>
    %246 = tpu.matmul %241, %243, %cst_85 {dimension_numbers = #tpu.dot_dimension_numbers<[2], [2], [1], [1], [0, 0, 0, 1, 1, 1], [0], [0]>} : vector<2x8x8xbf16>, vector<2x8x8xbf16>, vector<2x8x8xf32> -> vector<2x8x8xf32>
    "tpu.trace_stop"() : () -> ()
    %cst_86 = arith.constant 0.353553385 : f32
    %247 = vector.broadcast %cst_86 : f32 to vector<2x8x8xf32>
    %248 = arith.mulf %246, %247 : vector<2x8x8xf32>
    %249 = vector.broadcast %7 : vector<1x8x8xf32> to vector<2x8x8xf32>
    %250 = arith.addf %248, %249 : vector<2x8x8xf32>
    %cst_87 = arith.constant dense<0xFF800000> : vector<2x8xf32>
    %251 = vector.multi_reduction <maximumf>, %250, %cst_87 [2] : vector<2x8x8xf32> to vector<2x8xf32>
    %252 = vector.shape_cast %251 : vector<2x8xf32> to vector<2x8x1xf32>
    %253 = vector.broadcast %252 : vector<2x8x1xf32> to vector<2x8x8xf32>
    %254 = arith.subf %250, %253 : vector<2x8x8xf32>
    %255 = math.exp %254 : vector<2x8x8xf32>
    %cst_88 = arith.constant dense<0.000000e+00> : vector<2x8xf32>
    %256 = vector.multi_reduction <add>, %255, %cst_88 [2] : vector<2x8x8xf32> to vector<2x8xf32>
    %257 = vector.shape_cast %256 : vector<2x8xf32> to vector<2x8x1xf32>
    %258 = tpu.reciprocal %257 {approx = true} : vector<2x8x1xf32> -> vector<2x8x1xf32>
    %259 = vector.broadcast %258 : vector<2x8x1xf32> to vector<2x8x8xf32>
    %260 = arith.mulf %255, %259 : vector<2x8x8xf32>
    %261 = arith.truncf %260 : vector<2x8x8xf32> to vector<2x8x8xbf16>
    "tpu.trace_start"() <{level = 10 : i32, message = "bqk,bkd->bqd"}> : () -> ()
    %cst_89 = arith.constant dense<0.000000e+00> : vector<2x8x8xf32>
    %262 = tpu.matmul %261, %245, %cst_89 {dimension_numbers = #tpu.dot_dimension_numbers<[2], [1], [1], [2], [0, 0, 0, 1, 1, 2], [0], [0]>} : vector<2x8x8xbf16>, vector<2x8x8xbf16>, vector<2x8x8xf32> -> vector<2x8x8xf32>
    "tpu.trace_stop"() : () -> ()
    %263 = vector.shape_cast %262 : vector<2x8x8xf32> to vector<16x8xf32>
    %264 = arith.truncf %263 : vector<16x8xf32> to vector<16x8xbf16>
    %265 = vector.extract_strided_slice %238 {offsets = [0, 0], sizes = [8, 32], strides = [1, 1]} : vector<32x32xbf16> to vector<8x32xbf16>
    %cst_90 = arith.constant dense<0.000000e+00> : vector<16x32xf32>
    %266 = tpu.matmul %264, %265, %cst_90 {dimension_numbers = #tpu.dot_dimension_numbers<[1], [0], [0], [1], [0, 0, 1, 1], [], []>} : vector<16x8xbf16>, vector<8x32xbf16>, vector<16x32xf32> -> vector<16x32xf32>
    %267 = arith.addf %239, %266 : vector<16x32xf32>
    %268 = vector.extract_strided_slice %237 {offsets = [0, 8], sizes = [16, 8], strides = [1, 1]} : vector<16x96xbf16> to vector<16x8xbf16>
    %269 = vector.shape_cast %268 : vector<16x8xbf16> to vector<2x8x8xbf16>
    %270 = vector.extract_strided_slice %237 {offsets = [0, 40], sizes = [16, 8], strides = [1, 1]} : vector<16x96xbf16> to vector<16x8xbf16>
    %271 = vector.shape_cast %270 : vector<16x8xbf16> to vector<2x8x8xbf16>
    %272 = vector.extract_strided_slice %237 {offsets = [0, 72], sizes = [16, 8], strides = [1, 1]} : vector<16x96xbf16> to vector<16x8xbf16>
    %273 = vector.shape_cast %272 : vector<16x8xbf16> to vector<2x8x8xbf16>
    "tpu.trace_start"() <{level = 10 : i32, message = "bqd,bkd->bqk"}> : () -> ()
    %cst_91 = arith.constant dense<0.000000e+00> : vector<2x8x8xf32>
    %274 = tpu.matmul %269, %271, %cst_91 {dimension_numbers = #tpu.dot_dimension_numbers<[2], [2], [1], [1], [0, 0, 0, 1, 1, 1], [0], [0]>} : vector<2x8x8xbf16>, vector<2x8x8xbf16>, vector<2x8x8xf32> -> vector<2x8x8xf32>
    "tpu.trace_stop"() : () -> ()
    %cst_92 = arith.constant 0.353553385 : f32
    %275 = vector.broadcast %cst_92 : f32 to vector<2x8x8xf32>
    %276 = arith.mulf %274, %275 : vector<2x8x8xf32>
    %277 = vector.broadcast %7 : vector<1x8x8xf32> to vector<2x8x8xf32>
    %278 = arith.addf %276, %277 : vector<2x8x8xf32>
    %cst_93 = arith.constant dense<0xFF800000> : vector<2x8xf32>
    %279 = vector.multi_reduction <maximumf>, %278, %cst_93 [2] : vector<2x8x8xf32> to vector<2x8xf32>
    %280 = vector.shape_cast %279 : vector<2x8xf32> to vector<2x8x1xf32>
    %281 = vector.broadcast %280 : vector<2x8x1xf32> to vector<2x8x8xf32>
    %282 = arith.subf %278, %281 : vector<2x8x8xf32>
    %283 = math.exp %282 : vector<2x8x8xf32>
    %cst_94 = arith.constant dense<0.000000e+00> : vector<2x8xf32>
    %284 = vector.multi_reduction <add>, %283, %cst_94 [2] : vector<2x8x8xf32> to vector<2x8xf32>
    %285 = vector.shape_cast %284 : vector<2x8xf32> to vector<2x8x1xf32>
    %286 = tpu.reciprocal %285 {approx = true} : vector<2x8x1xf32> -> vector<2x8x1xf32>
    %287 = vector.broadcast %286 : vector<2x8x1xf32> to vector<2x8x8xf32>
    %288 = arith.mulf %283, %287 : vector<2x8x8xf32>
    %289 = arith.truncf %288 : vector<2x8x8xf32> to vector<2x8x8xbf16>
    "tpu.trace_start"() <{level = 10 : i32, message = "bqk,bkd->bqd"}> : () -> ()
    %cst_95 = arith.constant dense<0.000000e+00> : vector<2x8x8xf32>
    %290 = tpu.matmul %289, %273, %cst_95 {dimension_numbers = #tpu.dot_dimension_numbers<[2], [1], [1], [2], [0, 0, 0, 1, 1, 2], [0], [0]>} : vector<2x8x8xbf16>, vector<2x8x8xbf16>, vector<2x8x8xf32> -> vector<2x8x8xf32>
    "tpu.trace_stop"() : () -> ()
    %291 = vector.shape_cast %290 : vector<2x8x8xf32> to vector<16x8xf32>
    %292 = arith.truncf %291 : vector<16x8xf32> to vector<16x8xbf16>
    %293 = vector.extract_strided_slice %238 {offsets = [8, 0], sizes = [8, 32], strides = [1, 1]} : vector<32x32xbf16> to vector<8x32xbf16>
    %cst_96 = arith.constant dense<0.000000e+00> : vector<16x32xf32>
    %294 = tpu.matmul %292, %293, %cst_96 {dimension_numbers = #tpu.dot_dimension_numbers<[1], [0], [0], [1], [0, 0, 1, 1], [], []>} : vector<16x8xbf16>, vector<8x32xbf16>, vector<16x32xf32> -> vector<16x32xf32>
    %295 = arith.addf %267, %294 : vector<16x32xf32>
    %296 = vector.extract_strided_slice %237 {offsets = [0, 16], sizes = [16, 8], strides = [1, 1]} : vector<16x96xbf16> to vector<16x8xbf16>
    %297 = vector.shape_cast %296 : vector<16x8xbf16> to vector<2x8x8xbf16>
    %298 = vector.extract_strided_slice %237 {offsets = [0, 48], sizes = [16, 8], strides = [1, 1]} : vector<16x96xbf16> to vector<16x8xbf16>
    %299 = vector.shape_cast %298 : vector<16x8xbf16> to vector<2x8x8xbf16>
    %300 = vector.extract_strided_slice %237 {offsets = [0, 80], sizes = [16, 8], strides = [1, 1]} : vector<16x96xbf16> to vector<16x8xbf16>
    %301 = vector.shape_cast %300 : vector<16x8xbf16> to vector<2x8x8xbf16>
    "tpu.trace_start"() <{level = 10 : i32, message = "bqd,bkd->bqk"}> : () -> ()
    %cst_97 = arith.constant dense<0.000000e+00> : vector<2x8x8xf32>
    %302 = tpu.matmul %297, %299, %cst_97 {dimension_numbers = #tpu.dot_dimension_numbers<[2], [2], [1], [1], [0, 0, 0, 1, 1, 1], [0], [0]>} : vector<2x8x8xbf16>, vector<2x8x8xbf16>, vector<2x8x8xf32> -> vector<2x8x8xf32>
    "tpu.trace_stop"() : () -> ()
    %cst_98 = arith.constant 0.353553385 : f32
    %303 = vector.broadcast %cst_98 : f32 to vector<2x8x8xf32>
    %304 = arith.mulf %302, %303 : vector<2x8x8xf32>
    %305 = vector.broadcast %7 : vector<1x8x8xf32> to vector<2x8x8xf32>
    %306 = arith.addf %304, %305 : vector<2x8x8xf32>
    %cst_99 = arith.constant dense<0xFF800000> : vector<2x8xf32>
    %307 = vector.multi_reduction <maximumf>, %306, %cst_99 [2] : vector<2x8x8xf32> to vector<2x8xf32>
    %308 = vector.shape_cast %307 : vector<2x8xf32> to vector<2x8x1xf32>
    %309 = vector.broadcast %308 : vector<2x8x1xf32> to vector<2x8x8xf32>
    %310 = arith.subf %306, %309 : vector<2x8x8xf32>
    %311 = math.exp %310 : vector<2x8x8xf32>
    %cst_100 = arith.constant dense<0.000000e+00> : vector<2x8xf32>
    %312 = vector.multi_reduction <add>, %311, %cst_100 [2] : vector<2x8x8xf32> to vector<2x8xf32>
    %313 = vector.shape_cast %312 : vector<2x8xf32> to vector<2x8x1xf32>
    %314 = tpu.reciprocal %313 {approx = true} : vector<2x8x1xf32> -> vector<2x8x1xf32>
    %315 = vector.broadcast %314 : vector<2x8x1xf32> to vector<2x8x8xf32>
    %316 = arith.mulf %311, %315 : vector<2x8x8xf32>
    %317 = arith.truncf %316 : vector<2x8x8xf32> to vector<2x8x8xbf16>
    "tpu.trace_start"() <{level = 10 : i32, message = "bqk,bkd->bqd"}> : () -> ()
    %cst_101 = arith.constant dense<0.000000e+00> : vector<2x8x8xf32>
    %318 = tpu.matmul %317, %301, %cst_101 {dimension_numbers = #tpu.dot_dimension_numbers<[2], [1], [1], [2], [0, 0, 0, 1, 1, 2], [0], [0]>} : vector<2x8x8xbf16>, vector<2x8x8xbf16>, vector<2x8x8xf32> -> vector<2x8x8xf32>
    "tpu.trace_stop"() : () -> ()
    %319 = vector.shape_cast %318 : vector<2x8x8xf32> to vector<16x8xf32>
    %320 = arith.truncf %319 : vector<16x8xf32> to vector<16x8xbf16>
    %321 = vector.extract_strided_slice %238 {offsets = [16, 0], sizes = [8, 32], strides = [1, 1]} : vector<32x32xbf16> to vector<8x32xbf16>
    %cst_102 = arith.constant dense<0.000000e+00> : vector<16x32xf32>
    %322 = tpu.matmul %320, %321, %cst_102 {dimension_numbers = #tpu.dot_dimension_numbers<[1], [0], [0], [1], [0, 0, 1, 1], [], []>} : vector<16x8xbf16>, vector<8x32xbf16>, vector<16x32xf32> -> vector<16x32xf32>
    %323 = arith.addf %295, %322 : vector<16x32xf32>
    %324 = vector.extract_strided_slice %237 {offsets = [0, 24], sizes = [16, 8], strides = [1, 1]} : vector<16x96xbf16> to vector<16x8xbf16>
    %325 = vector.shape_cast %324 : vector<16x8xbf16> to vector<2x8x8xbf16>
    %326 = vector.extract_strided_slice %237 {offsets = [0, 56], sizes = [16, 8], strides = [1, 1]} : vector<16x96xbf16> to vector<16x8xbf16>
    %327 = vector.shape_cast %326 : vector<16x8xbf16> to vector<2x8x8xbf16>
    %328 = vector.extract_strided_slice %237 {offsets = [0, 88], sizes = [16, 8], strides = [1, 1]} : vector<16x96xbf16> to vector<16x8xbf16>
    %329 = vector.shape_cast %328 : vector<16x8xbf16> to vector<2x8x8xbf16>
    "tpu.trace_start"() <{level = 10 : i32, message = "bqd,bkd->bqk"}> : () -> ()
    %cst_103 = arith.constant dense<0.000000e+00> : vector<2x8x8xf32>
    %330 = tpu.matmul %325, %327, %cst_103 {dimension_numbers = #tpu.dot_dimension_numbers<[2], [2], [1], [1], [0, 0, 0, 1, 1, 1], [0], [0]>} : vector<2x8x8xbf16>, vector<2x8x8xbf16>, vector<2x8x8xf32> -> vector<2x8x8xf32>
    "tpu.trace_stop"() : () -> ()
    %cst_104 = arith.constant 0.353553385 : f32
    %331 = vector.broadcast %cst_104 : f32 to vector<2x8x8xf32>
    %332 = arith.mulf %330, %331 : vector<2x8x8xf32>
    %333 = vector.broadcast %7 : vector<1x8x8xf32> to vector<2x8x8xf32>
    %334 = arith.addf %332, %333 : vector<2x8x8xf32>
    %cst_105 = arith.constant dense<0xFF800000> : vector<2x8xf32>
    %335 = vector.multi_reduction <maximumf>, %334, %cst_105 [2] : vector<2x8x8xf32> to vector<2x8xf32>
    %336 = vector.shape_cast %335 : vector<2x8xf32> to vector<2x8x1xf32>
    %337 = vector.broadcast %336 : vector<2x8x1xf32> to vector<2x8x8xf32>
    %338 = arith.subf %334, %337 : vector<2x8x8xf32>
    %339 = math.exp %338 : vector<2x8x8xf32>
    %cst_106 = arith.constant dense<0.000000e+00> : vector<2x8xf32>
    %340 = vector.multi_reduction <add>, %339, %cst_106 [2] : vector<2x8x8xf32> to vector<2x8xf32>
    %341 = vector.shape_cast %340 : vector<2x8xf32> to vector<2x8x1xf32>
    %342 = tpu.reciprocal %341 {approx = true} : vector<2x8x1xf32> -> vector<2x8x1xf32>
    %343 = vector.broadcast %342 : vector<2x8x1xf32> to vector<2x8x8xf32>
    %344 = arith.mulf %339, %343 : vector<2x8x8xf32>
    %345 = arith.truncf %344 : vector<2x8x8xf32> to vector<2x8x8xbf16>
    "tpu.trace_start"() <{level = 10 : i32, message = "bqk,bkd->bqd"}> : () -> ()
    %cst_107 = arith.constant dense<0.000000e+00> : vector<2x8x8xf32>
    %346 = tpu.matmul %345, %329, %cst_107 {dimension_numbers = #tpu.dot_dimension_numbers<[2], [1], [1], [2], [0, 0, 0, 1, 1, 2], [0], [0]>} : vector<2x8x8xbf16>, vector<2x8x8xbf16>, vector<2x8x8xf32> -> vector<2x8x8xf32>
    "tpu.trace_stop"() : () -> ()
    %347 = vector.shape_cast %346 : vector<2x8x8xf32> to vector<16x8xf32>
    %348 = arith.truncf %347 : vector<16x8xf32> to vector<16x8xbf16>
    %349 = vector.extract_strided_slice %238 {offsets = [24, 0], sizes = [8, 32], strides = [1, 1]} : vector<32x32xbf16> to vector<8x32xbf16>
    %cst_108 = arith.constant dense<0.000000e+00> : vector<16x32xf32>
    %350 = tpu.matmul %348, %349, %cst_108 {dimension_numbers = #tpu.dot_dimension_numbers<[1], [0], [0], [1], [0, 0, 1, 1], [], []>} : vector<16x8xbf16>, vector<8x32xbf16>, vector<16x32xf32> -> vector<16x32xf32>
    %351 = arith.addf %323, %350 : vector<16x32xf32>
    %352 = arith.addf %206, %351 : vector<16x32xf32>
    %c0_109 = arith.constant 0 : index
    %c0_110 = arith.constant 0 : index
    %353 = vector.load %arg19[%c0_109, %c0_110] : memref<1x32xf32, #tpu.memory_space<vmem>>, vector<1x32xf32>
    %354 = vector.broadcast %353 : vector<1x32xf32> to vector<16x32xf32>
    %355 = arith.addf %352, %354 : vector<16x32xf32>
    %c0_111 = arith.constant 0 : index
    %c0_112 = arith.constant 0 : index
    %356 = vector.load %arg20[%c0_111, %c0_112] : memref<1x32xf32, #tpu.memory_space<vmem>>, vector<1x32xf32>
    %c0_113 = arith.constant 0 : index
    %c0_114 = arith.constant 0 : index
    %357 = vector.load %arg21[%c0_113, %c0_114] : memref<1x32xf32, #tpu.memory_space<vmem>>, vector<1x32xf32>
    %cst_115 = arith.constant dense<0.000000e+00> : vector<16xf32>
    %358 = vector.multi_reduction <add>, %355, %cst_115 [1] : vector<16x32xf32> to vector<16xf32>
    %359 = vector.shape_cast %358 : vector<16xf32> to vector<16x1xf32>
    %cst_116 = arith.constant 3.200000e+01 : f32
    %360 = vector.broadcast %cst_116 : f32 to vector<16x1xf32>
    %361 = arith.divf %359, %360 : vector<16x1xf32>
    %362 = vector.broadcast %361 : vector<16x1xf32> to vector<16x32xf32>
    %363 = arith.subf %355, %362 : vector<16x32xf32>
    %364 = arith.mulf %363, %363 : vector<16x32xf32>
    %cst_117 = arith.constant dense<0.000000e+00> : vector<16xf32>
    %365 = vector.multi_reduction <add>, %364, %cst_117 [1] : vector<16x32xf32> to vector<16xf32>
    %366 = vector.shape_cast %365 : vector<16xf32> to vector<16x1xf32>
    %cst_118 = arith.constant 3.200000e+01 : f32
    %367 = vector.broadcast %cst_118 : f32 to vector<16x1xf32>
    %368 = arith.divf %366, %367 : vector<16x1xf32>
    %369 = vector.broadcast %361 : vector<16x1xf32> to vector<16x32xf32>
    %370 = arith.subf %355, %369 : vector<16x32xf32>
    %cst_119 = arith.constant 9.99999974E-6 : f32
    %371 = vector.broadcast %cst_119 : f32 to vector<16x1xf32>
    %372 = arith.addf %368, %371 : vector<16x1xf32>
    %373 = math.rsqrt %372 : vector<16x1xf32>
    %374 = vector.broadcast %373 : vector<16x1xf32> to vector<16x32xf32>
    %375 = arith.mulf %370, %374 : vector<16x32xf32>
    %376 = vector.broadcast %356 : vector<1x32xf32> to vector<16x32xf32>
    %377 = arith.mulf %375, %376 : vector<16x32xf32>
    %378 = vector.broadcast %357 : vector<1x32xf32> to vector<16x32xf32>
    %379 = arith.addf %377, %378 : vector<16x32xf32>
    %380 = arith.truncf %379 : vector<16x32xf32> to vector<16x32xbf16>
    %c0_120 = arith.constant 0 : index
    %c0_121 = arith.constant 0 : index
    %381 = vector.load %arg22[%c0_120, %c0_121] : memref<32x128xbf16, #tpu.memory_space<vmem>>, vector<32x128xbf16>
    %cst_122 = arith.constant dense<0.000000e+00> : vector<16x128xf32>
    %382 = tpu.matmul %380, %381, %cst_122 {dimension_numbers = #tpu.dot_dimension_numbers<[1], [0], [0], [1], [0, 0, 1, 1], [], []>} : vector<16x32xbf16>, vector<32x128xbf16>, vector<16x128xf32> -> vector<16x128xf32>
    %c0_123 = arith.constant 0 : index
    %c0_124 = arith.constant 0 : index
    %383 = vector.load %arg23[%c0_123, %c0_124] : memref<1x128xf32, #tpu.memory_space<vmem>>, vector<1x128xf32>
    %384 = vector.broadcast %383 : vector<1x128xf32> to vector<16x128xf32>
    %385 = arith.addf %382, %384 : vector<16x128xf32>
    %386 = arith.mulf %385, %385 : vector<16x128xf32>
    %387 = arith.mulf %385, %386 : vector<16x128xf32>
    %cst_125 = arith.constant 4.471500e-02 : f32
    %388 = vector.broadcast %cst_125 : f32 to vector<16x128xf32>
    %389 = arith.mulf %388, %387 : vector<16x128xf32>
    %390 = arith.addf %385, %389 : vector<16x128xf32>
    %cst_126 = arith.constant 0.797884583 : f32
    %391 = vector.broadcast %cst_126 : f32 to vector<16x128xf32>
    %392 = arith.mulf %391, %390 : vector<16x128xf32>
    %393 = math.tanh %392 : vector<16x128xf32>
    %cst_127 = arith.constant 1.000000e+00 : f32
    %394 = vector.broadcast %cst_127 : f32 to vector<16x128xf32>
    %395 = arith.addf %394, %393 : vector<16x128xf32>
    %cst_128 = arith.constant 5.000000e-01 : f32
    %396 = vector.broadcast %cst_128 : f32 to vector<16x128xf32>
    %397 = arith.mulf %396, %395 : vector<16x128xf32>
    %398 = arith.mulf %385, %397 : vector<16x128xf32>
    %399 = arith.truncf %398 : vector<16x128xf32> to vector<16x128xbf16>
    %c0_129 = arith.constant 0 : index
    %c0_130 = arith.constant 0 : index
    %400 = vector.load %arg24[%c0_129, %c0_130] : memref<128x32xbf16, #tpu.memory_space<vmem>>, vector<128x32xbf16>
    %cst_131 = arith.constant dense<0.000000e+00> : vector<16x32xf32>
    %401 = tpu.matmul %399, %400, %cst_131 {dimension_numbers = #tpu.dot_dimension_numbers<[1], [0], [0], [1], [0, 0, 1, 1], [], []>} : vector<16x128xbf16>, vector<128x32xbf16>, vector<16x32xf32> -> vector<16x32xf32>
    %c0_132 = arith.constant 0 : index
    %c0_133 = arith.constant 0 : index
    %402 = vector.load %arg25[%c0_132, %c0_133] : memref<1x32xf32, #tpu.memory_space<vmem>>, vector<1x32xf32>
    %403 = vector.broadcast %402 : vector<1x32xf32> to vector<16x32xf32>
    %404 = arith.addf %401, %403 : vector<16x32xf32>
    %405 = arith.addf %355, %404 : vector<16x32xf32>
    %c0_134 = arith.constant 0 : index
    %c0_135 = arith.constant 0 : index
    %406 = vector.load %arg26[%c0_134, %c0_135] : memref<1x32xf32, #tpu.memory_space<vmem>>, vector<1x32xf32>
    %c0_136 = arith.constant 0 : index
    %c0_137 = arith.constant 0 : index
    %407 = vector.load %arg27[%c0_136, %c0_137] : memref<1x32xf32, #tpu.memory_space<vmem>>, vector<1x32xf32>
    %cst_138 = arith.constant dense<0.000000e+00> : vector<16xf32>
    %408 = vector.multi_reduction <add>, %405, %cst_138 [1] : vector<16x32xf32> to vector<16xf32>
    %409 = vector.shape_cast %408 : vector<16xf32> to vector<16x1xf32>
    %cst_139 = arith.constant 3.200000e+01 : f32
    %410 = vector.broadcast %cst_139 : f32 to vector<16x1xf32>
    %411 = arith.divf %409, %410 : vector<16x1xf32>
    %412 = vector.broadcast %411 : vector<16x1xf32> to vector<16x32xf32>
    %413 = arith.subf %405, %412 : vector<16x32xf32>
    %414 = arith.mulf %413, %413 : vector<16x32xf32>
    %cst_140 = arith.constant dense<0.000000e+00> : vector<16xf32>
    %415 = vector.multi_reduction <add>, %414, %cst_140 [1] : vector<16x32xf32> to vector<16xf32>
    %416 = vector.shape_cast %415 : vector<16xf32> to vector<16x1xf32>
    %cst_141 = arith.constant 3.200000e+01 : f32
    %417 = vector.broadcast %cst_141 : f32 to vector<16x1xf32>
    %418 = arith.divf %416, %417 : vector<16x1xf32>
    %419 = vector.broadcast %411 : vector<16x1xf32> to vector<16x32xf32>
    %420 = arith.subf %405, %419 : vector<16x32xf32>
    %cst_142 = arith.constant 9.99999974E-6 : f32
    %421 = vector.broadcast %cst_142 : f32 to vector<16x1xf32>
    %422 = arith.addf %418, %421 : vector<16x1xf32>
    %423 = math.rsqrt %422 : vector<16x1xf32>
    %424 = vector.broadcast %423 : vector<16x1xf32> to vector<16x32xf32>
    %425 = arith.mulf %420, %424 : vector<16x32xf32>
    %426 = vector.broadcast %406 : vector<1x32xf32> to vector<16x32xf32>
    %427 = arith.mulf %425, %426 : vector<16x32xf32>
    %428 = vector.broadcast %407 : vector<1x32xf32> to vector<16x32xf32>
    %429 = arith.addf %427, %428 : vector<16x32xf32>
    %430 = arith.truncf %429 : vector<16x32xf32> to vector<16x32xbf16>
    %c0_143 = arith.constant 0 : index
    %c0_144 = arith.constant 0 : index
    %431 = vector.load %arg28[%c0_143, %c0_144] : memref<32x128xbf16, #tpu.memory_space<vmem>>, vector<32x128xbf16>
    %cst_145 = arith.constant dense<0.000000e+00> : vector<16x128xf32>
    %432 = tpu.matmul %430, %431, %cst_145 {dimension_numbers = #tpu.dot_dimension_numbers<[1], [0], [0], [1], [0, 0, 1, 1], [], []>} : vector<16x32xbf16>, vector<32x128xbf16>, vector<16x128xf32> -> vector<16x128xf32>
    %c0_146 = arith.constant 0 : index
    %c0_147 = arith.constant 0 : index
    %433 = vector.load %arg29[%c0_146, %c0_147] : memref<1x128xf32, #tpu.memory_space<vmem>>, vector<1x128xf32>
    %434 = vector.broadcast %433 : vector<1x128xf32> to vector<16x128xf32>
    %435 = arith.addf %432, %434 : vector<16x128xf32>
    %c0_148 = arith.constant 0 : index
    %c0_149 = arith.constant 0 : index
    %436 = vector.load %arg30[%c0_148, %c0_149] : memref<16x128xf32, #tpu.memory_space<vmem>>, vector<16x128xf32>
    tpu.vector_store %arg30[%c0_148, %c0_149], %435 {strides = array<i32>} : memref<16x128xf32, #tpu.memory_space<vmem>>, vector<16x128xf32>,
    return
  }
  func.func @transform_0(%arg0: i32) -> (i32, i32) {
    %c0_i32 = arith.constant 0 : i32
    %c0_i32_0 = arith.constant 0 : i32
    %c0_i32_1 = arith.constant 0 : i32
    return %c0_i32, %c0_i32_0 : i32, i32
  }
  func.func @transform_1(%arg0: i32) -> (i32, i32) {
    %c0_i32 = arith.constant 0 : i32
    %c0_i32_0 = arith.constant 0 : i32
    %c0_i32_1 = arith.constant 0 : i32
    return %c0_i32, %c0_i32_0 : i32, i32
  }
  func.func @transform_2(%arg0: i32) -> (i32, i32) {
    %c0_i32 = arith.constant 0 : i32
    %c0_i32_0 = arith.constant 0 : i32
    %c0_i32_1 = arith.constant 0 : i32
    return %c0_i32, %c0_i32_0 : i32, i32
  }
  func.func @transform_3(%arg0: i32) -> (i32, i32) {
    %c0_i32 = arith.constant 0 : i32
    %c0_i32_0 = arith.constant 0 : i32
    %c0_i32_1 = arith.constant 0 : i32
    return %c0_i32, %c0_i32_0 : i32, i32
  }
  func.func @transform_4(%arg0: i32) -> (i32, i32) {
    %c0_i32 = arith.constant 0 : i32
    %c0_i32_0 = arith.constant 0 : i32
    %c0_i32_1 = arith.constant 0 : i32
    return %c0_i32, %c0_i32_0 : i32, i32
  }
  func.func @transform_5(%arg0: i32) -> (i32, i32) {
    %c0_i32 = arith.constant 0 : i32
    %c0_i32_0 = arith.constant 0 : i32
    %c0_i32_1 = arith.constant 0 : i32
    return %c0_i32, %c0_i32_0 : i32, i32
  }
  func.func @transform_6(%arg0: i32) -> (i32, i32) {
    %c0_i32 = arith.constant 0 : i32
    %c0_i32_0 = arith.constant 0 : i32
    %c0_i32_1 = arith.constant 0 : i32
    return %c0_i32, %c0_i32_0 : i32, i32
  }
  func.func @transform_7(%arg0: i32) -> (i32, i32) {
    %c0_i32 = arith.constant 0 : i32
    %c0_i32_0 = arith.constant 0 : i32
    %c0_i32_1 = arith.constant 0 : i32
    return %c0_i32, %c0_i32_0 : i32, i32
  }
  func.func @transform_8(%arg0: i32) -> (i32, i32) {
    %c0_i32 = arith.constant 0 : i32
    %c0_i32_0 = arith.constant 0 : i32
    %c0_i32_1 = arith.constant 0 : i32
    return %c0_i32, %c0_i32_0 : i32, i32
  }
  func.func @transform_9(%arg0: i32) -> (i32, i32) {
    %c0_i32 = arith.constant 0 : i32
    %c0_i32_0 = arith.constant 0 : i32
    %c0_i32_1 = arith.constant 0 : i32
    return %c0_i32, %c0_i32_0 : i32, i32
  }
  func.func @transform_10(%arg0: i32) -> (i32, i32) {
    %c0_i32 = arith.constant 0 : i32
    %c0_i32_0 = arith.constant 0 : i32
    %c0_i32_1 = arith.constant 0 : i32
    return %c0_i32, %c0_i32_0 : i32, i32
  }
  func.func @transform_11(%arg0: i32) -> (i32, i32) {
    %c0_i32 = arith.constant 0 : i32
    %c0_i32_0 = arith.constant 0 : i32
    %c0_i32_1 = arith.constant 0 : i32
    return %c0_i32, %c0_i32_0 : i32, i32
  }
  func.func @transform_12(%arg0: i32) -> (i32, i32) {
    %c0_i32 = arith.constant 0 : i32
    %c0_i32_0 = arith.constant 0 : i32
    %c0_i32_1 = arith.constant 0 : i32
    return %c0_i32, %c0_i32_0 : i32, i32
  }
  func.func @transform_13(%arg0: i32) -> (i32, i32) {
    %c0_i32 = arith.constant 0 : i32
    %c0_i32_0 = arith.constant 0 : i32
    %c0_i32_1 = arith.constant 0 : i32
    return %c0_i32, %c0_i32_0 : i32, i32
  }
  func.func @transform_14(%arg0: i32) -> (i32, i32) {
    %c0_i32 = arith.constant 0 : i32
    %c0_i32_0 = arith.constant 0 : i32
    %c0_i32_1 = arith.constant 0 : i32
    return %c0_i32, %c0_i32_0 : i32, i32
  }
  func.func @transform_15(%arg0: i32) -> (i32, i32) {
    %c0_i32 = arith.constant 0 : i32
    %c0_i32_0 = arith.constant 0 : i32
    %c0_i32_1 = arith.constant 0 : i32
    return %c0_i32, %c0_i32_0 : i32, i32
  }
  func.func @transform_16(%arg0: i32) -> (i32, i32) {
    %c0_i32 = arith.constant 0 : i32
    %c0_i32_0 = arith.constant 0 : i32
    %c0_i32_1 = arith.constant 0 : i32
    return %c0_i32, %c0_i32_0 : i32, i32
  }
  func.func @transform_17(%arg0: i32) -> (i32, i32) {
    %c0_i32 = arith.constant 0 : i32
    %c0_i32_0 = arith.constant 0 : i32
    %c0_i32_1 = arith.constant 0 : i32
    return %c0_i32, %c0_i32_0 : i32, i32
  }
  func.func @transform_18(%arg0: i32) -> (i32, i32) {
    %c0_i32 = arith.constant 0 : i32
    %c0_i32_0 = arith.constant 0 : i32
    %c0_i32_1 = arith.constant 0 : i32
    return %c0_i32, %c0_i32_0 : i32, i32
  }
  func.func @transform_19(%arg0: i32) -> (i32, i32) {
    %c0_i32 = arith.constant 0 : i32
    %c0_i32_0 = arith.constant 0 : i32
    %c0_i32_1 = arith.constant 0 : i32
    return %c0_i32, %c0_i32_0 : i32, i32
  }
  func.func @transform_20(%arg0: i32) -> (i32, i32) {
    %c0_i32 = arith.constant 0 : i32
    %c0_i32_0 = arith.constant 0 : i32
    %c0_i32_1 = arith.constant 0 : i32
    return %c0_i32, %c0_i32_0 : i32, i32
  }
  func.func @transform_21(%arg0: i32) -> (i32, i32) {
    %c0_i32 = arith.constant 0 : i32
    %c0_i32_0 = arith.constant 0 : i32
    %c0_i32_1 = arith.constant 0 : i32
    return %c0_i32, %c0_i32_0 : i32, i32
  }
  func.func @transform_22(%arg0: i32) -> (i32, i32) {
    %c0_i32 = arith.constant 0 : i32
    %c0_i32_0 = arith.constant 0 : i32
    %c0_i32_1 = arith.constant 0 : i32
    return %c0_i32, %c0_i32_0 : i32, i32
  }
  func.func @transform_23(%arg0: i32) -> (i32, i32) {
    %c0_i32 = arith.constant 0 : i32
    %c0_i32_0 = arith.constant 0 : i32
    %c0_i32_1 = arith.constant 0 : i32
    return %c0_i32, %c0_i32_0 : i32, i32
  }
  func.func @transform_24(%arg0: i32) -> (i32, i32) {
    %c0_i32 = arith.constant 0 : i32
    %c0_i32_0 = arith.constant 0 : i32
    %c0_i32_1 = arith.constant 0 : i32
    return %c0_i32, %c0_i32_0 : i32, i32
  }
  func.func @transform_25(%arg0: i32) -> (i32, i32) {
    %c0_i32 = arith.constant 0 : i32
    %c0_i32_0 = arith.constant 0 : i32
    %c0_i32_1 = arith.constant 0 : i32
    return %c0_i32, %c0_i32_0 : i32, i32
  }
  func.func @transform_26(%arg0: i32) -> (i32, i32) {
    %c0_i32 = arith.constant 0 : i32
    %c0_i32_0 = arith.constant 0 : i32
    %c0_i32_1 = arith.constant 0 : i32
    return %c0_i32, %c0_i32_0 : i32, i32
  }
  func.func @transform_27(%arg0: i32) -> (i32, i32) {
    %c0_i32 = arith.constant 0 : i32
    %c0_i32_0 = arith.constant 0 : i32
    %c0_i32_1 = arith.constant 0 : i32
    return %c0_i32, %c0_i32_0 : i32, i32
  }
  func.func @transform_28(%arg0: i32) -> (i32, i32) {
    %c0_i32 = arith.constant 0 : i32
    %c0_i32_0 = arith.constant 0 : i32
    %c0_i32_1 = arith.constant 0 : i32
    return %c0_i32, %c0_i32_0 : i32, i32
  }
  func.func @transform_29(%arg0: i32) -> (i32, i32) {
    %c0_i32 = arith.constant 0 : i32
    %c0_i32_0 = arith.constant 0 : i32
    %c0_i32_1 = arith.constant 0 : i32
    return %c0_i32, %c0_i32_0 : i32, i32
  }
}

</mosaic_0001>

<bundles_post_ra>
// kernel: tpu_custom_call.1
= control target key start
LH: loop header
LB: loop body
LE: loop exit
PB: predicated region body
PF: predicated region fallthrough
CT: control target
= control target key end

     0   :  { %s3946_s6 = smov 1   ;;  %s3947_s10 = smov 2   ;;  %s4694_s0 = inlined_call_operand.smem [shape: u32[30], index: -1, kind: input, shape index: {}] }
   0x1   :  { %s4000_s5 = sld [smem:[%s4694_s0]]   ;;  %s3948_s14 = smov 3  }
   0x2   :  { %s4005_s9 = sld [smem:[%s4694_s0 + %s3946_s6]]   ;;  %s3949_s18 = smov 4  }
   0x3   :  { %s4010_s13 = sld [smem:[%s4694_s0 + %s3947_s10]]   ;;  %s3950_s22 = smov 5  }
   0x4   :  { %s4015_s17 = sld [smem:[%s4694_s0 + %s3948_s14]]   ;;  %s3951_s26 = smov 6  }
   0x5   :  { %s4020_s21 = sld [smem:[%s4694_s0 + %s3949_s18]]   ;;  %s3952_s30 = smov 7  }
   0x6   :  { %s4025_s25 = sld [smem:[%s4694_s0 + %s3950_s22]]   ;;  %s3953_s4 = smov 8  }
   0x7   :  { %s4030_s29 = sld [smem:[%s4694_s0 + %s3951_s26]]   ;;  %s3954_s10 = smov 9  }
   0x8   :  { %s4035_s3 = sld [smem:[%s4694_s0 + %s3952_s30]]   ;;  %s3955_s15 = smov 10  }
   0x9   :  { %s4040_s8 = sld [smem:[%s4694_s0 + %s3953_s4]]   ;;  %s3956_s20 = smov 11  }
   0xa   :  { %s4045_s14 = sld [smem:[%s4694_s0 + %s3954_s10]]   ;;  %s3957_s26 = smov 12  }
   0xb   :  { %s4050_s19 = sld [smem:[%s4694_s0 + %s3955_s15]]   ;;  %s3958_s1 = smov 13  }
   0xc   :  { %s4055_s24 = sld [smem:[%s4694_s0 + %s3956_s20]]   ;;  %s3959_s7 = smov 14  }
   0xd   :  { %s4060_s30 = sld [smem:[%s4694_s0 + %s3957_s26]]   ;;  %s3960_s15 = smov 15  }
   0xe   :  { %s4065_s6 = sld [smem:[%s4694_s0 + %s3958_s1]]   ;;  %s3961_s22 = smov 16  }
   0xf   :  { %s4070_s12 = sld [smem:[%s4694_s0 + %s3959_s7]]   ;;  %s3962_s28 = smov 17  }
  0x10   :  { %s4075_s20 = sld [smem:[%s4694_s0 + %s3960_s15]]   ;;  %s3963_s7 = smov 18  }
  0x11   :  { %s4080_s27 = sld [smem:[%s4694_s0 + %s3961_s22]]   ;;  %s3964_s15 = smov 19  }
  0x12   :  { %s4085_s4 = sld [smem:[%s4694_s0 + %s3962_s28]]   ;;  %s3965_s22 = smov 20  }
  0x13   :  { %s3966_s28 = smov 21  }
  0x14   :  { %4698 = sst [smem:[#allocation5_spill]] %s4065_s6 }
  0x15   :  { %4699 = sst [smem:[#allocation6_spill]] %s4070_s12 }
  0x16   :  { %s4090_s12 = sld [smem:[%s4694_s0 + %s3963_s7]]   ;;  %s3967_s7 = smov 22  }
  0x17   :  { %4700 = sst [smem:[#allocation7_spill]] %s4080_s27 }
  0x18   :  { %4701 = sst [smem:[#allocation8_spill]] %s4085_s4 }
  0x19   :  { %s4095_s6 = sld [smem:[%s4694_s0 + %s3964_s15]]   ;;  %s3968_s15 = smov 23  }
  0x1a   :  { %s4100_s27 = sld [smem:[%s4694_s0 + %s3965_s22]]   ;;  %s3969_s22 = smov 24  }
  0x1b   :  { %s4105_s4 = sld [smem:[%s4694_s0 + %s3966_s28]]   ;;  %s3970_s28 = smov 25  }
  0x1c   :  { %4702 = sst [smem:[#allocation9_spill]] %s4090_s12 }
  0x1d   :  { %s4110_s12 = sld [smem:[%s4694_s0 + %s3967_s7]]   ;;  %s3971_s7 = smov 26  }
  0x1f   :  { %4703 = sst [smem:[#allocation10_spill]] %s4095_s6 }
  0x20   :  { %4704 = sst [smem:[#allocation11_spill]] %s4100_s27 }
  0x21   :  { %4705 = sst [smem:[#allocation12_spill]] %s4105_s4 }
  0x22   :  { %s4115_s6 = sld [smem:[%s4694_s0 + %s3968_s15]]   ;;  %s3972_s15 = smov 27  }
  0x23   :  { %4706 = sst [smem:[#allocation13_spill]] %s4110_s12 }
  0x24   :  { %s4120_s27 = sld [smem:[%s4694_s0 + %s3969_s22]]   ;;  %s3973_s22 = smov 28  }
  0x25   :  { %s4125_s4 = sld [smem:[%s4694_s0 + %s3970_s28]]   ;;  %s3974_s28 = smov 29  }
  0x26   :  { %s4130_s12 = sld [smem:[%s4694_s0 + %s3971_s7]]  }
  0x28   :  { %4707 = sst [smem:[#allocation14_spill]] %s4115_s6 }
  0x29   :  { %s4135_s6 = sld [smem:[%s4694_s0 + %s3972_s15]]  }
  0x2a   :  { %4708 = sst [smem:[#allocation15_spill]] %s4120_s27 }
  0x2b   :  { %4709 = sst [smem:[#allocation16_spill]] %s4125_s4 }
  0x2c   :  { %s4140_s27 = sld [smem:[%s4694_s0 + %s3973_s22]]  }
  0x2d   :  { %s4145_s4 = sld [smem:[%s4694_s0 + %s3974_s28]]  }
  0x2e   :  { %v4148_v0 = vld [vmem:[%s4000_s5] sm:$0xff]  ;;  %vm134_vm0 = vcmask 261120   ;;  %v4151_v1 = vld [vmem:[%s4000_s5 + $0x8] sm:$0xff] }
  0x2f   :  { %v135_v2 = vsel %vm134_vm0, %v4148_v0, 0.0  ;;  %v138_v3 = vsel %vm134_vm0, %v4151_v1, 0.0 }
  0x30   :  { %136 = vadd.xlane.f32.xlu0 %v135_v2 }
  0x34   :  { %139 = vadd.xlane.f32.xlu0 %v138_v3 }
  0x35   :  { %64 = vsyncpa [#allocation3], 0  ;;  %v3804_v14 = vld [vmem:[%s4015_s17] sm:$0xff]   ;;  %v3975_v15 = vmov 0.0   ;;  %v3805_v16 = vld [vmem:[%s4015_s17 + $0x8] sm:$0xff]   ;;  %vm3976_vm1 = vmmov 0   ;;  %v126_v47 = vlaneseq }
  0x36   :  { %3438 = vmatprep.subr.bf16.mxu1 %v3975_v15  ;;  %3452 = vmatprep.subr.bf16.mxu0 %v3975_v15  ;;  %v3227_v25 = vld [vmem:[%s4005_s9] ss:$0 sm:$0xff]  ;;  %s3977_s0 = smov 96   ;;  %vm258_vm2 = vcmask 64512   ;;  %v3978_v51 = vmov -1e+30  }
  0x37   :  { %3439 = vmatpush3.bf16.msra.mxu1 %v3804_v14  ;;  %3442 = vmatprep.mubr.msk.bf16.mxu1 %vm3976_vm1, %v3975_v15  ;;  %v3228_v29 = vld [vmem:[%s4010_s13] ss:$0 sm:$0xff]  ;;  %v127_v48 = vshrl.u32 %v126_v47, 7  ;;  %v129_v49 = vand.u32 127, %v126_v47  ;;  %s3979_s5 = smov 64   ;;  %s3980_s9 = smov 88  }
  0x38   :  { %3440 = vmatprep.subr.bf16.mxu1 %v3975_v15  ;;  %3454 = vmatprep.mubr.msk.bf16.mxu0 %vm3976_vm1, %v3975_v15  ;;  %v3229_v34 = vld [vmem:[%s4020_s21] ss:$0 sm:$0xff]  ;;  %vm386_vm4 = vcmask 1043456   ;;  %s3981_s13 = smov 120   ;;  %s3982_s17 = smov 56  }
  0x39   :  { %vm130_vm3 = vcmp.ge.s32.totalorder %v127_v48, %v129_v49  ;;  %s3983_s21 = smov 80   ;;  %s3984_s7 = smov 112  }
  0x3a   :  { %v4197_v52 = vsel %vm130_vm3, 0.0, %v3978_v51  ;;  %s3985_s10 = smov 48   ;;  %s3986_s11 = smov 72  }
  0x3b   :  { %3441 = vmatpush3.bf16.msra.mxu1 %v3805_v16  ;;  %s3987_s15 = smov 104   ;;  %s3988_s16 = smov 40  }
  0x3c   :  { %3446 = vmatprep.subr.bf16.mxu1 %v3975_v15  ;;  %s4719_s18 = sld [smem:[#allocation13_spill]]  ;;  %s4720_s22 = sld [smem:[#allocation15_spill]] }
  0x3d   :  { %s4721_s23 = sld [smem:[#allocation16_spill]] }
  0xbd   :  { %v137_v4 = vpop.xlane.xlu0 %136 }
  0xbe   :  { %v142_v5 = vmul.f32 0.03125, %v137_v4 }
  0xc0   :  { %v144_v6 = vsub.f32 %v4148_v0, %v142_v5 }
  0xc1   :  { %v140_v7 = vpop.xlane.xlu0 %139 }
  0xc2   :  { %v143_v8 = vmul.f32 0.03125, %v140_v7  ;;  %v146_v9 = vmul.f32 %v144_v6, %v144_v6 }
  0xc4   :  { %v145_v10 = vsub.f32 %v4151_v1, %v143_v8  ;;  %v148_v11 = vsel %vm134_vm0, %v146_v9, 0.0 }
  0xc5   :  { %149 = vadd.xlane.f32.xlu1 %v148_v11 }
  0xc6   :  { %v147_v12 = vmul.f32 %v145_v10, %v145_v10 }
  0xc8   :  { %v151_v13 = vsel %vm134_vm0, %v147_v12, 0.0 }
  0xc9   :  { %152 = vadd.xlane.f32.xlu1 %v151_v13 }
 0x152   :  { %v150_v17 = vpop.xlane.xlu1 %149 }
 0x153   :  { %v154_v18 = vmul.f32 0.03125, %v150_v17 }
 0x155   :  { %v156_v19 = vadd.f32 1e-05, %v154_v18 }
 0x156   :  { %v153_v20 = vpop.xlane.xlu1 %152 }
 0x157   :  { %3830 = vrsqrt.f32 %v156_v19  ;;  %v155_v21 = vmul.f32 0.03125, %v153_v20 }
 0x159   :  { %v157_v22 = vadd.f32 1e-05, %v155_v21 }
 0x15b   :  { %3832 = vrsqrt.f32 %v157_v22 }
 0x161   :  { %v3831_v23 = vpop.eup %3830 }
 0x162   :  { %v160_v24 = vmul.f32 %v3831_v23, %v144_v6 }
 0x164   :  { %v168_v28 = vmul.f32 %v3227_v25, %v160_v24 }
 0x165   :  { %v3833_v26 = vpop.eup %3832 }
 0x166   :  { %v161_v27 = vmul.f32 %v3833_v26, %v145_v10  ;;  %v176_v31 = vadd.f32 %v3228_v29, %v168_v28 }
 0x168   :  { %v169_v30 = vmul.f32 %v3227_v25, %v161_v27 }
 0x16a   :  { %v177_v32 = vadd.f32 %v3228_v29, %v169_v30 }
 0x16c   :  { %v178_v33 = vpack.c.bf16 %v177_v32, %v176_v31 }
 0x16e   :  { %3443 = vmatmul.mubr.msk.bf16.vlgmr.msra.gmra.mrb[0].mxu1 %vm134_vm0, %v178_v33 }
 0x16f   :  { %3448 = vmatprep.mubr.msk.bf16.mxu1 %vm3976_vm1, %v3975_v15 }
 0x241   :  { %v239_v35 = vpop.f32.mrb[0].mxu1 }
 0x242   :  { %v240_v36 = vadd.f32 %v3229_v34, %v239_v35  ;;  %v3444_v37 = vpop.f32.mrb[1].mxu1 }
 0x243   :  { %v242_v38 = vpop.f32.mrb[2].mxu1 }
 0x244   :  { %v4177_v39 = vpack.c.bf16 %v240_v36, %v240_v36  ;;  %v243_v40 = vadd.f32 %v3229_v34, %v242_v38  ;;  %v3445_v41 = vpop.f32.mrb[3].mxu1 }
 0x246   :  { %v4179_v42 = vpack.c.bf16 %v243_v40, %v243_v40  ;;  %256 = vrot.lane.b32.xlu0 %v4177_v39, %s3977_s0 }
 0x248   :  { %305 = vrot.lane.b32.xlu1 %v4179_v42, %s3977_s0 }
 0x2b8   :  { %v257_v43 = vpop.permute.xlu0 %256 }
 0x2b9   :  { %v263_v44 = vsel %vm258_vm2, %v257_v43, 0 }
 0x2ba   :  { %3447 = vmatpush3.bf16.xpose.msra.mxu1 %v263_v44  ;;  %v306_v45 = vpop.permute.xlu1 %305 }
 0x2bb   :  { %v311_v46 = vsel %vm258_vm2, %v306_v45, 0  ;;  %3458 = vmatprep.subr.bf16.mxu1 %v3975_v15 }
 0x2bc   :  { %3453 = vmatpush3.bf16.xpose.msra.mxu0 %v311_v46 }
 0x2bd   :  { %3464 = vmatprep.subr.bf16.mxu0 %v3975_v15 }
 0x2c1   :  { %3449 = vmatmul.mubr.msk.bf16.vlgmr.msra.gmra.mrb[4].mxu1 %vm258_vm2, %v4177_v39 }
 0x2c2   :  { %3460 = vmatprep.mubr.msk.bf16.mxu1 %vm3976_vm1, %v3975_v15 }
 0x2c3   :  { %3455 = vmatmul.mubr.msk.bf16.vlgmr.msra.gmra.mrb[0].mxu0 %vm258_vm2, %v4179_v42 }
 0x2c4   :  { %3466 = vmatprep.mubr.msk.bf16.mxu0 %vm3976_vm1, %v3975_v15 }
 0x394   :  { %v299_v50 = vpop.f32.mrb[4].mxu1 }
 0x395   :  { %v353_v53 = vmul.f32 0.35355338, %v299_v50  ;;  %v3450_v54 = vpop.f32.mrb[5].mxu1 }
 0x396   :  { %v302_v55 = vpop.f32.mrb[6].mxu1  ;;  %v347_v56 = vpop.f32.mrb[0].mxu0 }
 0x397   :  { %v354_v57 = vmul.f32 0.35355338, %v347_v56  ;;  %v3451_v58 = vpop.f32.mrb[7].mxu1  ;;  %v3456_v59 = vpop.f32.mrb[1].mxu0  ;;  %v355_v60 = vadd.f32 %v353_v53, %v4197_v52 }
 0x398   :  { %v350_v61 = vpop.f32.mrb[2].mxu0 }
 0x399   :  { %v3457_v62 = vpop.f32.mrb[3].mxu0  ;;  %v357_v63 = vsel %vm258_vm2, %v355_v60, -inf  ;;  %v356_v2 = vadd.f32 %v354_v57, %v4197_v52 }
 0x39a   :  { %358 = vmax.xlane.f32.xlu1 %v357_v63 }
 0x39b   :  { %v360_v3 = vsel %vm258_vm2, %v356_v2, -inf }
 0x39c   :  { %361 = vmax.xlane.f32.xlu0 %v360_v3 }
 0x3ab   :  { %430 = vrot.lane.b32.xlu1 %v4179_v42, %s3979_s5 }
 0x3af   :  { %481 = vrot.lane.b32.xlu1 %v4177_v39, %s3980_s9 }
 0x427   :  { %v359_v4 = vpop.xlane.xlu1 %358 }
 0x428   :  { %v363_v5 = vsub.f32 %v355_v60, %v359_v4 }
 0x429   :  { %v362_v6 = vpop.xlane.xlu0 %361 }
 0x42a   :  { %v365_v7 = vmul.f32 1.442695, %v363_v5  ;;  %v364_v8 = vsub.f32 %v356_v2, %v362_v6 }
 0x42b   :  { %v431_v9 = vpop.permute.xlu1 %430 }
 0x42c   :  { %3834 = vpow2.f32 %v365_v7  ;;  %v367_v10 = vmul.f32 1.442695, %v364_v8  ;;  %v436_v11 = vsel %vm386_vm4, %v431_v9, 0 }
 0x42d   :  { %3465 = vmatpush3.bf16.msra.mxu0 %v436_v11 }
 0x42e   :  { %3836 = vpow2.f32 %v367_v10  ;;  %3476 = vmatprep.subr.bf16.mxu0 %v3975_v15 }
 0x42f   :  { %v482_v17 = vpop.permute.xlu1 %481 }
 0x430   :  { %v487_v28 = vsel %vm258_vm2, %v482_v17, 0 }
 0x436   :  { %v3835_v12 = vpop.eup %3834 }
 0x437   :  { %v369_v13 = vsel %vm258_vm2, %v3835_v12, 0.0 }
 0x438   :  { %v3837_v14 = vpop.eup %3836  ;;  %370 = vadd.xlane.f32.xlu0 %v369_v13 }
 0x439   :  { %v372_v16 = vsel %vm258_vm2, %v3837_v14, 0.0 }
 0x43a   :  { %373 = vadd.xlane.f32.xlu1 %v372_v16 }
 0x44b   :  { %531 = vrot.lane.b32.xlu1 %v4179_v42, %s3980_s9 }
 0x44e   :  { %381 = vrot.lane.b32.xlu0 %v4177_v39, %s3979_s5 }
 0x44f   :  { %529 = vrot.lane.b32.xlu1 %v4179_v42, %s3981_s13 }
 0x452   :  { %479 = vrot.lane.b32.xlu0 %v4177_v39, %s3981_s13 }
 0x4c5   :  { %v371_v18 = vpop.xlane.xlu0 %370 }
 0x4c6   :  { %3838 = vrcp.f32 %v371_v18 }
 0x4c7   :  { %v374_v19 = vpop.xlane.xlu1 %373 }
 0x4c8   :  { %3840 = vrcp.f32 %v374_v19 }
 0x4c9   :  { %v382_v20 = vpop.permute.xlu0 %381 }
 0x4ca   :  { %v388_v21 = vsel %vm386_vm4, %v382_v20, 0  ;;  %v247_v20 = vld [vmem:[%s4025_s25] sm:$0xf] }
 0x4cb   :  { %3459 = vmatpush3.bf16.msra.mxu1 %v388_v21  ;;  %v532_v27 = vpop.permute.xlu1 %531 }
 0x4cc   :  { %3470 = vmatprep.subr.bf16.mxu1 %v3975_v15  ;;  %v537_v30 = vsel %vm258_vm2, %v532_v27, 0 }
 0x4cd   :  { %v480_v31 = vpop.permute.xlu0 %479 }
 0x4cf   :  { %v530_v32 = vpop.permute.xlu1 %529 }
 0x4d0   :  { %v3839_v22 = vpop.eup %3838 }
 0x4d1   :  { %v377_v23 = vmul.f32 %v3839_v22, %v3835_v12 }
 0x4d2   :  { %v3841_v24 = vpop.eup %3840 }
 0x4d3   :  { %v378_v25 = vmul.f32 %v3841_v24, %v3837_v14  ;;  %v379_v26 = vpack.c.bf16 %v377_v23, %v377_v23  ;;  %v248_v14 = vld [vmem:[%s4025_s25 + $0x4] sm:$0xf]  ;;  %v755_v23 = vsel %vm386_vm4, %v247_v20, 0 }
 0x4d4   :  { %v708_v18 = vsel %vm386_vm4, %v248_v14, 0 }
 0x4d5   :  { %3461 = vmatmul.mubr.msk.bf16.vlgmr.msra.gmra.mrb[8].mxu1 %vm258_vm2, %v379_v26  ;;  %v380_v29 = vpack.c.bf16 %v378_v25, %v378_v25 }
 0x4d6   :  { %3471 = vmatpush3.bf16.xpose.msra.mxu1 %v487_v28  ;;  %3472 = vmatprep.mubr.msk.bf16.mxu1 %vm3976_vm1, %v3975_v15 }
 0x4d7   :  { %3467 = vmatmul.mubr.msk.bf16.vlgmr.msra.gmra.mrb[4].mxu0 %vm258_vm2, %v380_v29  ;;  %3482 = vmatprep.subr.bf16.mxu1 %v3975_v15 }
 0x4d8   :  { %3477 = vmatpush3.bf16.xpose.msra.mxu0 %v537_v30  ;;  %3478 = vmatprep.mubr.msk.bf16.mxu0 %vm3976_vm1, %v3975_v15 }
 0x4d9   :  { %3488 = vmatprep.subr.bf16.mxu0 %v3975_v15 }
 0x4dd   :  { %3473 = vmatmul.mubr.msk.bf16.vlgmr.msra.gmra.mrb[12].mxu1 %vm258_vm2, %v480_v31 }
 0x4de   :  { %3484 = vmatprep.mubr.msk.bf16.mxu1 %vm3976_vm1, %v3975_v15 }
 0x4df   :  { %3479 = vmatmul.mubr.msk.bf16.vlgmr.msra.gmra.mrb[8].mxu0 %vm258_vm2, %v530_v32 }
 0x4e0   :  { %3490 = vmatprep.mubr.msk.bf16.mxu0 %vm3976_vm1, %v3975_v15 }
 0x5a8   :  { %v4237_v33 = vpop.f32.mrb[8].mxu1 }
 0x5a9   :  { %v3462_v34 = vpop.f32.mrb[9].mxu1 }
 0x5aa   :  { %v427_v35 = vpop.f32.mrb[10].mxu1  ;;  %v4239_v36 = vpop.f32.mrb[4].mxu0 }
 0x5ab   :  { %v478_v37 = vpack.c.bf16 %v4239_v36, %v4237_v33  ;;  %v3463_v38 = vpop.f32.mrb[11].mxu1  ;;  %v3468_v40 = vpop.f32.mrb[5].mxu0 }
 0x5ac   :  { %v475_v41 = vpop.f32.mrb[6].mxu0 }
 0x5ad   :  { %v3469_v43 = vpop.f32.mrb[7].mxu0 }
 0x5b0   :  { %v523_v44 = vpop.f32.mrb[12].mxu1 }
 0x5b1   :  { %v579_v45 = vmul.f32 0.35355338, %v523_v44  ;;  %v3474_v46 = vpop.f32.mrb[13].mxu1 }
 0x5b2   :  { %v526_v47 = vpop.f32.mrb[14].mxu1  ;;  %v573_v48 = vpop.f32.mrb[8].mxu0 }
 0x5b3   :  { %v580_v49 = vmul.f32 0.35355338, %v573_v48  ;;  %v3475_v50 = vpop.f32.mrb[15].mxu1  ;;  %v3480_v51 = vpop.f32.mrb[9].mxu0  ;;  %v581_v53 = vadd.f32 %v579_v45, %v4197_v52 }
 0x5b4   :  { %v576_v54 = vpop.f32.mrb[10].mxu0 }
 0x5b5   :  { %v3481_v55 = vpop.f32.mrb[11].mxu0  ;;  %v583_v56 = vsel %vm258_vm2, %v581_v53, -inf  ;;  %v582_v57 = vadd.f32 %v580_v49, %v4197_v52 }
 0x5b6   :  { %584 = vmax.xlane.f32.xlu0 %v583_v56 }
 0x5b7   :  { %v586_v58 = vsel %vm258_vm2, %v582_v57, -inf }
 0x5b8   :  { %587 = vmax.xlane.f32.xlu1 %v586_v58 }
 0x5c9   :  { %655 = vrot.lane.b32.xlu1 %v4179_v42, %s3982_s17 }
 0x5cd   :  { %800 = vrot.lane.b32.xlu1 %v4177_v39, %s3983_s21 }
 0x5d1   :  { %850 = vrot.lane.b32.xlu1 %v4179_v42, %s3983_s21 }
 0x5d5   :  { %848 = vrot.lane.b32.xlu1 %v4179_v42, %s3984_s7 }
 0x643   :  { %v585_v59 = vpop.xlane.xlu0 %584 }
 0x644   :  { %v589_v60 = vsub.f32 %v581_v53, %v585_v59 }
 0x645   :  { %v588_v61 = vpop.xlane.xlu1 %587 }
 0x646   :  { %v591_v62 = vmul.f32 1.442695, %v589_v60  ;;  %v590_v63 = vsub.f32 %v582_v57, %v588_v61 }
 0x648   :  { %3842 = vpow2.f32 %v591_v62  ;;  %v593_v2 = vmul.f32 1.442695, %v590_v63 }
 0x649   :  { %v656_v3 = vpop.permute.xlu1 %655 }
 0x64a   :  { %3844 = vpow2.f32 %v593_v2  ;;  %v661_v4 = vsel %vm386_vm4, %v656_v3, 0 }
 0x64b   :  { %3489 = vmatpush3.bf16.msra.mxu0 %v661_v4 }
 0x64c   :  { %3500 = vmatprep.subr.bf16.mxu0 %v3975_v15 }
 0x64d   :  { %v801_v24 = vpop.permute.xlu1 %800 }
 0x64e   :  { %v806_v36 = vsel %vm258_vm2, %v801_v24, 0 }
 0x651   :  { %v851_v25 = vpop.permute.xlu1 %850 }
 0x652   :  { %v3843_v5 = vpop.eup %3842  ;;  %v856_v26 = vsel %vm258_vm2, %v851_v25, 0 }
 0x653   :  { %v595_v6 = vsel %vm258_vm2, %v3843_v5, 0.0 }
 0x654   :  { %v3845_v7 = vpop.eup %3844  ;;  %596 = vadd.xlane.f32.xlu0 %v595_v6 }
 0x655   :  { %v598_v8 = vsel %vm258_vm2, %v3845_v7, 0.0  ;;  %v849_v27 = vpop.permute.xlu1 %848 }
 0x658   :  { %599 = vadd.xlane.f32.xlu0 %v598_v8 }
 0x66e   :  { %607 = vrot.lane.b32.xlu0 %v4177_v39, %s3982_s17 }
 0x672   :  { %798 = vrot.lane.b32.xlu0 %v4177_v39, %s3984_s7 }
 0x6e1   :  { %v597_v9 = vpop.xlane.xlu0 %596 }
 0x6e2   :  { %3846 = vrcp.f32 %v597_v9 }
 0x6e5   :  { %v600_v10 = vpop.xlane.xlu0 %599 }
 0x6e6   :  { %3848 = vrcp.f32 %v600_v10 }
 0x6e9   :  { %v608_v11 = vpop.permute.xlu0 %607 }
 0x6ea   :  { %v613_v12 = vsel %vm386_vm4, %v608_v11, 0 }
 0x6eb   :  { %3483 = vmatpush3.bf16.msra.mxu1 %v613_v12 }
 0x6ec   :  { %v3847_v13 = vpop.eup %3846  ;;  %3494 = vmatprep.subr.bf16.mxu1 %v3975_v15 }
 0x6ed   :  { %v603_v16 = vmul.f32 %v3847_v13, %v3843_v5  ;;  %v799_v41 = vpop.permute.xlu0 %798 }
 0x6ef   :  { %v605_v17 = vpack.c.bf16 %v603_v16, %v603_v16 }
 0x6f0   :  { %v3849_v19 = vpop.eup %3848 }
 0x6f1   :  { %v604_v21 = vmul.f32 %v3849_v19, %v3845_v7  ;;  %3485 = vmatmul.mubr.msk.bf16.vlgmr.msra.gmra.mrb[16].mxu1 %vm258_vm2, %v605_v17 }
 0x6f2   :  { %3495 = vmatpush3.bf16.msra.mxu1 %v708_v18  ;;  %3496 = vmatprep.mubr.msk.bf16.mxu1 %vm3976_vm1, %v3975_v15 }
 0x6f3   :  { %v606_v22 = vpack.c.bf16 %v604_v21, %v604_v21  ;;  %3506 = vmatprep.subr.bf16.mxu1 %v3975_v15 }
 0x6f5   :  { %3491 = vmatmul.mubr.msk.bf16.vlgmr.msra.gmra.mrb[12].mxu0 %vm258_vm2, %v606_v22 }
 0x6f6   :  { %3501 = vmatpush3.bf16.msra.mxu0 %v755_v23  ;;  %3502 = vmatprep.mubr.msk.bf16.mxu0 %vm3976_vm1, %v3975_v15 }
 0x6f7   :  { %3512 = vmatprep.subr.bf16.mxu0 %v3975_v15 }
 0x6fd   :  { %3503 = vmatmul.mubr.msk.bf16.vlgmr.msra.gmra.mrb[16].mxu0 %vm258_vm2, %v478_v37 }
 0x6fe   :  { %3514 = vmatprep.mubr.msk.bf16.mxu0 %vm3976_vm1, %v3975_v15 }
 0x6ff   :  { %3513 = vmatpush3.bf16.xpose.msra.mxu0 %v856_v26 }
 0x700   :  { %3524 = vmatprep.subr.bf16.mxu0 %v3975_v15 }
 0x706   :  { %3515 = vmatmul.mubr.msk.bf16.vlgmr.msra.gmra.mrb[20].mxu0 %vm258_vm2, %v849_v27 }
 0x707   :  { %3526 = vmatprep.mubr.msk.bf16.mxu0 %vm3976_vm1, %v3975_v15 }
 0x7c4   :  { %v649_v28 = vpop.f32.mrb[16].mxu1 }
 0x7c5   :  { %v3486_v29 = vpop.f32.mrb[17].mxu1 }
 0x7c6   :  { %v652_v30 = vpop.f32.mrb[18].mxu1 }
 0x7c7   :  { %v3487_v31 = vpop.f32.mrb[19].mxu1 }
 0x7c8   :  { %v697_v32 = vpop.f32.mrb[12].mxu0 }
 0x7c9   :  { %v703_v33 = vpack.c.bf16 %v697_v32, %v649_v28  ;;  %v3492_v34 = vpop.f32.mrb[13].mxu0 }
 0x7ca   :  { %v700_v35 = vpop.f32.mrb[14].mxu0  ;;  %v249_v34 = vld [vmem:[%s4025_s25 + $0x8] sm:$0xf] }
 0x7cb   :  { %v3493_v37 = vpop.f32.mrb[15].mxu0  ;;  %3497 = vmatmul.mubr.msk.bf16.vlgmr.msra.gmra.mrb[20].mxu1 %vm258_vm2, %v703_v33  ;;  %v1027_v35 = vsel %vm386_vm4, %v249_v34, 0 }
 0x7cc   :  { %3507 = vmatpush3.bf16.xpose.msra.mxu1 %v806_v36  ;;  %3508 = vmatprep.mubr.msk.bf16.mxu1 %vm3976_vm1, %v3975_v15 }
 0x7cd   :  { %3518 = vmatprep.subr.bf16.mxu1 %v3975_v15 }
 0x7d0   :  { %v791_v38 = vpop.f32.mrb[16].mxu0 }
 0x7d1   :  { %v3504_v40 = vpop.f32.mrb[17].mxu0 }
 0x7d2   :  { %v794_v43 = vpop.f32.mrb[18].mxu0 }
 0x7d3   :  { %v3505_v44 = vpop.f32.mrb[19].mxu0  ;;  %3509 = vmatmul.mubr.msk.bf16.vlgmr.msra.gmra.mrb[24].mxu1 %vm258_vm2, %v799_v41 }
 0x7d4   :  { %3520 = vmatprep.mubr.msk.bf16.mxu1 %vm3976_vm1, %v3975_v15 }
 0x7d9   :  { %v892_v45 = vpop.f32.mrb[20].mxu0 }
 0x7da   :  { %v899_v46 = vmul.f32 0.35355338, %v892_v45  ;;  %v3516_v47 = vpop.f32.mrb[21].mxu0 }
 0x7db   :  { %v895_v48 = vpop.f32.mrb[22].mxu0 }
 0x7dc   :  { %v3517_v49 = vpop.f32.mrb[23].mxu0  ;;  %v901_v50 = vadd.f32 %v899_v46, %v4197_v52 }
 0x7de   :  { %v905_v51 = vsel %vm258_vm2, %v901_v50, -inf }
 0x7df   :  { %906 = vmax.xlane.f32.xlu1 %v905_v51 }
 0x7f0   :  { %974 = vrot.lane.b32.xlu1 %v4179_v42, %s3985_s10 }
 0x7f4   :  { %1074 = vrot.lane.b32.xlu1 %v4177_v39, %s3986_s11 }
 0x7f8   :  { %1124 = vrot.lane.b32.xlu1 %v4179_v42, %s3986_s11 }
 0x7fc   :  { %1122 = vrot.lane.b32.xlu1 %v4179_v42, %s3987_s15 }
 0x86c   :  { %v907_v53 = vpop.xlane.xlu1 %906 }
 0x86d   :  { %v909_v56 = vsub.f32 %v901_v50, %v907_v53 }
 0x86f   :  { %v912_v57 = vmul.f32 1.442695, %v909_v56 }
 0x870   :  { %v975_v54 = vpop.permute.xlu1 %974 }
 0x871   :  { %v980_v55 = vsel %vm386_vm4, %v975_v54, 0  ;;  %3850 = vpow2.f32 %v912_v57 }
 0x872   :  { %3525 = vmatpush3.bf16.msra.mxu0 %v980_v55 }
 0x873   :  { %3536 = vmatprep.subr.bf16.mxu0 %v3975_v15 }
 0x874   :  { %v1075_v20 = vpop.permute.xlu1 %1074 }
 0x875   :  { %v1080_v22 = vsel %vm258_vm2, %v1075_v20, 0 }
 0x878   :  { %v1125_v45 = vpop.permute.xlu1 %1124 }
 0x879   :  { %v1130_v50 = vsel %vm258_vm2, %v1125_v45, 0 }
 0x87b   :  { %v3851_v9 = vpop.eup %3850 }
 0x87c   :  { %v917_v10 = vsel %vm258_vm2, %v3851_v9, 0.0  ;;  %v1123_v53 = vpop.permute.xlu1 %1122 }
 0x89e   :  { %v744_v58 = vpop.f32.mrb[20].mxu1 }
 0x89f   :  { %v4308_v59 = vadd.f32 %v791_v38, %v744_v58  ;;  %v3498_v60 = vpop.f32.mrb[21].mxu1 }
 0x8a0   :  { %v747_v61 = vpop.f32.mrb[22].mxu1 }
 0x8a1   :  { %v4310_v62 = vadd.f32 %v794_v43, %v747_v61  ;;  %v3499_v63 = vpop.f32.mrb[23].mxu1 }
 0x8a6   :  { %v842_v2 = vpop.f32.mrb[24].mxu1 }
 0x8a7   :  { %v898_v3 = vmul.f32 0.35355338, %v842_v2  ;;  %v3510_v4 = vpop.f32.mrb[25].mxu1 }
 0x8a8   :  { %v845_v5 = vpop.f32.mrb[26].mxu1 }
 0x8a9   :  { %v3511_v6 = vpop.f32.mrb[27].mxu1  ;;  %v900_v7 = vadd.f32 %v898_v3, %v4197_v52 }
 0x8ab   :  { %v902_v8 = vsel %vm258_vm2, %v900_v7, -inf }
 0x8ac   :  { %903 = vmax.xlane.f32.xlu0 %v902_v8 }
 0x8b0   :  { %918 = vadd.xlane.f32.xlu0 %v917_v10 }
 0x939   :  { %v904_v11 = vpop.xlane.xlu0 %903 }
 0x93a   :  { %v908_v12 = vsub.f32 %v900_v7, %v904_v11 }
 0x93c   :  { %v910_v13 = vmul.f32 1.442695, %v908_v12 }
 0x93d   :  { %v919_v14 = vpop.xlane.xlu0 %918 }
 0x93e   :  { %3852 = vpow2.f32 %v910_v13 }
 0x93f   :  { %3854 = vrcp.f32 %v919_v14 }
 0x948   :  { %v3853_v16 = vpop.eup %3852 }
 0x949   :  { %v3855_v17 = vpop.eup %3854  ;;  %v914_v18 = vsel %vm258_vm2, %v3853_v16, 0.0 }
 0x94a   :  { %v923_v19 = vmul.f32 %v3855_v17, %v3851_v9  ;;  %915 = vadd.xlane.f32.xlu0 %v914_v18 }
 0x94c   :  { %v925_v21 = vpack.c.bf16 %v923_v19, %v923_v19 }
 0x94e   :  { %3527 = vmatmul.mubr.msk.bf16.vlgmr.msra.gmra.mrb[24].mxu0 %vm258_vm2, %v925_v21 }
 0x94f   :  { %3537 = vmatpush3.bf16.xpose.msra.mxu0 %v1080_v22  ;;  %3538 = vmatprep.mubr.msk.bf16.mxu0 %vm3976_vm1, %v3975_v15 }
 0x950   :  { %3548 = vmatprep.subr.bf16.mxu0 %v3975_v15 }
 0x960   :  { %926 = vrot.lane.b32.xlu0 %v4177_v39, %s3985_s10 }
 0x964   :  { %1072 = vrot.lane.b32.xlu0 %v4177_v39, %s3987_s15 }
 0x9d7   :  { %v916_v23 = vpop.xlane.xlu0 %915 }
 0x9d8   :  { %3856 = vrcp.f32 %v916_v23 }
 0x9db   :  { %v927_v24 = vpop.permute.xlu0 %926 }
 0x9dc   :  { %v932_v25 = vsel %vm386_vm4, %v927_v24, 0 }
 0x9dd   :  { %3519 = vmatpush3.bf16.msra.mxu1 %v932_v25 }
 0x9de   :  { %3530 = vmatprep.subr.bf16.mxu1 %v3975_v15 }
 0x9df   :  { %v1073_v26 = vpop.permute.xlu0 %1072 }
 0x9e0   :  { %3539 = vmatmul.mubr.msk.bf16.vlgmr.msra.gmra.mrb[28].mxu0 %vm258_vm2, %v1073_v26  ;;  %v250_v26 = vld [vmem:[%s4025_s25 + $0xc] sm:$0xf]  ;;  %s4710_s25 = sld [smem:[#allocation5_spill]] }
 0x9e1   :  { %3550 = vmatprep.mubr.msk.bf16.mxu0 %vm3976_vm1, %v3975_v15 }
 0x9e2   :  { %v3857_v27 = vpop.eup %3856 }
 0x9e3   :  { %v922_v28 = vmul.f32 %v3857_v27, %v3853_v16  ;;  %v1301_v27 = vsel %vm386_vm4, %v250_v26, 0 }
 0x9e5   :  { %v924_v29 = vpack.c.bf16 %v922_v28, %v922_v28 }
 0x9e7   :  { %3521 = vmatmul.mubr.msk.bf16.vlgmr.msra.gmra.mrb[28].mxu1 %vm258_vm2, %v924_v29 }
 0x9e8   :  { %3532 = vmatprep.mubr.msk.bf16.mxu1 %vm3976_vm1, %v3975_v15  ;;  %3531 = vmatpush3.bf16.msra.mxu1 %v1027_v35 }
 0x9e9   :  { %3542 = vmatprep.subr.bf16.mxu1 %v3975_v15 }
 0xa21   :  { %v1016_v30 = vpop.f32.mrb[24].mxu0 }
 0xa22   :  { %v3528_v31 = vpop.f32.mrb[25].mxu0 }
 0xa23   :  { %v1019_v32 = vpop.f32.mrb[26].mxu0 }
 0xa24   :  { %v3529_v33 = vpop.f32.mrb[27].mxu0 }
 0xab3   :  { %v1116_v36 = vpop.f32.mrb[28].mxu0 }
 0xab4   :  { %v1172_v37 = vmul.f32 0.35355338, %v1116_v36  ;;  %v3540_v38 = vpop.f32.mrb[29].mxu0 }
 0xab5   :  { %v1119_v40 = vpop.f32.mrb[30].mxu0 }
 0xab6   :  { %v3541_v41 = vpop.f32.mrb[31].mxu0  ;;  %v1174_v43 = vadd.f32 %v1172_v37, %v4197_v52 }
 0xab7   :  { %v3255_v41 = vld [vmem:[%s4030_s29] ss:$0 sm:$0xff]  ;;  %s4711_s29 = sld [smem:[#allocation6_spill]] }
 0xab8   :  { %v1176_v44 = vsel %vm258_vm2, %v1174_v43, -inf }
 0xab9   :  { %1177 = vmax.xlane.f32.xlu0 %v1176_v44 }
 0xaba   :  { %v968_v46 = vpop.f32.mrb[28].mxu1 }
 0xabb   :  { %v1022_v47 = vpack.c.bf16 %v1016_v30, %v968_v46  ;;  %v3522_v48 = vpop.f32.mrb[29].mxu1 }
 0xabc   :  { %v971_v49 = vpop.f32.mrb[30].mxu1 }
 0xabd   :  { %v3523_v51 = vpop.f32.mrb[31].mxu1  ;;  %3533 = vmatmul.mubr.msk.bf16.vlgmr.msra.gmra.mrb[32].mxu1 %vm258_vm2, %v1022_v47 }
 0xabe   :  { %3543 = vmatpush3.bf16.xpose.msra.mxu1 %v1130_v50  ;;  %3544 = vmatprep.mubr.msk.bf16.mxu1 %vm3976_vm1, %v3975_v15 }
 0xabf   :  { %3554 = vmatprep.subr.bf16.mxu1 %v3975_v15 }
 0xac5   :  { %3545 = vmatmul.mubr.msk.bf16.vlgmr.msra.gmra.mrb[36].mxu1 %vm258_vm2, %v1123_v53 }
 0xac6   :  { %3556 = vmatprep.mubr.msk.bf16.mxu1 %vm3976_vm1, %v3975_v15 }
 0xb46   :  { %v1178_v54 = vpop.xlane.xlu0 %1177 }
 0xb47   :  { %v1182_v55 = vsub.f32 %v1174_v43, %v1178_v54 }
 0xb49   :  { %v1184_v56 = vmul.f32 1.442695, %v1182_v55 }
 0xb4b   :  { %3858 = vpow2.f32 %v1184_v56 }
 0xb55   :  { %v3859_v57 = vpop.eup %3858 }
 0xb56   :  { %v1188_v58 = vsel %vm258_vm2, %v3859_v57, 0.0 }
 0xb57   :  { %1189 = vadd.xlane.f32.xlu0 %v1188_v58 }
 0xb90   :  { %v1063_v60 = vpop.f32.mrb[32].mxu1 }
 0xb91   :  { %v1070_v61 = vadd.f32 %v1063_v60, %v4308_v59  ;;  %v3534_v63 = vpop.f32.mrb[33].mxu1 }
 0xb92   :  { %v1066_v2 = vpop.f32.mrb[34].mxu1  ;;  %v3806_v63 = vld [vmem:[%s4045_s14] sm:$0xff]  }
 0xb93   :  { %v4349_v3 = vadd.f32 %v1066_v2, %v4310_v62  ;;  %v3535_v4 = vpop.f32.mrb[35].mxu1  ;;  %v3807_v2 = vld [vmem:[%s4045_s14 + $0x8] sm:$0xff]   ;;  %s4714_s14 = sld [smem:[#allocation9_spill]] }
 0xb98   :  { %v1166_v5 = vpop.f32.mrb[36].mxu1 }
 0xb99   :  { %v1173_v6 = vmul.f32 0.35355338, %v1166_v5  ;;  %v3546_v7 = vpop.f32.mrb[37].mxu1 }
 0xb9a   :  { %v1169_v8 = vpop.f32.mrb[38].mxu1 }
 0xb9b   :  { %v3547_v9 = vpop.f32.mrb[39].mxu1  ;;  %v1175_v10 = vadd.f32 %v1173_v6, %v4197_v52 }
 0xb9d   :  { %v1179_v11 = vsel %vm258_vm2, %v1175_v10, -inf }
 0xb9e   :  { %1180 = vmax.xlane.f32.xlu1 %v1179_v11 }
 0xbaf   :  { %1248 = vrot.lane.b32.xlu1 %v4179_v42, %s3988_s16 }
 0xbe4   :  { %v1190_v18 = vpop.xlane.xlu0 %1189 }
 0xc2b   :  { %v1181_v59 = vpop.xlane.xlu1 %1180 }
 0xc2c   :  { %v1183_v12 = vsub.f32 %v1175_v10, %v1181_v59  ;;  %v3256_v10 = vld [vmem:[%s4035_s3] ss:$0 sm:$0xff]  ;;  %s4712_s3 = sld [smem:[#allocation7_spill]] }
 0xc2e   :  { %v1186_v13 = vmul.f32 1.442695, %v1183_v12 }
 0xc2f   :  { %v1249_v62 = vpop.permute.xlu1 %1248 }
 0xc30   :  { %3860 = vpow2.f32 %v1186_v13  ;;  %v1254_v14 = vsel %vm386_vm4, %v1249_v62, 0  ;;  %v3257_v62 = vld [vmem:[%s4040_s8] ss:$0 sm:$0xff]  ;;  %s4713_s8 = sld [smem:[#allocation8_spill]] }
 0xc31   :  { %3555 = vmatpush3.bf16.msra.mxu1 %v1254_v14  ;;  %3862 = vrcp.f32 %v1190_v18 }
 0xc32   :  { %3566 = vmatprep.subr.bf16.mxu1 %v3975_v15 }
 0xc3a   :  { %v3861_v16 = vpop.eup %3860 }
 0xc3b   :  { %v1191_v17 = vsel %vm258_vm2, %v3861_v16, 0.0  ;;  %v3863_v42 = vpop.eup %3862 }
 0xc3c   :  { %1192 = vadd.xlane.f32.xlu0 %v1191_v17  ;;  %v1196_v20 = vmul.f32 %v3863_v42, %v3859_v57  ;;  %v3808_v42 = vld [vmem:[%s4055_s24] sm:$0xff]  }
 0xc3e   :  { %v1198_v23 = vpack.c.bf16 %v1196_v20, %v1196_v20  ;;  %v3810_v20 = vld [vmem:[%s4055_s24 + $0x10] sm:$0xff]  }
 0xc52   :  { %1200 = vrot.lane.b32.xlu0 %v4177_v39, %s3988_s16 }
 0xcc9   :  { %v1193_v19 = vpop.xlane.xlu0 %1192 }
 0xcca   :  { %3864 = vrcp.f32 %v1193_v19  ;;  %v3809_v19 = vld [vmem:[%s4055_s24 + $0x8] sm:$0xff]  }
 0xccd   :  { %v1201_v21 = vpop.permute.xlu0 %1200 }
 0xcce   :  { %v1206_v22 = vsel %vm386_vm4, %v1201_v21, 0  ;;  %v3811_v21 = vld [vmem:[%s4055_s24 + $0x18] sm:$0xff]  }
 0xccf   :  { %3549 = vmatpush3.bf16.msra.mxu0 %v1206_v22  ;;  %v3812_v22 = vld [vmem:[%s4055_s24 + $0x20] sm:$0xff]  }
 0xcd0   :  { %3560 = vmatprep.subr.bf16.mxu0 %v3975_v15 }
 0xcd2   :  { %3551 = vmatmul.mubr.msk.bf16.vlgmr.msra.gmra.mrb[32].mxu0 %vm258_vm2, %v1198_v23  ;;  %v3813_v23 = vld [vmem:[%s4055_s24 + $0x28] sm:$0xff]  }
 0xcd3   :  { %3562 = vmatprep.mubr.msk.bf16.mxu0 %vm3976_vm1, %v3975_v15  ;;  %3561 = vmatpush3.bf16.msra.mxu0 %v1301_v27 }
 0xcd4   :  { %v3865_v39 = vpop.eup %3864  ;;  %3574 = vmatprep.subr.bf16.mxu0 %v3975_v15 }
 0xcd5   :  { %v1197_v24 = vmul.f32 %v3865_v39, %v3861_v16  ;;  %v3814_v39 = vld [vmem:[%s4055_s24 + $0x30] sm:$0xff]  }
 0xcd7   :  { %v1199_v25 = vpack.c.bf16 %v1197_v24, %v1197_v24  ;;  %v3815_v24 = vld [vmem:[%s4055_s24 + $0x38] sm:$0xff]   ;;  %s4716_s24 = sld [smem:[#allocation10_spill]] }
 0xcd9   :  { %3557 = vmatmul.mubr.msk.bf16.vlgmr.msra.gmra.mrb[40].mxu1 %vm258_vm2, %v1199_v25  ;;  %v3258_v25 = vld [vmem:[%s4050_s19] ss:$0 sm:$0xff]  ;;  %s4715_s19 = sld [smem:[#allocation12_spill]] }
 0xcda   :  { %3570 = vmatprep.mubr.msk.bf16.mxu1 %vm3976_vm1, %v3975_v15  ;;  %3567 = vmatpush3.bf16.msra.mxu1 %v3806_v63 }
 0xcdb   :  { %3568 = vmatprep.subr.bf16.mxu1 %v3975_v15 }
 0xcde   :  { %3569 = vmatpush3.bf16.msra.mxu1 %v3807_v2 }
 0xcdf   :  { %3594 = vmatprep.subr.bf16.mxu1 %v3975_v15 }
 0xda5   :  { %v1242_v28 = vpop.f32.mrb[32].mxu0 }
 0xda6   :  { %v3552_v29 = vpop.f32.mrb[33].mxu0 }
 0xda7   :  { %v1245_v30 = vpop.f32.mrb[34].mxu0 }
 0xda8   :  { %v3553_v31 = vpop.f32.mrb[35].mxu0 }
 0xdac   :  { %v1290_v32 = vpop.f32.mrb[40].mxu1 }
 0xdad   :  { %v1296_v33 = vpack.c.bf16 %v1290_v32, %v1242_v28  ;;  %v3558_v34 = vpop.f32.mrb[41].mxu1 }
 0xdae   :  { %v1293_v35 = vpop.f32.mrb[42].mxu1 }
 0xdaf   :  { %v3559_v36 = vpop.f32.mrb[43].mxu1  ;;  %3563 = vmatmul.mubr.msk.bf16.vlgmr.msra.gmra.mrb[36].mxu0 %vm258_vm2, %v1296_v33 }
 0xdb0   :  { %3590 = vmatprep.mubr.msk.bf16.mxu0 %vm3976_vm1, %v3975_v15  ;;  %3575 = vmatpush3.bf16.msra.mxu0 %v3808_v42 }
 0xdb1   :  { %3576 = vmatprep.subr.bf16.mxu0 %v3975_v15 }
 0xdb4   :  { %3577 = vmatpush3.bf16.msra.mxu0 %v3809_v19 }
 0xdb5   :  { %3578 = vmatprep.subr.bf16.mxu0 %v3975_v15 }
 0xdb8   :  { %3579 = vmatpush3.bf16.msra.mxu0 %v3810_v20  ;;  %v3271_v20 = vld [vmem:[%s4710_s25] ss:$0 sm:$0xff] }
 0xdb9   :  { %3580 = vmatprep.subr.bf16.mxu0 %v3975_v15 }
 0xdbc   :  { %3581 = vmatpush3.bf16.msra.mxu0 %v3811_v21 }
 0xdbd   :  { %3582 = vmatprep.subr.bf16.mxu0 %v3975_v15 }
 0xdc0   :  { %3583 = vmatpush3.bf16.msra.mxu0 %v3812_v22 }
 0xdc1   :  { %3584 = vmatprep.subr.bf16.mxu0 %v3975_v15 }
 0xdc4   :  { %3585 = vmatpush3.bf16.msra.mxu0 %v3813_v23 }
 0xdc5   :  { %3586 = vmatprep.subr.bf16.mxu0 %v3975_v15 }
 0xdc8   :  { %3587 = vmatpush3.bf16.msra.mxu0 %v3814_v39 }
 0xdc9   :  { %3588 = vmatprep.subr.bf16.mxu0 %v3975_v15 }
 0xdcc   :  { %3589 = vmatpush3.bf16.msra.mxu0 %v3815_v24  ;;  %v3272_v24 = vld [vmem:[%s4711_s29] ss:$0 sm:$0xff] }
 0xdcd   :  { %3620 = vmatprep.subr.bf16.mxu0 %v3975_v15 }
 0xe82   :  { %v1337_v37 = vpop.f32.mrb[36].mxu0 }
 0xe83   :  { %v1344_v38 = vadd.f32 %v1337_v37, %v1070_v61  ;;  %v3564_v40 = vpop.f32.mrb[37].mxu0 }
 0xe84   :  { %v1340_v43 = vpop.f32.mrb[38].mxu0 }
 0xe85   :  { %v1346_v44 = vadd.f32 %v1344_v38, %v4148_v0  ;;  %v1345_v45 = vadd.f32 %v1340_v43, %v4349_v3  ;;  %v3565_v46 = vpop.f32.mrb[39].mxu0 }
 0xe87   :  { %v4377_v47 = vadd.f32 %v3255_v41, %v1346_v44  ;;  %v1347_v48 = vadd.f32 %v1345_v45, %v4151_v1 }
 0xe89   :  { %v4380_v49 = vadd.f32 %v3255_v41, %v1347_v48  ;;  %v1359_v50 = vsel %vm134_vm0, %v4377_v47, 0.0 }
 0xe8a   :  { %1360 = vadd.xlane.f32.xlu1 %v1359_v50 }
 0xe8b   :  { %v1362_v51 = vsel %vm134_vm0, %v4380_v49, 0.0 }
 0xe8c   :  { %1363 = vadd.xlane.f32.xlu0 %v1362_v51 }
 0xf17   :  { %v1361_v0 = vpop.xlane.xlu1 %1360 }
 0xf18   :  { %v1365_v53 = vmul.f32 0.03125, %v1361_v0 }
 0xf19   :  { %v1364_v54 = vpop.xlane.xlu0 %1363 }
 0xf1a   :  { %v1367_v55 = vsub.f32 %v4377_v47, %v1365_v53  ;;  %v1366_v56 = vmul.f32 0.03125, %v1364_v54 }
 0xf1c   :  { %v1368_v1 = vsub.f32 %v4380_v49, %v1366_v56  ;;  %v1369_v57 = vmul.f32 %v1367_v55, %v1367_v55 }
 0xf1e   :  { %v1371_v58 = vsel %vm134_vm0, %v1369_v57, 0.0  ;;  %v1370_v60 = vmul.f32 %v1368_v1, %v1368_v1 }
 0xf1f   :  { %1372 = vadd.xlane.f32.xlu0 %v1371_v58 }
 0xf20   :  { %v1374_v61 = vsel %vm134_vm0, %v1370_v60, 0.0 }
 0xf21   :  { %1375 = vadd.xlane.f32.xlu1 %v1374_v61 }
 0xfac   :  { %v1373_v3 = vpop.xlane.xlu0 %1372 }
 0xfad   :  { %v1377_v4 = vmul.f32 0.03125, %v1373_v3 }
 0xfae   :  { %v1376_v5 = vpop.xlane.xlu1 %1375 }
 0xfaf   :  { %v1379_v6 = vadd.f32 1e-05, %v1377_v4  ;;  %v1378_v7 = vmul.f32 0.03125, %v1376_v5 }
 0xfb1   :  { %3866 = vrsqrt.f32 %v1379_v6  ;;  %v1380_v8 = vadd.f32 1e-05, %v1378_v7 }
 0xfb3   :  { %3868 = vrsqrt.f32 %v1380_v8 }
 0xfbb   :  { %v3867_v9 = vpop.eup %3866 }
 0xfbc   :  { %v1383_v11 = vmul.f32 %v3867_v9, %v1367_v55  ;;  %v3262_v55 = vld [vmem:[%s4060_s30] ss:$0 sm:$0xff]  ;;  %s4717_s30 = sld [smem:[#allocation11_spill]] }
 0xfbd   :  { %v3869_v59 = vpop.eup %3868 }
 0xfbe   :  { %v1391_v12 = vmul.f32 %v3256_v10, %v1383_v11  ;;  %v1384_v13 = vmul.f32 %v3869_v59, %v1368_v1 }
 0xfc0   :  { %v1392_v14 = vmul.f32 %v3256_v10, %v1384_v13  ;;  %v1399_v16 = vadd.f32 %v3257_v62, %v1391_v12  ;;  %v3816_v12 = vld [vmem:[%s4075_s20] sm:$0xff]   ;;  %v3817_v13 = vld [vmem:[%s4075_s20 + $0x8] sm:$0xff]   ;;  %s4718_s20 = sld [smem:[#allocation14_spill]] }
 0xfc2   :  { %v1400_v17 = vadd.f32 %v3257_v62, %v1392_v14 }
 0xfc4   :  { %v1401_v18 = vpack.c.bf16 %v1400_v17, %v1399_v16 }
 0xfc6   :  { %3571 = vmatmul.mubr.msk.bf16.vlgmr.msra.gmra.mrb[44].mxu1 %vm134_vm0, %v1401_v18 }
 0xfc7   :  { %3598 = vmatprep.mubr.msk.bf16.mxu1 %vm3976_vm1, %v3975_v15  ;;  %3595 = vmatpush3.bf16.msra.mxu1 %v3816_v12 }
 0xfc8   :  { %3596 = vmatprep.subr.bf16.mxu1 %v3975_v15 }
 0xfcb   :  { %3597 = vmatpush3.bf16.msra.mxu1 %v3817_v13 }
 0xfcc   :  { %3602 = vmatprep.subr.bf16.mxu1 %v3975_v15 }
0x1099   :  { %v1462_v26 = vpop.f32.mrb[44].mxu1 }
0x109a   :  { %v1463_v27 = vadd.f32 %v3258_v25, %v1462_v26  ;;  %v3572_v28 = vpop.f32.mrb[45].mxu1 }
0x109b   :  { %v1465_v29 = vpop.f32.mrb[46].mxu1 }
0x109c   :  { %v1469_v30 = vmul.f32 %v1463_v27, %v1463_v27  ;;  %v1466_v31 = vadd.f32 %v3258_v25, %v1465_v29  ;;  %v3573_v32 = vpop.f32.mrb[47].mxu1  ;;  %v3273_v29 = vld [vmem:[%s4712_s3] ss:$0 sm:$0xff] }
0x109e   :  { %v1471_v33 = vmul.f32 %v1469_v30, %v1463_v27  ;;  %v1470_v34 = vmul.f32 %v1466_v31, %v1466_v31 }
0x10a0   :  { %v1473_v35 = vmul.f32 0.044715, %v1471_v33  ;;  %v1472_v36 = vmul.f32 %v1470_v34, %v1466_v31 }
0x10a2   :  { %v1475_v37 = vadd.f32 %v1473_v35, %v1463_v27  ;;  %v1474_v38 = vmul.f32 0.044715, %v1472_v36 }
0x10a4   :  { %v1477_v40 = vmul.f32 0.7978846, %v1475_v37  ;;  %v1476_v41 = vadd.f32 %v1474_v38, %v1466_v31 }
0x10a6   :  { %3870 = vtanh.f32 %v1477_v40  ;;  %v1478_v43 = vmul.f32 0.7978846, %v1476_v41 }
0x10a8   :  { %3872 = vtanh.f32 %v1478_v43 }
0x10b0   :  { %v3871_v44 = vpop.eup %3870 }
0x10b1   :  { %v1481_v45 = vadd.f32 1.0, %v3871_v44 }
0x10b2   :  { %v3873_v46 = vpop.eup %3872 }
0x10b3   :  { %v1483_v48 = vmul.f32 0.5, %v1481_v45  ;;  %v1482_v50 = vadd.f32 1.0, %v3873_v46 }
0x10b5   :  { %v1484_v51 = vmul.f32 0.5, %v1482_v50  ;;  %v1485_v0 = vmul.f32 %v1483_v48, %v1463_v27 }
0x10b7   :  { %v1486_v53 = vmul.f32 %v1484_v51, %v1466_v31 }
0x10b9   :  { %v1487_v54 = vpack.c.bf16 %v1486_v53, %v1485_v0 }
0x10bb   :  { %3591 = vmatmul.mubr.bf16.vlgmr.msra.gmra.mrb[40].mxu0 %v1487_v54 }
0x10bc   :  { %3622 = vmatprep.mubr.msk.bf16.mxu0 %vm3976_vm1, %v3975_v15 }
0x118e   :  { %v1593_v56 = vpop.f32.mrb[40].mxu0 }
0x118f   :  { %v1594_v1 = vadd.f32 %v3262_v55, %v1593_v56  ;;  %v3592_v57 = vpop.f32.mrb[41].mxu0 }
0x1190   :  { %v1596_v58 = vpop.f32.mrb[42].mxu0 }
0x1191   :  { %v4420_v60 = vadd.f32 %v1594_v1, %v4377_v47  ;;  %v1597_v61 = vadd.f32 %v3262_v55, %v1596_v58  ;;  %v3593_v63 = vpop.f32.mrb[43].mxu0 }
0x1193   :  { %v4423_v2 = vadd.f32 %v1597_v61, %v4380_v49  ;;  %v1604_v3 = vsel %vm134_vm0, %v4420_v60, 0.0 }
0x1194   :  { %1605 = vadd.xlane.f32.xlu0 %v1604_v3 }
0x1195   :  { %v1607_v4 = vsel %vm134_vm0, %v4423_v2, 0.0 }
0x1196   :  { %1608 = vadd.xlane.f32.xlu1 %v1607_v4 }
0x1221   :  { %v1606_v5 = vpop.xlane.xlu0 %1605 }
0x1222   :  { %v1610_v6 = vmul.f32 0.03125, %v1606_v5 }
0x1223   :  { %v1609_v7 = vpop.xlane.xlu1 %1608 }
0x1224   :  { %v1612_v47 = vsub.f32 %v4420_v60, %v1610_v6  ;;  %v1611_v8 = vmul.f32 0.03125, %v1609_v7 }
0x1226   :  { %v1613_v9 = vsub.f32 %v4423_v2, %v1611_v8  ;;  %v1614_v49 = vmul.f32 %v1612_v47, %v1612_v47 }
0x1228   :  { %v1616_v10 = vsel %vm134_vm0, %v1614_v49, 0.0  ;;  %v1615_v11 = vmul.f32 %v1613_v9, %v1613_v9 }
0x1229   :  { %1617 = vadd.xlane.f32.xlu0 %v1616_v10 }
0x122a   :  { %v1619_v59 = vsel %vm134_vm0, %v1615_v11, 0.0 }
0x122b   :  { %1620 = vadd.xlane.f32.xlu1 %v1619_v59 }
0x12b6   :  { %v1618_v62 = vpop.xlane.xlu0 %1617 }
0x12b7   :  { %v1622_v14 = vmul.f32 0.03125, %v1618_v62 }
0x12b8   :  { %v1621_v16 = vpop.xlane.xlu1 %1620 }
0x12b9   :  { %v1624_v17 = vadd.f32 1e-05, %v1622_v14  ;;  %v1623_v18 = vmul.f32 0.03125, %v1621_v16 }
0x12bb   :  { %3874 = vrsqrt.f32 %v1624_v17  ;;  %v1625_v42 = vadd.f32 1e-05, %v1623_v18 }
0x12bd   :  { %3876 = vrsqrt.f32 %v1625_v42 }
0x12c5   :  { %v3875_v19 = vpop.eup %3874 }
0x12c6   :  { %v1628_v21 = vmul.f32 %v3875_v19, %v1612_v47 }
0x12c7   :  { %v3877_v22 = vpop.eup %3876 }
0x12c8   :  { %v1636_v23 = vmul.f32 %v3271_v20, %v1628_v21  ;;  %v1629_v39 = vmul.f32 %v3877_v22, %v1613_v9 }
0x12ca   :  { %v1637_v25 = vmul.f32 %v3271_v20, %v1629_v39  ;;  %v1644_v26 = vadd.f32 %v3272_v24, %v1636_v23 }
0x12cc   :  { %v1645_v27 = vadd.f32 %v3272_v24, %v1637_v25 }
0x12ce   :  { %v1646_v28 = vpack.c.bf16 %v1645_v27, %v1644_v26 }
0x12d0   :  { %3599 = vmatmul.mubr.msk.bf16.vlgmr.msra.gmra.mrb[48].mxu1 %vm134_vm0, %v1646_v28 }
0x12d1   :  { %3604 = vmatprep.mubr.msk.bf16.mxu1 %vm3976_vm1, %v3975_v15 }
0x13a3   :  { %v1707_v30 = vpop.f32.mrb[48].mxu1 }
0x13a4   :  { %v1708_v31 = vadd.f32 %v3273_v29, %v1707_v30  ;;  %v3600_v32 = vpop.f32.mrb[49].mxu1 }
0x13a5   :  { %v1710_v33 = vpop.f32.mrb[50].mxu1 }
0x13a6   :  { %v4443_v34 = vpack.c.bf16 %v1708_v31, %v1708_v31  ;;  %v1711_v35 = vadd.f32 %v3273_v29, %v1710_v33  ;;  %v3601_v36 = vpop.f32.mrb[51].mxu1 }
0x13a8   :  { %v4445_v37 = vpack.c.bf16 %v1711_v35, %v1711_v35  ;;  %1724 = vrot.lane.b32.xlu0 %v4443_v34, %s3977_s0 }
0x13aa   :  { %1772 = vrot.lane.b32.xlu1 %v4445_v37, %s3977_s0 }
0x141a   :  { %v1725_v38 = vpop.permute.xlu0 %1724 }
0x141b   :  { %v1730_v40 = vsel %vm258_vm2, %v1725_v38, 0 }
0x141c   :  { %3603 = vmatpush3.bf16.xpose.msra.mxu1 %v1730_v40  ;;  %v1773_v41 = vpop.permute.xlu1 %1772 }
0x141d   :  { %3608 = vmatprep.subr.bf16.mxu1 %v3975_v15  ;;  %v1778_v43 = vsel %vm258_vm2, %v1773_v41, 0 }
0x1423   :  { %3605 = vmatmul.mubr.msk.bf16.vlgmr.msra.gmra.mrb[52].mxu1 %vm258_vm2, %v4443_v34 }
0x1424   :  { %3609 = vmatpush3.bf16.xpose.msra.mxu1 %v1778_v43  ;;  %3610 = vmatprep.mubr.msk.bf16.mxu1 %vm3976_vm1, %v3975_v15 }
0x1425   :  { %3614 = vmatprep.subr.bf16.mxu1 %v3975_v15 }
0x142b   :  { %3611 = vmatmul.mubr.msk.bf16.vlgmr.msra.gmra.mrb[56].mxu1 %vm258_vm2, %v4445_v37 }
0x142c   :  { %3616 = vmatprep.mubr.msk.bf16.mxu1 %vm3976_vm1, %v3975_v15 }
0x14f6   :  { %v1766_v44 = vpop.f32.mrb[52].mxu1 }
0x14f7   :  { %v1820_v45 = vmul.f32 0.35355338, %v1766_v44  ;;  %v3606_v46 = vpop.f32.mrb[53].mxu1 }
0x14f8   :  { %v1769_v48 = vpop.f32.mrb[54].mxu1 }
0x14f9   :  { %v3607_v50 = vpop.f32.mrb[55].mxu1  ;;  %v1822_v51 = vadd.f32 %v1820_v45, %v4197_v52 }
0x14fb   :  { %v1824_v0 = vsel %vm258_vm2, %v1822_v51, -inf }
0x14fc   :  { %1825 = vmax.xlane.f32.xlu1 %v1824_v0 }
0x14fe   :  { %v1814_v53 = vpop.f32.mrb[56].mxu1 }
0x14ff   :  { %v1821_v54 = vmul.f32 0.35355338, %v1814_v53  ;;  %v3612_v55 = vpop.f32.mrb[57].mxu1 }
0x1500   :  { %v1817_v56 = vpop.f32.mrb[58].mxu1 }
0x1501   :  { %v3613_v1 = vpop.f32.mrb[59].mxu1  ;;  %v1823_v57 = vadd.f32 %v1821_v54, %v4197_v52 }
0x1503   :  { %v1827_v58 = vsel %vm258_vm2, %v1823_v57, -inf }
0x1504   :  { %1828 = vmax.xlane.f32.xlu0 %v1827_v58 }
0x150d   :  { %1896 = vrot.lane.b32.xlu1 %v4445_v37, %s3979_s5 }
0x1511   :  { %1947 = vrot.lane.b32.xlu1 %v4443_v34, %s3980_s9 }
0x1589   :  { %v1826_v61 = vpop.xlane.xlu1 %1825 }
0x158a   :  { %v1830_v63 = vsub.f32 %v1822_v51, %v1826_v61 }
0x158c   :  { %v1832_v3 = vmul.f32 1.442695, %v1830_v63 }
0x158d   :  { %v1897_v4 = vpop.permute.xlu1 %1896 }
0x158e   :  { %3878 = vpow2.f32 %v1832_v3  ;;  %v1902_v5 = vsel %vm386_vm4, %v1897_v4, 0 }
0x158f   :  { %3621 = vmatpush3.bf16.msra.mxu0 %v1902_v5 }
0x1590   :  { %3632 = vmatprep.subr.bf16.mxu0 %v3975_v15 }
0x1591   :  { %v1829_v6 = vpop.xlane.xlu0 %1828  ;;  %v1948_v59 = vpop.permute.xlu1 %1947 }
0x1592   :  { %v1831_v7 = vsub.f32 %v1823_v57, %v1829_v6  ;;  %v1953_v18 = vsel %vm258_vm2, %v1948_v59, 0  ;;  %v1715_v59 = vld [vmem:[%s4713_s8] sm:$0xf] }
0x1594   :  { %v1834_v47 = vmul.f32 1.442695, %v1831_v7 }
0x1596   :  { %3880 = vpow2.f32 %v1834_v47 }
0x1598   :  { %v3879_v8 = vpop.eup %3878 }
0x1599   :  { %v1836_v9 = vsel %vm258_vm2, %v3879_v8, 0.0 }
0x159a   :  { %1837 = vadd.xlane.f32.xlu0 %v1836_v9 }
0x15a0   :  { %v3881_v49 = vpop.eup %3880 }
0x15a1   :  { %v1839_v10 = vsel %vm258_vm2, %v3881_v49, 0.0 }
0x15a2   :  { %1840 = vadd.xlane.f32.xlu1 %v1839_v10 }
0x15b0   :  { %1848 = vrot.lane.b32.xlu0 %v4443_v34, %s3979_s5 }
0x15b3   :  { %1997 = vrot.lane.b32.xlu1 %v4445_v37, %s3980_s9 }
0x15b4   :  { %1945 = vrot.lane.b32.xlu0 %v4443_v34, %s3981_s13 }
0x15b7   :  { %1995 = vrot.lane.b32.xlu1 %v4445_v37, %s3981_s13 }
0x1627   :  { %v1838_v11 = vpop.xlane.xlu0 %1837 }
0x1628   :  { %3882 = vrcp.f32 %v1838_v11 }
0x162b   :  { %v1849_v12 = vpop.permute.xlu0 %1848 }
0x162c   :  { %v1854_v13 = vsel %vm386_vm4, %v1849_v12, 0 }
0x162d   :  { %3615 = vmatpush3.bf16.msra.mxu1 %v1854_v13 }
0x162e   :  { %3626 = vmatprep.subr.bf16.mxu1 %v3975_v15 }
0x162f   :  { %v1841_v62 = vpop.xlane.xlu1 %1840  ;;  %v1946_v22 = vpop.permute.xlu0 %1945 }
0x1630   :  { %3884 = vrcp.f32 %v1841_v62  ;;  %v2221_v62 = vsel %vm386_vm4, %v1715_v59, 0 }
0x1632   :  { %v3883_v14 = vpop.eup %3882 }
0x1633   :  { %v1844_v16 = vmul.f32 %v3883_v14, %v3879_v8  ;;  %v1998_v20 = vpop.permute.xlu1 %1997 }
0x1634   :  { %v2003_v23 = vsel %vm258_vm2, %v1998_v20, 0 }
0x1635   :  { %v1846_v17 = vpack.c.bf16 %v1844_v16, %v1844_v16 }
0x1637   :  { %3617 = vmatmul.mubr.msk.bf16.vlgmr.msra.gmra.mrb[60].mxu1 %vm258_vm2, %v1846_v17  ;;  %v1996_v39 = vpop.permute.xlu1 %1995 }
0x1638   :  { %3627 = vmatpush3.bf16.xpose.msra.mxu1 %v1953_v18  ;;  %3628 = vmatprep.mubr.msk.bf16.mxu1 %vm3976_vm1, %v3975_v15 }
0x1639   :  { %3638 = vmatprep.subr.bf16.mxu1 %v3975_v15 }
0x163a   :  { %v3885_v42 = vpop.eup %3884 }
0x163b   :  { %v1845_v19 = vmul.f32 %v3885_v42, %v3881_v49  ;;  %v1716_v42 = vld [vmem:[%s4713_s8 + $0x4] sm:$0xf] }
0x163d   :  { %v1847_v21 = vpack.c.bf16 %v1845_v19, %v1845_v19  ;;  %v2174_v19 = vsel %vm386_vm4, %v1716_v42, 0 }
0x163f   :  { %3623 = vmatmul.mubr.msk.bf16.vlgmr.msra.gmra.mrb[44].mxu0 %vm258_vm2, %v1847_v21  ;;  %3629 = vmatmul.mubr.msk.bf16.vlgmr.msra.gmra.mrb[64].mxu1 %vm258_vm2, %v1946_v22 }
0x1640   :  { %3633 = vmatpush3.bf16.xpose.msra.mxu0 %v2003_v23  ;;  %3634 = vmatprep.mubr.msk.bf16.mxu0 %vm3976_vm1, %v3975_v15 }
0x1641   :  { %3644 = vmatprep.subr.bf16.mxu0 %v3975_v15  ;;  %3640 = vmatprep.mubr.msk.bf16.mxu1 %vm3976_vm1, %v3975_v15 }
0x1647   :  { %3635 = vmatmul.mubr.msk.bf16.vlgmr.msra.gmra.mrb[48].mxu0 %vm258_vm2, %v1996_v39 }
0x1648   :  { %3646 = vmatprep.mubr.msk.bf16.mxu0 %vm3976_vm1, %v3975_v15 }
0x170a   :  { %v4501_v24 = vpop.f32.mrb[60].mxu1 }
0x170b   :  { %v3618_v25 = vpop.f32.mrb[61].mxu1 }
0x170c   :  { %v1893_v26 = vpop.f32.mrb[62].mxu1 }
0x170d   :  { %v3619_v27 = vpop.f32.mrb[63].mxu1 }
0x1712   :  { %v4503_v28 = vpop.f32.mrb[44].mxu0  ;;  %v1989_v29 = vpop.f32.mrb[64].mxu1 }
0x1713   :  { %v1944_v30 = vpack.c.bf16 %v4503_v28, %v4501_v24  ;;  %v2045_v31 = vmul.f32 0.35355338, %v1989_v29  ;;  %v3624_v32 = vpop.f32.mrb[45].mxu0  ;;  %v3630_v33 = vpop.f32.mrb[65].mxu1 }
0x1714   :  { %v1941_v35 = vpop.f32.mrb[46].mxu0  ;;  %v1992_v36 = vpop.f32.mrb[66].mxu1 }
0x1715   :  { %v3625_v38 = vpop.f32.mrb[47].mxu0  ;;  %v3631_v40 = vpop.f32.mrb[67].mxu1  ;;  %v2047_v41 = vadd.f32 %v2045_v31, %v4197_v52 }
0x1717   :  { %v2049_v43 = vsel %vm258_vm2, %v2047_v41, -inf }
0x1718   :  { %2050 = vmax.xlane.f32.xlu0 %v2049_v43 }
0x171a   :  { %v2039_v44 = vpop.f32.mrb[48].mxu0 }
0x171b   :  { %v2046_v45 = vmul.f32 0.35355338, %v2039_v44  ;;  %v3636_v46 = vpop.f32.mrb[49].mxu0 }
0x171c   :  { %v2042_v48 = vpop.f32.mrb[50].mxu0 }
0x171d   :  { %v3637_v50 = vpop.f32.mrb[51].mxu0  ;;  %v2048_v51 = vadd.f32 %v2046_v45, %v4197_v52 }
0x171f   :  { %v2052_v0 = vsel %vm258_vm2, %v2048_v51, -inf }
0x1720   :  { %2053 = vmax.xlane.f32.xlu1 %v2052_v0 }
0x1731   :  { %2121 = vrot.lane.b32.xlu1 %v4445_v37, %s3982_s17 }
0x1735   :  { %2266 = vrot.lane.b32.xlu1 %v4443_v34, %s3983_s21 }
0x1739   :  { %2316 = vrot.lane.b32.xlu1 %v4445_v37, %s3983_s21 }
0x173d   :  { %2314 = vrot.lane.b32.xlu1 %v4445_v37, %s3984_s7 }
0x17a5   :  { %v2051_v53 = vpop.xlane.xlu0 %2050 }
0x17a6   :  { %v2055_v54 = vsub.f32 %v2047_v41, %v2051_v53 }
0x17a8   :  { %v2057_v55 = vmul.f32 1.442695, %v2055_v54 }
0x17aa   :  { %3886 = vpow2.f32 %v2057_v55 }
0x17ad   :  { %v2054_v56 = vpop.xlane.xlu1 %2053 }
0x17ae   :  { %v2056_v1 = vsub.f32 %v2048_v51, %v2054_v56 }
0x17b0   :  { %v2059_v57 = vmul.f32 1.442695, %v2056_v1 }
0x17b1   :  { %v2122_v58 = vpop.permute.xlu1 %2121 }
0x17b2   :  { %3888 = vpow2.f32 %v2059_v57  ;;  %v2127_v61 = vsel %vm386_vm4, %v2122_v58, 0 }
0x17b3   :  { %3645 = vmatpush3.bf16.msra.mxu0 %v2127_v61 }
0x17b4   :  { %v3887_v63 = vpop.eup %3886  ;;  %3656 = vmatprep.subr.bf16.mxu0 %v3975_v15 }
0x17b5   :  { %v2061_v3 = vsel %vm258_vm2, %v3887_v63, 0.0  ;;  %v2267_v14 = vpop.permute.xlu1 %2266 }
0x17b6   :  { %2062 = vadd.xlane.f32.xlu0 %v2061_v3  ;;  %v2272_v27 = vsel %vm258_vm2, %v2267_v14, 0 }
0x17b9   :  { %v2317_v16 = vpop.permute.xlu1 %2316 }
0x17ba   :  { %v2322_v17 = vsel %vm258_vm2, %v2317_v16, 0 }
0x17bc   :  { %v3889_v4 = vpop.eup %3888 }
0x17bd   :  { %v2064_v5 = vsel %vm258_vm2, %v3889_v4, 0.0  ;;  %v2315_v18 = vpop.permute.xlu1 %2314 }
0x17be   :  { %2065 = vadd.xlane.f32.xlu0 %v2064_v5 }
0x17d4   :  { %2073 = vrot.lane.b32.xlu0 %v4443_v34, %s3982_s17 }
0x17d8   :  { %2264 = vrot.lane.b32.xlu0 %v4443_v34, %s3984_s7 }
0x1843   :  { %v2063_v6 = vpop.xlane.xlu0 %2062 }
0x1844   :  { %3890 = vrcp.f32 %v2063_v6 }
0x184b   :  { %v2066_v7 = vpop.xlane.xlu0 %2065 }
0x184c   :  { %3892 = vrcp.f32 %v2066_v7 }
0x184e   :  { %v3891_v47 = vpop.eup %3890 }
0x184f   :  { %v2069_v8 = vmul.f32 %v3891_v47, %v3887_v63  ;;  %v2074_v9 = vpop.permute.xlu0 %2073 }
0x1850   :  { %v2079_v49 = vsel %vm386_vm4, %v2074_v9, 0 }
0x1851   :  { %3639 = vmatpush3.bf16.msra.mxu1 %v2079_v49  ;;  %v2071_v10 = vpack.c.bf16 %v2069_v8, %v2069_v8 }
0x1852   :  { %3650 = vmatprep.subr.bf16.mxu1 %v3975_v15 }
0x1853   :  { %v2265_v31 = vpop.permute.xlu0 %2264 }
0x1854   :  { %3641 = vmatmul.mubr.msk.bf16.vlgmr.msra.gmra.mrb[68].mxu1 %vm258_vm2, %v2071_v10 }
0x1855   :  { %3652 = vmatprep.mubr.msk.bf16.mxu1 %vm3976_vm1, %v3975_v15  ;;  %3651 = vmatpush3.bf16.msra.mxu1 %v2174_v19 }
0x1856   :  { %v3893_v11 = vpop.eup %3892  ;;  %3662 = vmatprep.subr.bf16.mxu1 %v3975_v15 }
0x1857   :  { %v2070_v12 = vmul.f32 %v3893_v11, %v3889_v4 }
0x1859   :  { %v2072_v13 = vpack.c.bf16 %v2070_v12, %v2070_v12 }
0x185b   :  { %3647 = vmatmul.mubr.msk.bf16.vlgmr.msra.gmra.mrb[52].mxu0 %vm258_vm2, %v2072_v13 }
0x185c   :  { %3657 = vmatpush3.bf16.msra.mxu0 %v2221_v62  ;;  %3658 = vmatprep.mubr.msk.bf16.mxu0 %vm3976_vm1, %v3975_v15 }
0x185d   :  { %3668 = vmatprep.subr.bf16.mxu0 %v3975_v15 }
0x1863   :  { %3659 = vmatmul.mubr.msk.bf16.vlgmr.msra.gmra.mrb[56].mxu0 %vm258_vm2, %v1944_v30 }
0x1864   :  { %3670 = vmatprep.mubr.msk.bf16.mxu0 %vm3976_vm1, %v3975_v15 }
0x1865   :  { %3669 = vmatpush3.bf16.xpose.msra.mxu0 %v2322_v17 }
0x1866   :  { %3680 = vmatprep.subr.bf16.mxu0 %v3975_v15 }
0x186c   :  { %3671 = vmatmul.mubr.msk.bf16.vlgmr.msra.gmra.mrb[60].mxu0 %vm258_vm2, %v2315_v18 }
0x186d   :  { %3682 = vmatprep.mubr.msk.bf16.mxu0 %vm3976_vm1, %v3975_v15 }
0x1927   :  { %v2115_v20 = vpop.f32.mrb[68].mxu1 }
0x1928   :  { %v3642_v21 = vpop.f32.mrb[69].mxu1 }
0x1929   :  { %v2118_v22 = vpop.f32.mrb[70].mxu1 }
0x192a   :  { %v3643_v23 = vpop.f32.mrb[71].mxu1 }
0x192e   :  { %v2163_v39 = vpop.f32.mrb[52].mxu0 }
0x192f   :  { %v2169_v24 = vpack.c.bf16 %v2163_v39, %v2115_v20  ;;  %v3648_v25 = vpop.f32.mrb[53].mxu0 }
0x1930   :  { %v2166_v26 = vpop.f32.mrb[54].mxu0  ;;  %v1717_v25 = vld [vmem:[%s4713_s8 + $0x8] sm:$0xf] }
0x1931   :  { %v3649_v28 = vpop.f32.mrb[55].mxu0  ;;  %3653 = vmatmul.mubr.msk.bf16.vlgmr.msra.gmra.mrb[72].mxu1 %vm258_vm2, %v2169_v24  ;;  %v2493_v26 = vsel %vm386_vm4, %v1717_v25, 0 }
0x1932   :  { %3663 = vmatpush3.bf16.xpose.msra.mxu1 %v2272_v27  ;;  %3664 = vmatprep.mubr.msk.bf16.mxu1 %vm3976_vm1, %v3975_v15 }
0x1933   :  { %3674 = vmatprep.subr.bf16.mxu1 %v3975_v15 }
0x1936   :  { %v2257_v29 = vpop.f32.mrb[56].mxu0 }
0x1937   :  { %v3660_v30 = vpop.f32.mrb[57].mxu0 }
0x1938   :  { %v2260_v32 = vpop.f32.mrb[58].mxu0 }
0x1939   :  { %v3661_v33 = vpop.f32.mrb[59].mxu0  ;;  %3665 = vmatmul.mubr.msk.bf16.vlgmr.msra.gmra.mrb[76].mxu1 %vm258_vm2, %v2265_v31 }
0x193a   :  { %3676 = vmatprep.mubr.msk.bf16.mxu1 %vm3976_vm1, %v3975_v15 }
0x193f   :  { %v2358_v35 = vpop.f32.mrb[60].mxu0 }
0x1940   :  { %v2365_v36 = vmul.f32 0.35355338, %v2358_v35  ;;  %v3672_v38 = vpop.f32.mrb[61].mxu0 }
0x1941   :  { %v2361_v40 = vpop.f32.mrb[62].mxu0 }
0x1942   :  { %v3673_v41 = vpop.f32.mrb[63].mxu0  ;;  %v2367_v43 = vadd.f32 %v2365_v36, %v4197_v52 }
0x1944   :  { %v2371_v44 = vsel %vm258_vm2, %v2367_v43, -inf }
0x1945   :  { %2372 = vmax.xlane.f32.xlu1 %v2371_v44 }
0x1956   :  { %2440 = vrot.lane.b32.xlu1 %v4445_v37, %s3985_s10 }
0x195a   :  { %2540 = vrot.lane.b32.xlu1 %v4443_v34, %s3986_s11 }
0x195e   :  { %2590 = vrot.lane.b32.xlu1 %v4445_v37, %s3986_s11 }
0x1962   :  { %2588 = vrot.lane.b32.xlu1 %v4445_v37, %s3987_s15 }
0x19d2   :  { %v2373_v45 = vpop.xlane.xlu1 %2372 }
0x19d3   :  { %v2375_v50 = vsub.f32 %v2367_v43, %v2373_v45 }
0x19d5   :  { %v2378_v51 = vmul.f32 1.442695, %v2375_v50 }
0x19d6   :  { %v2441_v46 = vpop.permute.xlu1 %2440 }
0x19d7   :  { %v2446_v48 = vsel %vm386_vm4, %v2441_v46, 0  ;;  %3894 = vpow2.f32 %v2378_v51 }
0x19d8   :  { %3681 = vmatpush3.bf16.msra.mxu0 %v2446_v48 }
0x19d9   :  { %3692 = vmatprep.subr.bf16.mxu0 %v3975_v15 }
0x19da   :  { %v2541_v13 = vpop.permute.xlu1 %2540 }
0x19db   :  { %v2546_v14 = vsel %vm258_vm2, %v2541_v13, 0 }
0x19de   :  { %v2591_v35 = vpop.permute.xlu1 %2590 }
0x19df   :  { %v2596_v43 = vsel %vm258_vm2, %v2591_v35, 0 }
0x19e1   :  { %v3895_v6 = vpop.eup %3894 }
0x19e2   :  { %v2383_v7 = vsel %vm258_vm2, %v3895_v6, 0.0  ;;  %v2589_v45 = vpop.permute.xlu1 %2588 }
0x1a04   :  { %v2210_v0 = vpop.f32.mrb[72].mxu1 }
0x1a05   :  { %v4572_v53 = vadd.f32 %v2257_v29, %v2210_v0  ;;  %v3654_v54 = vpop.f32.mrb[73].mxu1 }
0x1a06   :  { %v2213_v55 = vpop.f32.mrb[74].mxu1 }
0x1a07   :  { %v4574_v56 = vadd.f32 %v2260_v32, %v2213_v55  ;;  %v3655_v1 = vpop.f32.mrb[75].mxu1 }
0x1a0c   :  { %v2308_v57 = vpop.f32.mrb[76].mxu1 }
0x1a0d   :  { %v2364_v58 = vmul.f32 0.35355338, %v2308_v57  ;;  %v3666_v61 = vpop.f32.mrb[77].mxu1 }
0x1a0e   :  { %v2311_v63 = vpop.f32.mrb[78].mxu1 }
0x1a0f   :  { %v3667_v3 = vpop.f32.mrb[79].mxu1  ;;  %v2366_v4 = vadd.f32 %v2364_v58, %v4197_v52 }
0x1a11   :  { %v2368_v5 = vsel %vm258_vm2, %v2366_v4, -inf }
0x1a12   :  { %2369 = vmax.xlane.f32.xlu0 %v2368_v5 }
0x1a16   :  { %2384 = vadd.xlane.f32.xlu0 %v2383_v7 }
0x1a9f   :  { %v2370_v47 = vpop.xlane.xlu0 %2369 }
0x1aa0   :  { %v2374_v8 = vsub.f32 %v2366_v4, %v2370_v47 }
0x1aa2   :  { %v2376_v9 = vmul.f32 1.442695, %v2374_v8 }
0x1aa3   :  { %v2385_v49 = vpop.xlane.xlu0 %2384 }
0x1aa4   :  { %3896 = vpow2.f32 %v2376_v9 }
0x1aa5   :  { %3898 = vrcp.f32 %v2385_v49 }
0x1aae   :  { %v3897_v10 = vpop.eup %3896 }
0x1aaf   :  { %v3899_v11 = vpop.eup %3898  ;;  %v2380_v59 = vsel %vm258_vm2, %v3897_v10, 0.0 }
0x1ab0   :  { %v2389_v12 = vmul.f32 %v3899_v11, %v3895_v6  ;;  %2381 = vadd.xlane.f32.xlu0 %v2380_v59 }
0x1ab2   :  { %v2391_v62 = vpack.c.bf16 %v2389_v12, %v2389_v12 }
0x1ab4   :  { %3683 = vmatmul.mubr.msk.bf16.vlgmr.msra.gmra.mrb[64].mxu0 %vm258_vm2, %v2391_v62 }
0x1ab5   :  { %3693 = vmatpush3.bf16.xpose.msra.mxu0 %v2546_v14  ;;  %3694 = vmatprep.mubr.msk.bf16.mxu0 %vm3976_vm1, %v3975_v15 }
0x1ab6   :  { %3704 = vmatprep.subr.bf16.mxu0 %v3975_v15 }
0x1ac6   :  { %2392 = vrot.lane.b32.xlu0 %v4443_v34, %s3985_s10 }
0x1aca   :  { %2538 = vrot.lane.b32.xlu0 %v4443_v34, %s3987_s15 }
0x1b3d   :  { %v2382_v16 = vpop.xlane.xlu0 %2381 }
0x1b3e   :  { %3900 = vrcp.f32 %v2382_v16 }
0x1b41   :  { %v2393_v17 = vpop.permute.xlu0 %2392 }
0x1b42   :  { %v2398_v18 = vsel %vm386_vm4, %v2393_v17, 0 }
0x1b43   :  { %3675 = vmatpush3.bf16.msra.mxu1 %v2398_v18  ;;  %v1718_v18 = vld [vmem:[%s4713_s8 + $0xc] sm:$0xf] }
0x1b44   :  { %3686 = vmatprep.subr.bf16.mxu1 %v3975_v15 }
0x1b45   :  { %v2539_v42 = vpop.permute.xlu0 %2538 }
0x1b46   :  { %3695 = vmatmul.mubr.msk.bf16.vlgmr.msra.gmra.mrb[68].mxu0 %vm258_vm2, %v2539_v42  ;;  %v2767_v42 = vsel %vm386_vm4, %v1718_v18, 0 }
0x1b47   :  { %3706 = vmatprep.mubr.msk.bf16.mxu0 %vm3976_vm1, %v3975_v15 }
0x1b48   :  { %v3901_v19 = vpop.eup %3900 }
0x1b49   :  { %v2388_v20 = vmul.f32 %v3901_v19, %v3897_v10 }
0x1b4b   :  { %v2390_v21 = vpack.c.bf16 %v2388_v20, %v2388_v20 }
0x1b4d   :  { %3677 = vmatmul.mubr.msk.bf16.vlgmr.msra.gmra.mrb[80].mxu1 %vm258_vm2, %v2390_v21 }
0x1b4e   :  { %3688 = vmatprep.mubr.msk.bf16.mxu1 %vm3976_vm1, %v3975_v15  ;;  %3687 = vmatpush3.bf16.msra.mxu1 %v2493_v26 }
0x1b4f   :  { %3698 = vmatprep.subr.bf16.mxu1 %v3975_v15 }
0x1b87   :  { %v2482_v22 = vpop.f32.mrb[64].mxu0 }
0x1b88   :  { %v3684_v23 = vpop.f32.mrb[65].mxu0 }
0x1b89   :  { %v2485_v39 = vpop.f32.mrb[66].mxu0 }
0x1b8a   :  { %v3685_v24 = vpop.f32.mrb[67].mxu0 }
0x1c19   :  { %v2582_v27 = vpop.f32.mrb[68].mxu0 }
0x1c1a   :  { %v2638_v28 = vmul.f32 0.35355338, %v2582_v27  ;;  %v3696_v29 = vpop.f32.mrb[69].mxu0 }
0x1c1b   :  { %v2585_v30 = vpop.f32.mrb[70].mxu0 }
0x1c1c   :  { %v3697_v31 = vpop.f32.mrb[71].mxu0  ;;  %v2640_v32 = vadd.f32 %v2638_v28, %v4197_v52  ;;  %v3299_v30 = vld [vmem:[%s4714_s14] ss:$0 sm:$0xff] }
0x1c1e   :  { %v2642_v33 = vsel %vm258_vm2, %v2640_v32, -inf }
0x1c1f   :  { %2643 = vmax.xlane.f32.xlu0 %v2642_v33 }
0x1c20   :  { %v2434_v36 = vpop.f32.mrb[80].mxu1 }
0x1c21   :  { %v2488_v38 = vpack.c.bf16 %v2482_v22, %v2434_v36  ;;  %v3678_v40 = vpop.f32.mrb[81].mxu1 }
0x1c22   :  { %v2437_v41 = vpop.f32.mrb[82].mxu1 }
0x1c23   :  { %v3679_v44 = vpop.f32.mrb[83].mxu1  ;;  %3689 = vmatmul.mubr.msk.bf16.vlgmr.msra.gmra.mrb[84].mxu1 %vm258_vm2, %v2488_v38 }
0x1c24   :  { %3699 = vmatpush3.bf16.xpose.msra.mxu1 %v2596_v43  ;;  %3700 = vmatprep.mubr.msk.bf16.mxu1 %vm3976_vm1, %v3975_v15 }
0x1c25   :  { %3710 = vmatprep.subr.bf16.mxu1 %v3975_v15 }
0x1c2b   :  { %3701 = vmatmul.mubr.msk.bf16.vlgmr.msra.gmra.mrb[88].mxu1 %vm258_vm2, %v2589_v45 }
0x1c2c   :  { %3712 = vmatprep.mubr.msk.bf16.mxu1 %vm3976_vm1, %v3975_v15 }
0x1cac   :  { %v2644_v46 = vpop.xlane.xlu0 %2643 }
0x1cad   :  { %v2648_v48 = vsub.f32 %v2640_v32, %v2644_v46 }
0x1caf   :  { %v2650_v50 = vmul.f32 1.442695, %v2648_v48 }
0x1cb1   :  { %3902 = vpow2.f32 %v2650_v50 }
0x1cbb   :  { %v3903_v51 = vpop.eup %3902 }
0x1cbc   :  { %v2654_v0 = vsel %vm258_vm2, %v3903_v51, 0.0 }
0x1cbd   :  { %2655 = vadd.xlane.f32.xlu0 %v2654_v0 }
0x1cf6   :  { %v2529_v54 = vpop.f32.mrb[84].mxu1 }
0x1cf7   :  { %v2536_v55 = vadd.f32 %v2529_v54, %v4572_v53  ;;  %v3690_v1 = vpop.f32.mrb[85].mxu1 }
0x1cf8   :  { %v2532_v57 = vpop.f32.mrb[86].mxu1  ;;  %v3819_v1 = vld [vmem:[%s4715_s19 + $0x8] sm:$0xff]  }
0x1cf9   :  { %v2537_v58 = vadd.f32 %v2532_v57, %v4574_v56  ;;  %v3691_v61 = vpop.f32.mrb[87].mxu1 }
0x1cfe   :  { %v2632_v63 = vpop.f32.mrb[88].mxu1 }
0x1cff   :  { %v2639_v3 = vmul.f32 0.35355338, %v2632_v63  ;;  %v3702_v4 = vpop.f32.mrb[89].mxu1 }
0x1d00   :  { %v2635_v5 = vpop.f32.mrb[90].mxu1 }
0x1d01   :  { %v3703_v6 = vpop.f32.mrb[91].mxu1  ;;  %v2641_v7 = vadd.f32 %v2639_v3, %v4197_v52 }
0x1d02   :  { %v3300_v6 = vld [vmem:[%s4716_s24] ss:$0 sm:$0xff] }
0x1d03   :  { %v2645_v47 = vsel %vm258_vm2, %v2641_v7, -inf }
0x1d04   :  { %2646 = vmax.xlane.f32.xlu1 %v2645_v47 }
0x1d15   :  { %2714 = vrot.lane.b32.xlu1 %v4445_v37, %s3988_s16 }
0x1d4a   :  { %v2656_v52 = vpop.xlane.xlu0 %2655 }
0x1d91   :  { %v2647_v8 = vpop.xlane.xlu1 %2646 }
0x1d92   :  { %v2649_v53 = vsub.f32 %v2641_v7, %v2647_v8 }
0x1d94   :  { %v2652_v9 = vmul.f32 1.442695, %v2649_v53 }
0x1d95   :  { %v2715_v49 = vpop.permute.xlu1 %2714 }
0x1d96   :  { %3904 = vpow2.f32 %v2652_v9  ;;  %v2720_v56 = vsel %vm386_vm4, %v2715_v49, 0  ;;  %v3301_v9 = vld [vmem:[%s4717_s30] ss:$0 sm:$0xff] }
0x1d97   :  { %3711 = vmatpush3.bf16.msra.mxu1 %v2720_v56  ;;  %3906 = vrcp.f32 %v2656_v52  ;;  %v3820_v52 = vld [vmem:[%s4718_s20] sm:$0xff]  }
0x1d98   :  { %3722 = vmatprep.subr.bf16.mxu1 %v3975_v15 }
0x1da0   :  { %v3905_v10 = vpop.eup %3904 }
0x1da1   :  { %v2657_v11 = vsel %vm258_vm2, %v3905_v10, 0.0  ;;  %v3907_v37 = vpop.eup %3906 }
0x1da2   :  { %2658 = vadd.xlane.f32.xlu0 %v2657_v11  ;;  %v2662_v12 = vmul.f32 %v3907_v37, %v3903_v51  ;;  %v3821_v37 = vld [vmem:[%s4718_s20 + $0x8] sm:$0xff]  }
0x1da4   :  { %v2664_v14 = vpack.c.bf16 %v2662_v12, %v2662_v12  ;;  %v3823_v12 = vld [vmem:[%s4718_s20 + $0x18] sm:$0xff]  }
0x1db8   :  { %2666 = vrot.lane.b32.xlu0 %v4443_v34, %s3988_s16 }
0x1e2f   :  { %v2659_v59 = vpop.xlane.xlu0 %2658 }
0x1e30   :  { %3908 = vrcp.f32 %v2659_v59  ;;  %v3822_v59 = vld [vmem:[%s4718_s20 + $0x10] sm:$0xff]  }
0x1e33   :  { %v2667_v13 = vpop.permute.xlu0 %2666 }
0x1e34   :  { %v2672_v62 = vsel %vm386_vm4, %v2667_v13, 0  ;;  %v3824_v13 = vld [vmem:[%s4718_s20 + $0x20] sm:$0xff]  }
0x1e35   :  { %3705 = vmatpush3.bf16.msra.mxu0 %v2672_v62  ;;  %v3825_v62 = vld [vmem:[%s4718_s20 + $0x28] sm:$0xff]  }
0x1e36   :  { %3716 = vmatprep.subr.bf16.mxu0 %v3975_v15 }
0x1e38   :  { %3707 = vmatmul.mubr.msk.bf16.vlgmr.msra.gmra.mrb[72].mxu0 %vm258_vm2, %v2664_v14  ;;  %v3826_v14 = vld [vmem:[%s4718_s20 + $0x30] sm:$0xff]  }
0x1e39   :  { %3718 = vmatprep.mubr.msk.bf16.mxu0 %vm3976_vm1, %v3975_v15  ;;  %3717 = vmatpush3.bf16.msra.mxu0 %v2767_v42 }
0x1e3a   :  { %v3909_v34 = vpop.eup %3908  ;;  %3730 = vmatprep.subr.bf16.mxu0 %v3975_v15 }
0x1e3b   :  { %v2663_v16 = vmul.f32 %v3909_v34, %v3905_v10  ;;  %v3827_v34 = vld [vmem:[%s4718_s20 + $0x38] sm:$0xff]  }
0x1e3d   :  { %v2665_v17 = vpack.c.bf16 %v2663_v16, %v2663_v16  ;;  %v3302_v16 = vld [vmem:[%s4719_s18] ss:$0 sm:$0xff] }
0x1e3f   :  { %3713 = vmatmul.mubr.msk.bf16.vlgmr.msra.gmra.mrb[92].mxu1 %vm258_vm2, %v2665_v17 }
0x1e40   :  { %3726 = vmatprep.mubr.msk.bf16.mxu1 %vm3976_vm1, %v3975_v15 }
0x1f0b   :  { %v2708_v19 = vpop.f32.mrb[72].mxu0 }
0x1f0c   :  { %v3708_v20 = vpop.f32.mrb[73].mxu0 }
0x1f0d   :  { %v2711_v21 = vpop.f32.mrb[74].mxu0 }
0x1f0e   :  { %v3709_v22 = vpop.f32.mrb[75].mxu0 }
0x1f12   :  { %v2756_v23 = vpop.f32.mrb[92].mxu1 }
0x1f13   :  { %v2762_v39 = vpack.c.bf16 %v2756_v23, %v2708_v19  ;;  %v3714_v24 = vpop.f32.mrb[93].mxu1 }
0x1f14   :  { %v2759_v25 = vpop.f32.mrb[94].mxu1 }
0x1f15   :  { %v3715_v26 = vpop.f32.mrb[95].mxu1  ;;  %3719 = vmatmul.mubr.msk.bf16.vlgmr.msra.gmra.mrb[76].mxu0 %vm258_vm2, %v2762_v39 }
0x1f16   :  { %3746 = vmatprep.mubr.msk.bf16.mxu0 %vm3976_vm1, %v3975_v15  ;;  %3731 = vmatpush3.bf16.msra.mxu0 %v3820_v52 }
0x1f17   :  { %3732 = vmatprep.subr.bf16.mxu0 %v3975_v15 }
0x1f1a   :  { %3733 = vmatpush3.bf16.msra.mxu0 %v3821_v37  ;;  %v3315_v37 = vld [vmem:[%s4721_s23] ss:$0 sm:$0xff] }
0x1f1b   :  { %3734 = vmatprep.subr.bf16.mxu0 %v3975_v15 }
0x1f1e   :  { %3735 = vmatpush3.bf16.msra.mxu0 %v3822_v59 }
0x1f1f   :  { %3736 = vmatprep.subr.bf16.mxu0 %v3975_v15 }
0x1f22   :  { %3737 = vmatpush3.bf16.msra.mxu0 %v3823_v12 }
0x1f23   :  { %3738 = vmatprep.subr.bf16.mxu0 %v3975_v15 }
0x1f26   :  { %3739 = vmatpush3.bf16.msra.mxu0 %v3824_v13 }
0x1f27   :  { %3740 = vmatprep.subr.bf16.mxu0 %v3975_v15 }
0x1f2a   :  { %3741 = vmatpush3.bf16.msra.mxu0 %v3825_v62 }
0x1f2b   :  { %3742 = vmatprep.subr.bf16.mxu0 %v3975_v15 }
0x1f2e   :  { %3743 = vmatpush3.bf16.msra.mxu0 %v3826_v14  ;;  %v3316_v14 = vld [vmem:[%s4130_s12] ss:$0 sm:$0xff] }
0x1f2f   :  { %3744 = vmatprep.subr.bf16.mxu0 %v3975_v15 }
0x1f32   :  { %3745 = vmatpush3.bf16.msra.mxu0 %v3827_v34 }
0x1fe8   :  { %v2803_v27 = vpop.f32.mrb[76].mxu0 }
0x1fe9   :  { %v2810_v28 = vadd.f32 %v2803_v27, %v2536_v55  ;;  %v3720_v29 = vpop.f32.mrb[77].mxu0  ;;  %v3818_v55 = vld [vmem:[%s4715_s19] sm:$0xff]  }
0x1fea   :  { %v2806_v31 = vpop.f32.mrb[78].mxu0  ;;  %3723 = vmatpush3.bf16.msra.mxu1 %v3818_v55 }
0x1feb   :  { %v2812_v32 = vadd.f32 %v2810_v28, %v4420_v60  ;;  %v2811_v33 = vadd.f32 %v2806_v31, %v2537_v58  ;;  %v3721_v35 = vpop.f32.mrb[79].mxu0  ;;  %3724 = vmatprep.subr.bf16.mxu1 %v3975_v15 }
0x1fed   :  { %v4638_v36 = vadd.f32 %v3299_v30, %v2812_v32  ;;  %v2813_v38 = vadd.f32 %v2811_v33, %v4423_v2 }
0x1fee   :  { %3725 = vmatpush3.bf16.msra.mxu1 %v3819_v1 }
0x1fef   :  { %v4641_v40 = vadd.f32 %v3299_v30, %v2813_v38  ;;  %v2825_v41 = vsel %vm134_vm0, %v4638_v36, 0.0  ;;  %3750 = vmatprep.subr.bf16.mxu1 %v3975_v15 }
0x1ff0   :  { %2826 = vadd.xlane.f32.xlu1 %v2825_v41 }
0x1ff1   :  { %v2828_v43 = vsel %vm134_vm0, %v4641_v40, 0.0 }
0x1ff2   :  { %2829 = vadd.xlane.f32.xlu0 %v2828_v43 }
0x207d   :  { %v2827_v44 = vpop.xlane.xlu1 %2826 }
0x207e   :  { %v2831_v60 = vmul.f32 0.03125, %v2827_v44 }
0x207f   :  { %v2830_v45 = vpop.xlane.xlu0 %2829 }
0x2080   :  { %v2833_v46 = vsub.f32 %v4638_v36, %v2831_v60  ;;  %v2832_v48 = vmul.f32 0.03125, %v2830_v45  ;;  %v3306_v45 = vld [vmem:[%s4720_s22] ss:$0 sm:$0xff] }
0x2082   :  { %v2834_v2 = vsub.f32 %v4641_v40, %v2832_v48  ;;  %v2835_v50 = vmul.f32 %v2833_v46, %v2833_v46 }
0x2084   :  { %v2837_v51 = vsel %vm134_vm0, %v2835_v50, 0.0  ;;  %v2836_v0 = vmul.f32 %v2834_v2, %v2834_v2 }
0x2085   :  { %2838 = vadd.xlane.f32.xlu0 %v2837_v51 }
0x2086   :  { %v2840_v54 = vsel %vm134_vm0, %v2836_v0, 0.0 }
0x2087   :  { %2841 = vadd.xlane.f32.xlu1 %v2840_v54 }
0x2112   :  { %v2839_v57 = vpop.xlane.xlu0 %2838 }
0x2113   :  { %v2843_v58 = vmul.f32 0.03125, %v2839_v57 }
0x2114   :  { %v2842_v61 = vpop.xlane.xlu1 %2841 }
0x2115   :  { %v2845_v63 = vadd.f32 1e-05, %v2843_v58  ;;  %v2844_v3 = vmul.f32 0.03125, %v2842_v61 }
0x2117   :  { %3910 = vrsqrt.f32 %v2845_v63  ;;  %v2846_v4 = vadd.f32 1e-05, %v2844_v3 }
0x2119   :  { %3912 = vrsqrt.f32 %v2846_v4 }
0x2121   :  { %v3911_v5 = vpop.eup %3910 }
0x2122   :  { %v2849_v7 = vmul.f32 %v3911_v5, %v2833_v46 }
0x2123   :  { %v3913_v47 = vpop.eup %3912 }
0x2124   :  { %v2857_v8 = vmul.f32 %v3300_v6, %v2849_v7  ;;  %v2850_v53 = vmul.f32 %v3913_v47, %v2834_v2 }
0x2126   :  { %v2858_v49 = vmul.f32 %v3300_v6, %v2850_v53  ;;  %v2865_v56 = vadd.f32 %v3301_v9, %v2857_v8  ;;  %v3829_v8 = vld [vmem:[%s4135_s6 + $0x8] sm:$0xff]  }
0x2128   :  { %v2866_v10 = vadd.f32 %v3301_v9, %v2858_v49 }
0x212a   :  { %v2867_v11 = vpack.c.bf16 %v2866_v10, %v2865_v56 }
0x212c   :  { %3727 = vmatmul.mubr.msk.bf16.vlgmr.msra.gmra.mrb[96].mxu1 %vm134_vm0, %v2867_v11 }
0x212d   :  { %3754 = vmatprep.mubr.msk.bf16.mxu1 %vm3976_vm1, %v3975_v15 }
0x21ff   :  { %v2928_v17 = vpop.f32.mrb[96].mxu1 }
0x2200   :  { %v2929_v18 = vadd.f32 %v3302_v16, %v2928_v17  ;;  %v3728_v42 = vpop.f32.mrb[97].mxu1 }
0x2201   :  { %v2931_v19 = vpop.f32.mrb[98].mxu1 }
0x2202   :  { %v2935_v20 = vmul.f32 %v2929_v18, %v2929_v18  ;;  %v2932_v21 = vadd.f32 %v3302_v16, %v2931_v19  ;;  %v3729_v22 = vpop.f32.mrb[99].mxu1 }
0x2204   :  { %v2937_v23 = vmul.f32 %v2935_v20, %v2929_v18  ;;  %v2936_v39 = vmul.f32 %v2932_v21, %v2932_v21 }
0x2206   :  { %v2939_v24 = vmul.f32 0.044715, %v2937_v23  ;;  %v2938_v25 = vmul.f32 %v2936_v39, %v2932_v21 }
0x2208   :  { %v2941_v26 = vadd.f32 %v2939_v24, %v2929_v18  ;;  %v2940_v27 = vmul.f32 0.044715, %v2938_v25 }
0x220a   :  { %v2943_v28 = vmul.f32 0.7978846, %v2941_v26  ;;  %v2942_v29 = vadd.f32 %v2940_v27, %v2932_v21 }
0x220c   :  { %3914 = vtanh.f32 %v2943_v28  ;;  %v2944_v30 = vmul.f32 0.7978846, %v2942_v29 }
0x220e   :  { %3916 = vtanh.f32 %v2944_v30 }
0x2216   :  { %v3915_v31 = vpop.eup %3914 }
0x2217   :  { %v2947_v32 = vadd.f32 1.0, %v3915_v31 }
0x2218   :  { %v3917_v33 = vpop.eup %3916 }
0x2219   :  { %v2949_v35 = vmul.f32 0.5, %v2947_v32  ;;  %v2948_v38 = vadd.f32 1.0, %v3917_v33 }
0x221b   :  { %v2950_v41 = vmul.f32 0.5, %v2948_v38  ;;  %v2951_v43 = vmul.f32 %v2949_v35, %v2929_v18  ;;  %v3317_v18 = vld [vmem:[%s4140_s27] ss:$0 sm:$0xff] }
0x221d   :  { %v2952_v44 = vmul.f32 %v2950_v41, %v2932_v21 }
0x221f   :  { %v2953_v60 = vpack.c.bf16 %v2952_v44, %v2951_v43 }
0x2221   :  { %3747 = vmatmul.mubr.bf16.vlgmr.msra.gmra.mrb[80].mxu0 %v2953_v60 }
0x22f4   :  { %v3059_v46 = vpop.f32.mrb[80].mxu0 }
0x22f5   :  { %v3060_v48 = vadd.f32 %v3306_v45, %v3059_v46  ;;  %v3748_v2 = vpop.f32.mrb[81].mxu0 }
0x22f6   :  { %v3062_v50 = vpop.f32.mrb[82].mxu0 }
0x22f7   :  { %v3063_v51 = vadd.f32 %v3306_v45, %v3062_v50  ;;  %v3749_v0 = vpop.f32.mrb[83].mxu0  ;;  %v3066_v54 = vadd.f32 %v3060_v48, %v4638_v36 }
0x22f9   :  { %v3070_v55 = vsel %vm134_vm0, %v3066_v54, 0.0  ;;  %v3067_v1 = vadd.f32 %v3063_v51, %v4641_v40  ;;  %v3828_v40 = vld [vmem:[%s4135_s6] sm:$0xff]   ;;  %s3989_s6 = smov [#allocation2]  }
0x22fa   :  { %3071 = vadd.xlane.f32.xlu0 %v3070_v55  ;;  %3751 = vmatpush3.bf16.msra.mxu1 %v3828_v40  ;;  %s3187_s26 = sshll.u32 %s3989_s6, 4  ;;  %s3188_s26 = int_to_ptr.vmem [resolvable:$true] %s3187_s26 }
0x22fb   :  { %v3073_v57 = vsel %vm134_vm0, %v3067_v1, 0.0  ;;  %3752 = vmatprep.subr.bf16.mxu1 %v3975_v15  ;;  %s3922_s28 = scalar_lea.vmem %s3188_s26, 256  ;;  %p3927_p1 = scmp.lt.s32.totalorder %s3188_s26, %s3188_s26 }
0x22fc   :  { %3074 = vadd.xlane.f32.xlu1 %v3073_v57  ;;  %p3923_p0 = scmp.ne.s32.totalorder %s3188_s26, %s3922_s28  ;;  %p3928_p2 = scmp.lt.s32.totalorder %s3922_s28, %s3922_s28 }
0x22fe   :  { %3753 = vmatpush3.bf16.msra.mxu1 %v3829_v8  ;;  %p3929_p3 = por %p3928_p2, %p3927_p1 }
0x2300   :  { %p3930_p4 = pnand %p3929_p3, %p3923_p0 }
0x2387   :  { %v3072_v58 = vpop.xlane.xlu0 %3071 }
0x2388   :  { %v3076_v61 = vmul.f32 0.03125, %v3072_v58 }
0x2389   :  { %v3075_v63 = vpop.xlane.xlu1 %3074 }
0x238a   :  { %v3078_v3 = vsub.f32 %v3066_v54, %v3076_v61  ;;  %v3077_v4 = vmul.f32 0.03125, %v3075_v63 }
0x238c   :  { %v3079_v5 = vsub.f32 %v3067_v1, %v3077_v4  ;;  %v3080_v6 = vmul.f32 %v3078_v3, %v3078_v3 }
0x238e   :  { %v3082_v7 = vsel %vm134_vm0, %v3080_v6, 0.0  ;;  %v3081_v36 = vmul.f32 %v3079_v5, %v3079_v5 }
0x238f   :  { %3083 = vadd.xlane.f32.xlu0 %v3082_v7 }
0x2390   :  { %v3085_v47 = vsel %vm134_vm0, %v3081_v36, 0.0 }
0x2391   :  { %3086 = vadd.xlane.f32.xlu1 %v3085_v47 }
0x241c   :  { %v3084_v53 = vpop.xlane.xlu0 %3083 }
0x241d   :  { %v3088_v9 = vmul.f32 0.03125, %v3084_v53 }
0x241e   :  { %v3087_v49 = vpop.xlane.xlu1 %3086 }
0x241f   :  { %v3090_v56 = vadd.f32 1e-05, %v3088_v9  ;;  %v3089_v10 = vmul.f32 0.03125, %v3087_v49 }
0x2421   :  { %3918 = vrsqrt.f32 %v3090_v56  ;;  %v3091_v11 = vadd.f32 1e-05, %v3089_v10 }
0x2423   :  { %3920 = vrsqrt.f32 %v3091_v11 }
0x242b   :  { %v3919_v52 = vpop.eup %3918 }
0x242c   :  { %v3094_v59 = vmul.f32 %v3919_v52, %v3078_v3 }
0x242d   :  { %v3921_v12 = vpop.eup %3920 }
0x242e   :  { %v3102_v13 = vmul.f32 %v3315_v37, %v3094_v59  ;;  %v3095_v62 = vmul.f32 %v3921_v12, %v3079_v5 }
0x2430   :  { %v3103_v34 = vmul.f32 %v3315_v37, %v3095_v62  ;;  %v3110_v15 = vadd.f32 %v3316_v14, %v3102_v13 }
0x2432   :  { %v3111_v16 = vadd.f32 %v3316_v14, %v3103_v34 }
0x2434   :  { %v3112_v17 = vpack.c.bf16 %v3111_v16, %v3110_v15 }
0x2436   :  { %3755 = vmatmul.mubr.msk.bf16.vlgmr.msra.gmra.mrb[100].mxu1 %vm134_vm0, %v3112_v17 }
0x2509   :  { %v3173_v42 = vpop.f32.mrb[100].mxu1 }
0x250a   :  { %v3174_v19 = vadd.f32 %v3317_v18, %v3173_v42  ;;  %v3756_v20 = vpop.f32.mrb[101].mxu1 }
0x250b   :  { %v3176_v21 = vpop.f32.mrb[102].mxu1 }
0x250c   :  { %3180 = vst [vmem:[#allocation2] sm:$0xff] %v3174_v19  ;;  %v3177_v22 = vadd.f32 %v3317_v18, %v3176_v21  ;;  %v3757_v23 = vpop.f32.mrb[103].mxu1 }
0x250e   :  { %3181 = vst [vmem:[#allocation2 + $0x8] sm:$0xff] %v3177_v22 }
0x250f   :  { %3933 = shalt.err (!%p3930_p4)
}
0x2510   :  { %s3934_s12 = scalar_lea.hbm %s4145_s4, 256 }
0x2511   :  { %p3935_p5 = scmp.ne.s32.totalorder %s4145_s4, %s3934_s12  ;;  %p3938_p6 = scmp.lt.u32.totalorder %s3934_s12, %s4145_s4 }
0x2513   :  { %p3940_p7 = pnand %p3938_p6, %p3935_p5 }
0x2515   :  { %3943 = shalt.err (!%p3940_p7)
}
0x2516   :  { %s3990_s27 = smov 128   ;;  %s3991_s1 = smov 8  }
0x2517   :  { %3193 = dma.vmem_to_hbm [thread:$0]  %s3188_s26, 256, %s4145_s4, [#allocation3], %s3990_s27, %s3990_s27, %s3991_s1  }
0x2518   :  { %3944 = dma.done.wait [#allocation3], 256  }
0x2519   :  { %3945 = vsyncadd [#allocation3], 4294967040 }
0x251a   :  { %3197 = vsyncpa [#allocation3], 1 }

</bundles_post_ra>
